<compile_context>
chip_gen: v7x
topology: tpu7x:2x2x1
jax: 0.10.0
libtpu: 0.0.40
codegen_flags: <defaults>
</compile_context>

<pallas_src>
import functools

import jax
import jax.numpy as jnp
from jax.experimental import pallas as pl
from jax.experimental.pallas import tpu as pltpu

# ---- synthetic "roberta-base"-like config (tiny) ----
HIDDEN = 32
HEADS = 4
HEAD_DIM = HIDDEN // HEADS
LAYERS = 2
FFN = 64
VOCAB = 64
MAX_POS = 16
LN_EPS = 1e-5
PAD = 128            # lane-dense output width for pooler / RTD head outputs


# -------------------- fused Pallas kernel --------------------

def _ln(x, g, b):
    mu = jnp.mean(x, axis=-1, keepdims=True)
    var = jnp.mean(jnp.square(x - mu), axis=-1, keepdims=True)
    return (x - mu) * jax.lax.rsqrt(var + LN_EPS) * g + b


def _fused_encoder_kernel(emb_ref, bias_ref, eg_ref, eb_ref,
                          wqkv_ref, bqkv_ref, wo3_ref, bo_ref,
                          ln1g_ref, ln1b_ref, w1_ref, b1_ref,
                          w2_ref, b2_ref, ln2g_ref, ln2b_ref,
                          encpw_ref, encpb_ref, pw_ref, pb_ref,
                          rw_ref, rb_ref,
                          pooled_ref, rtd_ref,
                          *, n_ex, seq, heads, head_dim):
    hid = heads * head_dim
    tokens = n_ex * seq

    h = _ln(emb_ref[...], eg_ref[...], eb_ref[...])            # (T, H) f32
    # Block-diagonal additive key mask, broadcast across heads exactly once.
    bias_h = jnp.broadcast_to(bias_ref[...][None], (heads, tokens, tokens))

    # NOTE: at real roberta-base sizes this all-layers-resident design should move the
    # layer index onto an 'arbitrary' grid axis with per-layer weight BlockSpecs.
    for l in range(LAYERS):
        hb = h.astype(jnp.bfloat16)
        # Fused QKV projection: one (T,H)x(H,3H) bf16 MXU matmul, f32 accumulation.
        # 1/sqrt(head_dim) is already folded into the Q columns of wqkv.
        qkv = (jnp.dot(hb, wqkv_ref[l], preferred_element_type=jnp.float32)
               + bqkv_ref[l]).astype(jnp.bfloat16)             # (T, 3H)

        def split_heads(base):
            # Stack per-head lane slices onto a NEW leading axis -> (heads, T, d);
            # every downstream contraction is then head-batched (leading batch dim).
            return jnp.stack(
                [qkv[:, base + hh * head_dim: base + (hh + 1) * head_dim]
                 for hh in range(heads)], axis=0)

        q_h = split_heads(0)
        k_h = split_heads(hid)
        v_h = split_heads(2 * hid)

        s = jnp.einsum("hqd,hkd->hqk", q_h, k_h,
                       preferred_element_type=jnp.float32) + bias_h
        s = s - jnp.max(s, axis=-1, keepdims=True)
        p = jnp.exp(s)
        p = p * pl.reciprocal(jnp.sum(p, axis=-1, keepdims=True), approx=True)

        ctx = jnp.einsum("hqk,hkd->hqd", p.astype(jnp.bfloat16), v_h,
                         preferred_element_type=jnp.float32)    # (heads, T, d)
        per_head = jnp.einsum("hqd,hdc->hqc", ctx.astype(jnp.bfloat16), wo3_ref[l],
                              preferred_element_type=jnp.float32)  # (heads, T, H)
        attn_out = sum(per_head[hh] for hh in range(heads)) + bo_ref[l]
        h = _ln(h + attn_out, ln1g_ref[l], ln1b_ref[l])

        ff = jnp.dot(h.astype(jnp.bfloat16), w1_ref[l],
                     preferred_element_type=jnp.float32) + b1_ref[l]
        # TODO(synk): PyTorch nn.GELU defaults to the exact erf form; the tanh
        # approximation is used here (EUP-friendly), a small systematic deviation.
        ff = jax.nn.gelu(ff, approximate=True)
        ff = jnp.dot(ff.astype(jnp.bfloat16), w2_ref[l],
                     preferred_element_type=jnp.float32) + b2_ref[l]
        h = _ln(h + ff, ln2g_ref[l], ln2b_ref[l])

    hb = h.astype(jnp.bfloat16)

    # RTD head over all tokens; weights zero-padded to 128 cols -> full-width vst,
    # bf16 writeback halves the only non-trivial HBM store.
    rtd_ref[...] = (jnp.dot(hb, rw_ref[...], preferred_element_type=jnp.float32)
                    + rb_ref[...]).astype(rtd_ref.dtype)

    # CLS pooling via one-hot selection matmul (no reshape/copy of the activations).
    tok_idx = jax.lax.broadcasted_iota(jnp.int32, (n_ex, tokens), 1)
    cls_idx = jax.lax.broadcasted_iota(jnp.int32, (n_ex, tokens), 0) * seq
    sel = (tok_idx == cls_idx).astype(jnp.bfloat16)             # (n_ex, T)
    cls = jnp.dot(sel, hb, preferred_element_type=jnp.float32).astype(jnp.bfloat16)

    # encoder.pooler (dense+tanh on CLS), then model pooler (dense+tanh), 128-padded.
    enc_pooled = jnp.tanh(
        jnp.dot(cls, encpw_ref[...], preferred_element_type=jnp.float32)
        + encpb_ref[...])
    # TODO(synk): nn.Dropout(0.2) on the pooled output is identity (eval semantics).
    pooled = jnp.tanh(
        jnp.dot(enc_pooled.astype(jnp.bfloat16), pw_ref[...],
                preferred_element_type=jnp.float32) + pb_ref[...])
    pooled_ref[...] = pooled.astype(pooled_ref.dtype)


def _fused_forward(params, emb, bias_tt, n_ex, seq):
    tokens = n_ex * seq
    L = LAYERS

    def full(shape):
        nd = len(shape)
        return pl.BlockSpec(shape, lambda i: (0,) * nd)

    kern = functools.partial(_fused_encoder_kernel, n_ex=n_ex, seq=seq,
                             heads=HEADS, head_dim=HEAD_DIM)

    pooled_pad, rtd_pad = pl.pallas_call(
        kern,
        grid=(1,),                 # both branches folded into one fused step
        in_specs=[
            full((tokens, HIDDEN)),                      # embeddings (pre-LN)
            full((tokens, tokens)),                      # block-diag additive mask
            full((1, HIDDEN)), full((1, HIDDEN)),        # embedding LN
            full((L, HIDDEN, 3 * HIDDEN)), full((L, 1, 3 * HIDDEN)),    # fused QKV
            full((L, HEADS, HEAD_DIM, HIDDEN)), full((L, 1, HIDDEN)),   # attn out proj
            full((L, 1, HIDDEN)), full((L, 1, HIDDEN)),  # LN1
            full((L, HIDDEN, FFN)), full((L, 1, FFN)),   # FFN in
            full((L, FFN, HIDDEN)), full((L, 1, HIDDEN)),  # FFN out
            full((L, 1, HIDDEN)), full((L, 1, HIDDEN)),  # LN2
            full((HIDDEN, HIDDEN)), full((1, HIDDEN)),   # encoder pooler
            full((HIDDEN, PAD)), full((1, PAD)),         # model pooler (lane-padded)
            full((HIDDEN, PAD)), full((1, PAD)),         # RTD head (lane-padded)
        ],
        out_specs=[
            full((n_ex, PAD)),
            full((tokens, PAD)),
        ],
        out_shape=[
            jax.ShapeDtypeStruct((n_ex, PAD), jnp.float32),
            jax.ShapeDtypeStruct((tokens, PAD), jnp.bfloat16),
        ],
        compiler_params=pltpu.CompilerParams(
            dimension_semantics=("arbitrary",),
            vmem_limit_bytes=32 * 1024 * 1024,
        ),
    )(emb, bias_tt,
      params["emb_ln_g"], params["emb_ln_b"],
      params["wqkv"], params["bqkv"], params["wo3"], params["bo"],
      params["ln1_g"], params["ln1_b"], params["w1"], params["b1"],
      params["w2"], params["b2"], params["ln2_g"], params["ln2_b"],
      params["enc_pool_w"], params["enc_pool_b"],
      params["pooler_w"], params["pooler_b"],
      params["rtd_w"], params["rtd_b"])
    return pooled_pad, rtd_pad


# -------------------- model wrapper (glue in JAX, compute in the fused kernel) -----

def diffcse_forward(params, input_ids, attention_mask,
                    augmented_input_ids=None, augmented_attention_mask=None):
    B, S = input_ids.shape
    have_aug = (augmented_input_ids is not None and augmented_attention_mask is not None)
    if have_aug:
        ids = jnp.concatenate([input_ids, augmented_input_ids], axis=0)
        mask = jnp.concatenate([attention_mask, augmented_attention_mask], axis=0)
    else:
        ids, mask = input_ids, attention_mask
    n_ex = ids.shape[0]
    tokens = n_ex * S

    # Embedding lookup + positional add (single tiny gather) feeding the fused kernel.
    pos = params["pos_emb"][:S]
    emb = (params["tok_emb"][ids] + pos[None, :, :]).reshape(tokens, HIDDEN)

    # Additive attention mask for the folded token slab: block-diagonal (T, T) that
    # only lets queries attend to non-padded keys of their own example.
    ex_id = jnp.repeat(jnp.arange(n_ex), S)
    key_ok = mask.reshape(tokens).astype(bool)
    bias_tt = jnp.where((ex_id[:, None] == ex_id[None, :]) & key_ok[None, :],
                        0.0, -1e9).astype(jnp.float32)

    pooled_pad, rtd_pad = _fused_forward(params, emb, bias_tt, n_ex, S)

    pooled_all = pooled_pad[:, :HIDDEN]
    rtd_all = rtd_pad[:, :VOCAB].astype(jnp.float32).reshape(n_ex, S, VOCAB)

    pooled, rtd_logits = pooled_all[:B], rtd_all[:B]
    if have_aug:
        return pooled, rtd_logits, pooled_all[B:], rtd_all[B:]
    return pooled, rtd_logits, None, None


# -------------------- deterministic parameter init --------------------

def init_params(key):
    keys = iter(jax.random.split(key, 32))

    def w_init(kin, kout):
        return jax.random.normal(next(keys), (kin, kout), jnp.float32) * 0.02

    scale = 1.0 / float(HEAD_DIM) ** 0.5

    wqkv, wo3, w1, w2 = [], [], [], []
    for _ in range(LAYERS):
        wq = w_init(HIDDEN, HIDDEN) * scale        # 1/sqrt(head_dim) folded into Q
        wk = w_init(HIDDEN, HIDDEN)
        wv = w_init(HIDDEN, HIDDEN)
        wqkv.append(jnp.concatenate([wq, wk, wv], axis=1))               # (H, 3H)
        wo3.append(w_init(HIDDEN, HIDDEN).reshape(HEADS, HEAD_DIM, HIDDEN))
        w1.append(w_init(HIDDEN, FFN))
        w2.append(w_init(FFN, HIDDEN))

    def zeros_stack(cols):
        return jnp.zeros((LAYERS, 1, cols), jnp.float32)

    def ones_stack(cols):
        return jnp.ones((LAYERS, 1, cols), jnp.float32)

    def pad_head(w, width=PAD):
        return jnp.zeros((w.shape[0], width), jnp.float32).at[:, :w.shape[1]].set(w)

    bf16 = jnp.bfloat16
    return {
        "tok_emb": w_init(VOCAB, HIDDEN),
        "pos_emb": w_init(MAX_POS, HIDDEN),
        "emb_ln_g": jnp.ones((1, HIDDEN), jnp.float32),
        "emb_ln_b": jnp.zeros((1, HIDDEN), jnp.float32),
        "wqkv": jnp.stack(wqkv).astype(bf16),
        # q-third of bqkv would also carry the 1/sqrt(d) scale if it were non-zero.
        "bqkv": jnp.zeros((LAYERS, 1, 3 * HIDDEN), jnp.float32),
        "wo3": jnp.stack(wo3).astype(bf16), "bo": zeros_stack(HIDDEN),
        "ln1_g": ones_stack(HIDDEN), "ln1_b": zeros_stack(HIDDEN),
        "w1": jnp.stack(w1).astype(bf16), "b1": zeros_stack(FFN),
        "w2": jnp.stack(w2).astype(bf16), "b2": zeros_stack(HIDDEN),
        "ln2_g": ones_stack(HIDDEN), "ln2_b": zeros_stack(HIDDEN),
        "enc_pool_w": w_init(HIDDEN, HIDDEN).astype(bf16),
        "enc_pool_b": jnp.zeros((1, HIDDEN), jnp.float32),
        "pooler_w": pad_head(w_init(HIDDEN, HIDDEN)).astype(bf16),
        "pooler_b": jnp.zeros((1, PAD), jnp.float32),
        "rtd_w": pad_head(w_init(HIDDEN, VOCAB)).astype(bf16),
        "rtd_b": jnp.zeros((1, PAD), jnp.float32),
    }


if __name__ == "__main__":
    key = jax.random.PRNGKey(0)
    pkey, ikey, akey = jax.random.split(key, 3)
    params = init_params(pkey)

    B, S = 2, 8
    input_ids = jax.random.randint(ikey, (B, S), 0, VOCAB, dtype=jnp.int32)
    attention_mask = jnp.ones((B, S), jnp.int32).at[:, 6:].set(0)
    aug_ids = jax.random.randint(akey, (B, S), 0, VOCAB, dtype=jnp.int32)
    aug_mask = jnp.ones((B, S), jnp.int32).at[:, 7:].set(0)

    fwd = jax.jit(diffcse_forward)
    pooled, rtd, aug_pooled, aug_rtd = fwd(params, input_ids, attention_mask,
                                           aug_ids, aug_mask)
    jax.block_until_ready((pooled, rtd, aug_pooled, aug_rtd))

    assert pooled.shape == (B, HIDDEN)
    assert rtd.shape == (B, S, VOCAB)
    assert aug_pooled.shape == (B, HIDDEN)
    assert aug_rtd.shape == (B, S, VOCAB)
    assert bool(jnp.all(jnp.isfinite(pooled))) and bool(jnp.all(jnp.isfinite(rtd)))
    assert bool(jnp.all(jnp.isfinite(aug_pooled))) and bool(jnp.all(jnp.isfinite(aug_rtd)))
    print("KERNEL_OK")
</pallas_src>

<mosaic_0001>
module attributes {stable_mosaic.version = 11 : i64} {
  func.func @_fused_encoder_kernel(%arg0: i32, %arg1: memref<32x32xf32, #tpu.memory_space<vmem>>, %arg2: memref<32x32xf32, #tpu.memory_space<vmem>>, %arg3: memref<1x32xf32, #tpu.memory_space<vmem>>, %arg4: memref<1x32xf32, #tpu.memory_space<vmem>>, %arg5: memref<2x32x96xbf16, #tpu.memory_space<vmem>>, %arg6: memref<2x1x96xf32, #tpu.memory_space<vmem>>, %arg7: memref<2x4x8x32xbf16, #tpu.memory_space<vmem>>, %arg8: memref<2x1x32xf32, #tpu.memory_space<vmem>>, %arg9: memref<2x1x32xf32, #tpu.memory_space<vmem>>, %arg10: memref<2x1x32xf32, #tpu.memory_space<vmem>>, %arg11: memref<2x32x64xbf16, #tpu.memory_space<vmem>>, %arg12: memref<2x1x64xf32, #tpu.memory_space<vmem>>, %arg13: memref<2x64x32xbf16, #tpu.memory_space<vmem>>, %arg14: memref<2x1x32xf32, #tpu.memory_space<vmem>>, %arg15: memref<2x1x32xf32, #tpu.memory_space<vmem>>, %arg16: memref<2x1x32xf32, #tpu.memory_space<vmem>>, %arg17: memref<32x32xbf16, #tpu.memory_space<vmem>>, %arg18: memref<1x32xf32, #tpu.memory_space<vmem>>, %arg19: memref<32x128xbf16, #tpu.memory_space<vmem>>, %arg20: memref<1x128xf32, #tpu.memory_space<vmem>>, %arg21: memref<32x128xbf16, #tpu.memory_space<vmem>>, %arg22: memref<1x128xf32, #tpu.memory_space<vmem>>, %arg23: memref<4x128xf32, #tpu.memory_space<vmem>>, %arg24: memref<32x128xbf16, #tpu.memory_space<vmem>>) attributes {dimension_semantics = [#tpu.dimension_semantics<arbitrary>], iteration_bounds = array<i64: 1>, scalar_prefetch = 0 : i64, scratch_operands = 0 : i64, tpu.core_type = #tpu.core_type<tc>, window_params = [{pipeline_mode = #tpu.pipeline_mode<synchronous>, transform_indices = @transform_0, window_bounds = array<i64: 32, 32>}, {pipeline_mode = #tpu.pipeline_mode<synchronous>, transform_indices = @transform_1, window_bounds = array<i64: 32, 32>}, {pipeline_mode = #tpu.pipeline_mode<synchronous>, transform_indices = @transform_2, window_bounds = array<i64: 1, 32>}, {pipeline_mode = #tpu.pipeline_mode<synchronous>, transform_indices = @transform_3, window_bounds = array<i64: 1, 32>}, {pipeline_mode = #tpu.pipeline_mode<synchronous>, transform_indices = @transform_4, window_bounds = array<i64: 2, 32, 96>}, {pipeline_mode = #tpu.pipeline_mode<synchronous>, transform_indices = @transform_5, window_bounds = array<i64: 2, 1, 96>}, {pipeline_mode = #tpu.pipeline_mode<synchronous>, transform_indices = @transform_6, window_bounds = array<i64: 2, 4, 8, 32>}, {pipeline_mode = #tpu.pipeline_mode<synchronous>, transform_indices = @transform_7, window_bounds = array<i64: 2, 1, 32>}, {pipeline_mode = #tpu.pipeline_mode<synchronous>, transform_indices = @transform_8, window_bounds = array<i64: 2, 1, 32>}, {pipeline_mode = #tpu.pipeline_mode<synchronous>, transform_indices = @transform_9, window_bounds = array<i64: 2, 1, 32>}, {pipeline_mode = #tpu.pipeline_mode<synchronous>, transform_indices = @transform_10, window_bounds = array<i64: 2, 32, 64>}, {pipeline_mode = #tpu.pipeline_mode<synchronous>, transform_indices = @transform_11, window_bounds = array<i64: 2, 1, 64>}, {pipeline_mode = #tpu.pipeline_mode<synchronous>, transform_indices = @transform_12, window_bounds = array<i64: 2, 64, 32>}, {pipeline_mode = #tpu.pipeline_mode<synchronous>, transform_indices = @transform_13, window_bounds = array<i64: 2, 1, 32>}, {pipeline_mode = #tpu.pipeline_mode<synchronous>, transform_indices = @transform_14, window_bounds = array<i64: 2, 1, 32>}, {pipeline_mode = #tpu.pipeline_mode<synchronous>, transform_indices = @transform_15, window_bounds = array<i64: 2, 1, 32>}, {pipeline_mode = #tpu.pipeline_mode<synchronous>, transform_indices = @transform_16, window_bounds = array<i64: 32, 32>}, {pipeline_mode = #tpu.pipeline_mode<synchronous>, transform_indices = @transform_17, window_bounds = array<i64: 1, 32>}, {pipeline_mode = #tpu.pipeline_mode<synchronous>, transform_indices = @transform_18, window_bounds = array<i64: 32, 128>}, {pipeline_mode = #tpu.pipeline_mode<synchronous>, transform_indices = @transform_19, window_bounds = array<i64: 1, 128>}, {pipeline_mode = #tpu.pipeline_mode<synchronous>, transform_indices = @transform_20, window_bounds = array<i64: 32, 128>}, {pipeline_mode = #tpu.pipeline_mode<synchronous>, transform_indices = @transform_21, window_bounds = array<i64: 1, 128>}, {pipeline_mode = #tpu.pipeline_mode<synchronous>, transform_indices = @transform_22, window_bounds = array<i64: 4, 128>}, {pipeline_mode = #tpu.pipeline_mode<synchronous>, transform_indices = @transform_23, window_bounds = array<i64: 32, 128>}]} {
    %c0 = arith.constant 0 : index
    %c0_0 = arith.constant 0 : index
    %0 = vector.load %arg1[%c0, %c0_0] : memref<32x32xf32, #tpu.memory_space<vmem>>, vector<32x32xf32>
    %c0_1 = arith.constant 0 : index
    %c0_2 = arith.constant 0 : index
    %1 = vector.load %arg3[%c0_1, %c0_2] : memref<1x32xf32, #tpu.memory_space<vmem>>, vector<1x32xf32>
    %c0_3 = arith.constant 0 : index
    %c0_4 = arith.constant 0 : index
    %2 = vector.load %arg4[%c0_3, %c0_4] : memref<1x32xf32, #tpu.memory_space<vmem>>, vector<1x32xf32>
    %cst = arith.constant dense<0.000000e+00> : vector<32xf32>
    %3 = vector.multi_reduction <add>, %0, %cst [1] : vector<32x32xf32> to vector<32xf32>
    %4 = vector.shape_cast %3 : vector<32xf32> to vector<32x1xf32>
    %cst_5 = arith.constant 3.200000e+01 : f32
    %5 = vector.broadcast %cst_5 : f32 to vector<32x1xf32>
    %6 = arith.divf %4, %5 : vector<32x1xf32>
    %7 = vector.broadcast %6 : vector<32x1xf32> to vector<32x32xf32>
    %8 = arith.subf %0, %7 : vector<32x32xf32>
    %9 = arith.mulf %8, %8 : vector<32x32xf32>
    %cst_6 = arith.constant dense<0.000000e+00> : vector<32xf32>
    %10 = vector.multi_reduction <add>, %9, %cst_6 [1] : vector<32x32xf32> to vector<32xf32>
    %11 = vector.shape_cast %10 : vector<32xf32> to vector<32x1xf32>
    %cst_7 = arith.constant 3.200000e+01 : f32
    %12 = vector.broadcast %cst_7 : f32 to vector<32x1xf32>
    %13 = arith.divf %11, %12 : vector<32x1xf32>
    %14 = vector.broadcast %6 : vector<32x1xf32> to vector<32x32xf32>
    %15 = arith.subf %0, %14 : vector<32x32xf32>
    %cst_8 = arith.constant 9.99999974E-6 : f32
    %16 = vector.broadcast %cst_8 : f32 to vector<32x1xf32>
    %17 = arith.addf %13, %16 : vector<32x1xf32>
    %18 = math.rsqrt %17 : vector<32x1xf32>
    %19 = vector.broadcast %18 : vector<32x1xf32> to vector<32x32xf32>
    %20 = arith.mulf %15, %19 : vector<32x32xf32>
    %21 = vector.broadcast %1 : vector<1x32xf32> to vector<32x32xf32>
    %22 = arith.mulf %20, %21 : vector<32x32xf32>
    %23 = vector.broadcast %2 : vector<1x32xf32> to vector<32x32xf32>
    %24 = arith.addf %22, %23 : vector<32x32xf32>
    %c0_9 = arith.constant 0 : index
    %c0_10 = arith.constant 0 : index
    %25 = vector.load %arg2[%c0_9, %c0_10] : memref<32x32xf32, #tpu.memory_space<vmem>>, vector<32x32xf32>
    %26 = vector.shape_cast %25 : vector<32x32xf32> to vector<1x32x32xf32>
    %27 = vector.shape_cast %26 : vector<1x32x32xf32> to vector<1x32x32xf32>
    %28 = vector.broadcast %27 : vector<1x32x32xf32> to vector<4x32x32xf32>
    %29 = arith.truncf %24 : vector<32x32xf32> to vector<32x32xbf16>
    %c0_11 = arith.constant 0 : index
    %c0_12 = arith.constant 0 : index
    %c0_13 = arith.constant 0 : index
    %30 = vector.load %arg5[%c0_11, %c0_12, %c0_13] : memref<2x32x96xbf16, #tpu.memory_space<vmem>>, vector<1x32x96xbf16>
    %31 = vector.shape_cast %30 : vector<1x32x96xbf16> to vector<32x96xbf16>
    %cst_14 = arith.constant dense<0.000000e+00> : vector<32x96xf32>
    %32 = tpu.matmul %29, %31, %cst_14 {dimension_numbers = #tpu.dot_dimension_numbers<[1], [0], [0], [1], [0, 0, 1, 1], [], []>} : vector<32x32xbf16>, vector<32x96xbf16>, vector<32x96xf32> -> vector<32x96xf32>
    %c0_15 = arith.constant 0 : index
    %c0_16 = arith.constant 0 : index
    %c0_17 = arith.constant 0 : index
    %33 = vector.load %arg6[%c0_15, %c0_16, %c0_17] : memref<2x1x96xf32, #tpu.memory_space<vmem>>, vector<1x1x96xf32>
    %34 = vector.shape_cast %33 : vector<1x1x96xf32> to vector<1x96xf32>
    %35 = vector.broadcast %34 : vector<1x96xf32> to vector<32x96xf32>
    %36 = arith.addf %32, %35 : vector<32x96xf32>
    %37 = arith.truncf %36 : vector<32x96xf32> to vector<32x96xbf16>
    %38 = vector.extract_strided_slice %37 {offsets = [0, 0], sizes = [32, 8], strides = [1, 1]} : vector<32x96xbf16> to vector<32x8xbf16>
    %39 = vector.extract_strided_slice %37 {offsets = [0, 8], sizes = [32, 8], strides = [1, 1]} : vector<32x96xbf16> to vector<32x8xbf16>
    %40 = vector.extract_strided_slice %37 {offsets = [0, 16], sizes = [32, 8], strides = [1, 1]} : vector<32x96xbf16> to vector<32x8xbf16>
    %41 = vector.extract_strided_slice %37 {offsets = [0, 24], sizes = [32, 8], strides = [1, 1]} : vector<32x96xbf16> to vector<32x8xbf16>
    %42 = vector.shape_cast %38 : vector<32x8xbf16> to vector<1x32x8xbf16>
    %43 = vector.shape_cast %39 : vector<32x8xbf16> to vector<1x32x8xbf16>
    %44 = vector.shape_cast %40 : vector<32x8xbf16> to vector<1x32x8xbf16>
    %45 = vector.shape_cast %41 : vector<32x8xbf16> to vector<1x32x8xbf16>
    %46 = tpu.concatenate %42, %43, %44, %45 in 0 : vector<1x32x8xbf16>, vector<1x32x8xbf16>, vector<1x32x8xbf16>, vector<1x32x8xbf16> -> vector<4x32x8xbf16>
    %47 = vector.extract_strided_slice %37 {offsets = [0, 32], sizes = [32, 8], strides = [1, 1]} : vector<32x96xbf16> to vector<32x8xbf16>
    %48 = vector.extract_strided_slice %37 {offsets = [0, 40], sizes = [32, 8], strides = [1, 1]} : vector<32x96xbf16> to vector<32x8xbf16>
    %49 = vector.extract_strided_slice %37 {offsets = [0, 48], sizes = [32, 8], strides = [1, 1]} : vector<32x96xbf16> to vector<32x8xbf16>
    %50 = vector.extract_strided_slice %37 {offsets = [0, 56], sizes = [32, 8], strides = [1, 1]} : vector<32x96xbf16> to vector<32x8xbf16>
    %51 = vector.shape_cast %47 : vector<32x8xbf16> to vector<1x32x8xbf16>
    %52 = vector.shape_cast %48 : vector<32x8xbf16> to vector<1x32x8xbf16>
    %53 = vector.shape_cast %49 : vector<32x8xbf16> to vector<1x32x8xbf16>
    %54 = vector.shape_cast %50 : vector<32x8xbf16> to vector<1x32x8xbf16>
    %55 = tpu.concatenate %51, %52, %53, %54 in 0 : vector<1x32x8xbf16>, vector<1x32x8xbf16>, vector<1x32x8xbf16>, vector<1x32x8xbf16> -> vector<4x32x8xbf16>
    %56 = vector.extract_strided_slice %37 {offsets = [0, 64], sizes = [32, 8], strides = [1, 1]} : vector<32x96xbf16> to vector<32x8xbf16>
    %57 = vector.extract_strided_slice %37 {offsets = [0, 72], sizes = [32, 8], strides = [1, 1]} : vector<32x96xbf16> to vector<32x8xbf16>
    %58 = vector.extract_strided_slice %37 {offsets = [0, 80], sizes = [32, 8], strides = [1, 1]} : vector<32x96xbf16> to vector<32x8xbf16>
    %59 = vector.extract_strided_slice %37 {offsets = [0, 88], sizes = [32, 8], strides = [1, 1]} : vector<32x96xbf16> to vector<32x8xbf16>
    %60 = vector.shape_cast %56 : vector<32x8xbf16> to vector<1x32x8xbf16>
    %61 = vector.shape_cast %57 : vector<32x8xbf16> to vector<1x32x8xbf16>
    %62 = vector.shape_cast %58 : vector<32x8xbf16> to vector<1x32x8xbf16>
    %63 = vector.shape_cast %59 : vector<32x8xbf16> to vector<1x32x8xbf16>
    %64 = tpu.concatenate %60, %61, %62, %63 in 0 : vector<1x32x8xbf16>, vector<1x32x8xbf16>, vector<1x32x8xbf16>, vector<1x32x8xbf16> -> vector<4x32x8xbf16>
    "tpu.trace_start"() <{level = 10 : i32, message = "hqd,hkd->hqk"}> : () -> ()
    %cst_18 = arith.constant dense<0.000000e+00> : vector<4x32x32xf32>
    %65 = tpu.matmul %46, %55, %cst_18 {dimension_numbers = #tpu.dot_dimension_numbers<[2], [2], [1], [1], [0, 0, 0, 1, 1, 1], [0], [0]>} : vector<4x32x8xbf16>, vector<4x32x8xbf16>, vector<4x32x32xf32> -> vector<4x32x32xf32>
    "tpu.trace_stop"() : () -> ()
    %66 = arith.addf %65, %28 : vector<4x32x32xf32>
    %cst_19 = arith.constant dense<0xFF800000> : vector<4x32xf32>
    %67 = vector.multi_reduction <maximumf>, %66, %cst_19 [2] : vector<4x32x32xf32> to vector<4x32xf32>
    %68 = vector.shape_cast %67 : vector<4x32xf32> to vector<4x32x1xf32>
    %69 = vector.broadcast %68 : vector<4x32x1xf32> to vector<4x32x32xf32>
    %70 = arith.subf %66, %69 : vector<4x32x32xf32>
    %71 = math.exp %70 : vector<4x32x32xf32>
    %cst_20 = arith.constant dense<0.000000e+00> : vector<4x32xf32>
    %72 = vector.multi_reduction <add>, %71, %cst_20 [2] : vector<4x32x32xf32> to vector<4x32xf32>
    %73 = vector.shape_cast %72 : vector<4x32xf32> to vector<4x32x1xf32>
    %74 = tpu.reciprocal %73 {approx = true} : vector<4x32x1xf32> -> vector<4x32x1xf32>
    %75 = vector.broadcast %74 : vector<4x32x1xf32> to vector<4x32x32xf32>
    %76 = arith.mulf %71, %75 : vector<4x32x32xf32>
    %77 = arith.truncf %76 : vector<4x32x32xf32> to vector<4x32x32xbf16>
    "tpu.trace_start"() <{level = 10 : i32, message = "hqk,hkd->hqd"}> : () -> ()
    %cst_21 = arith.constant dense<0.000000e+00> : vector<4x32x8xf32>
    %78 = tpu.matmul %77, %64, %cst_21 {dimension_numbers = #tpu.dot_dimension_numbers<[2], [1], [1], [2], [0, 0, 0, 1, 1, 2], [0], [0]>} : vector<4x32x32xbf16>, vector<4x32x8xbf16>, vector<4x32x8xf32> -> vector<4x32x8xf32>
    "tpu.trace_stop"() : () -> ()
    %79 = arith.truncf %78 : vector<4x32x8xf32> to vector<4x32x8xbf16>
    %c0_22 = arith.constant 0 : index
    %c0_23 = arith.constant 0 : index
    %c0_24 = arith.constant 0 : index
    %c0_25 = arith.constant 0 : index
    %80 = vector.load %arg7[%c0_22, %c0_23, %c0_24, %c0_25] : memref<2x4x8x32xbf16, #tpu.memory_space<vmem>>, vector<1x4x8x32xbf16>
    %81 = vector.shape_cast %80 : vector<1x4x8x32xbf16> to vector<4x8x32xbf16>
    "tpu.trace_start"() <{level = 10 : i32, message = "hqd,hdc->hqc"}> : () -> ()
    %cst_26 = arith.constant dense<0.000000e+00> : vector<4x32x32xf32>
    %82 = tpu.matmul %79, %81, %cst_26 {dimension_numbers = #tpu.dot_dimension_numbers<[2], [1], [1], [2], [0, 0, 0, 1, 1, 2], [0], [0]>} : vector<4x32x8xbf16>, vector<4x8x32xbf16>, vector<4x32x32xf32> -> vector<4x32x32xf32>
    "tpu.trace_stop"() : () -> ()
    %83 = vector.extract_strided_slice %82 {offsets = [0, 0, 0], sizes = [1, 32, 32], strides = [1, 1, 1]} : vector<4x32x32xf32> to vector<1x32x32xf32>
    %84 = vector.shape_cast %83 : vector<1x32x32xf32> to vector<32x32xf32>
    %cst_27 = arith.constant 0.000000e+00 : f32
    %85 = vector.broadcast %cst_27 : f32 to vector<32x32xf32>
    %86 = arith.addf %85, %84 : vector<32x32xf32>
    %87 = vector.extract_strided_slice %82 {offsets = [1, 0, 0], sizes = [1, 32, 32], strides = [1, 1, 1]} : vector<4x32x32xf32> to vector<1x32x32xf32>
    %88 = vector.shape_cast %87 : vector<1x32x32xf32> to vector<32x32xf32>
    %89 = arith.addf %86, %88 : vector<32x32xf32>
    %90 = vector.extract_strided_slice %82 {offsets = [2, 0, 0], sizes = [1, 32, 32], strides = [1, 1, 1]} : vector<4x32x32xf32> to vector<1x32x32xf32>
    %91 = vector.shape_cast %90 : vector<1x32x32xf32> to vector<32x32xf32>
    %92 = arith.addf %89, %91 : vector<32x32xf32>
    %93 = vector.extract_strided_slice %82 {offsets = [3, 0, 0], sizes = [1, 32, 32], strides = [1, 1, 1]} : vector<4x32x32xf32> to vector<1x32x32xf32>
    %94 = vector.shape_cast %93 : vector<1x32x32xf32> to vector<32x32xf32>
    %95 = arith.addf %92, %94 : vector<32x32xf32>
    %c0_28 = arith.constant 0 : index
    %c0_29 = arith.constant 0 : index
    %c0_30 = arith.constant 0 : index
    %96 = vector.load %arg8[%c0_28, %c0_29, %c0_30] : memref<2x1x32xf32, #tpu.memory_space<vmem>>, vector<1x1x32xf32>
    %97 = vector.shape_cast %96 : vector<1x1x32xf32> to vector<1x32xf32>
    %98 = vector.broadcast %97 : vector<1x32xf32> to vector<32x32xf32>
    %99 = arith.addf %95, %98 : vector<32x32xf32>
    %100 = arith.addf %24, %99 : vector<32x32xf32>
    %c0_31 = arith.constant 0 : index
    %c0_32 = arith.constant 0 : index
    %c0_33 = arith.constant 0 : index
    %101 = vector.load %arg9[%c0_31, %c0_32, %c0_33] : memref<2x1x32xf32, #tpu.memory_space<vmem>>, vector<1x1x32xf32>
    %102 = vector.shape_cast %101 : vector<1x1x32xf32> to vector<1x32xf32>
    %c0_34 = arith.constant 0 : index
    %c0_35 = arith.constant 0 : index
    %c0_36 = arith.constant 0 : index
    %103 = vector.load %arg10[%c0_34, %c0_35, %c0_36] : memref<2x1x32xf32, #tpu.memory_space<vmem>>, vector<1x1x32xf32>
    %104 = vector.shape_cast %103 : vector<1x1x32xf32> to vector<1x32xf32>
    %cst_37 = arith.constant dense<0.000000e+00> : vector<32xf32>
    %105 = vector.multi_reduction <add>, %100, %cst_37 [1] : vector<32x32xf32> to vector<32xf32>
    %106 = vector.shape_cast %105 : vector<32xf32> to vector<32x1xf32>
    %cst_38 = arith.constant 3.200000e+01 : f32
    %107 = vector.broadcast %cst_38 : f32 to vector<32x1xf32>
    %108 = arith.divf %106, %107 : vector<32x1xf32>
    %109 = vector.broadcast %108 : vector<32x1xf32> to vector<32x32xf32>
    %110 = arith.subf %100, %109 : vector<32x32xf32>
    %111 = arith.mulf %110, %110 : vector<32x32xf32>
    %cst_39 = arith.constant dense<0.000000e+00> : vector<32xf32>
    %112 = vector.multi_reduction <add>, %111, %cst_39 [1] : vector<32x32xf32> to vector<32xf32>
    %113 = vector.shape_cast %112 : vector<32xf32> to vector<32x1xf32>
    %cst_40 = arith.constant 3.200000e+01 : f32
    %114 = vector.broadcast %cst_40 : f32 to vector<32x1xf32>
    %115 = arith.divf %113, %114 : vector<32x1xf32>
    %116 = vector.broadcast %108 : vector<32x1xf32> to vector<32x32xf32>
    %117 = arith.subf %100, %116 : vector<32x32xf32>
    %cst_41 = arith.constant 9.99999974E-6 : f32
    %118 = vector.broadcast %cst_41 : f32 to vector<32x1xf32>
    %119 = arith.addf %115, %118 : vector<32x1xf32>
    %120 = math.rsqrt %119 : vector<32x1xf32>
    %121 = vector.broadcast %120 : vector<32x1xf32> to vector<32x32xf32>
    %122 = arith.mulf %117, %121 : vector<32x32xf32>
    %123 = vector.broadcast %102 : vector<1x32xf32> to vector<32x32xf32>
    %124 = arith.mulf %122, %123 : vector<32x32xf32>
    %125 = vector.broadcast %104 : vector<1x32xf32> to vector<32x32xf32>
    %126 = arith.addf %124, %125 : vector<32x32xf32>
    %127 = arith.truncf %126 : vector<32x32xf32> to vector<32x32xbf16>
    %c0_42 = arith.constant 0 : index
    %c0_43 = arith.constant 0 : index
    %c0_44 = arith.constant 0 : index
    %128 = vector.load %arg11[%c0_42, %c0_43, %c0_44] : memref<2x32x64xbf16, #tpu.memory_space<vmem>>, vector<1x32x64xbf16>
    %129 = vector.shape_cast %128 : vector<1x32x64xbf16> to vector<32x64xbf16>
    %cst_45 = arith.constant dense<0.000000e+00> : vector<32x64xf32>
    %130 = tpu.matmul %127, %129, %cst_45 {dimension_numbers = #tpu.dot_dimension_numbers<[1], [0], [0], [1], [0, 0, 1, 1], [], []>} : vector<32x32xbf16>, vector<32x64xbf16>, vector<32x64xf32> -> vector<32x64xf32>
    %c0_46 = arith.constant 0 : index
    %c0_47 = arith.constant 0 : index
    %c0_48 = arith.constant 0 : index
    %131 = vector.load %arg12[%c0_46, %c0_47, %c0_48] : memref<2x1x64xf32, #tpu.memory_space<vmem>>, vector<1x1x64xf32>
    %132 = vector.shape_cast %131 : vector<1x1x64xf32> to vector<1x64xf32>
    %133 = vector.broadcast %132 : vector<1x64xf32> to vector<32x64xf32>
    %134 = arith.addf %130, %133 : vector<32x64xf32>
    %135 = arith.mulf %134, %134 : vector<32x64xf32>
    %136 = arith.mulf %134, %135 : vector<32x64xf32>
    %cst_49 = arith.constant 4.471500e-02 : f32
    %137 = vector.broadcast %cst_49 : f32 to vector<32x64xf32>
    %138 = arith.mulf %137, %136 : vector<32x64xf32>
    %139 = arith.addf %134, %138 : vector<32x64xf32>
    %cst_50 = arith.constant 0.797884583 : f32
    %140 = vector.broadcast %cst_50 : f32 to vector<32x64xf32>
    %141 = arith.mulf %140, %139 : vector<32x64xf32>
    %142 = math.tanh %141 : vector<32x64xf32>
    %cst_51 = arith.constant 1.000000e+00 : f32
    %143 = vector.broadcast %cst_51 : f32 to vector<32x64xf32>
    %144 = arith.addf %143, %142 : vector<32x64xf32>
    %cst_52 = arith.constant 5.000000e-01 : f32
    %145 = vector.broadcast %cst_52 : f32 to vector<32x64xf32>
    %146 = arith.mulf %145, %144 : vector<32x64xf32>
    %147 = arith.mulf %134, %146 : vector<32x64xf32>
    %148 = arith.truncf %147 : vector<32x64xf32> to vector<32x64xbf16>
    %c0_53 = arith.constant 0 : index
    %c0_54 = arith.constant 0 : index
    %c0_55 = arith.constant 0 : index
    %149 = vector.load %arg13[%c0_53, %c0_54, %c0_55] : memref<2x64x32xbf16, #tpu.memory_space<vmem>>, vector<1x64x32xbf16>
    %150 = vector.shape_cast %149 : vector<1x64x32xbf16> to vector<64x32xbf16>
    %cst_56 = arith.constant dense<0.000000e+00> : vector<32x32xf32>
    %151 = tpu.matmul %148, %150, %cst_56 {dimension_numbers = #tpu.dot_dimension_numbers<[1], [0], [0], [1], [0, 0, 1, 1], [], []>} : vector<32x64xbf16>, vector<64x32xbf16>, vector<32x32xf32> -> vector<32x32xf32>
    %c0_57 = arith.constant 0 : index
    %c0_58 = arith.constant 0 : index
    %c0_59 = arith.constant 0 : index
    %152 = vector.load %arg14[%c0_57, %c0_58, %c0_59] : memref<2x1x32xf32, #tpu.memory_space<vmem>>, vector<1x1x32xf32>
    %153 = vector.shape_cast %152 : vector<1x1x32xf32> to vector<1x32xf32>
    %154 = vector.broadcast %153 : vector<1x32xf32> to vector<32x32xf32>
    %155 = arith.addf %151, %154 : vector<32x32xf32>
    %156 = arith.addf %126, %155 : vector<32x32xf32>
    %c0_60 = arith.constant 0 : index
    %c0_61 = arith.constant 0 : index
    %c0_62 = arith.constant 0 : index
    %157 = vector.load %arg15[%c0_60, %c0_61, %c0_62] : memref<2x1x32xf32, #tpu.memory_space<vmem>>, vector<1x1x32xf32>
    %158 = vector.shape_cast %157 : vector<1x1x32xf32> to vector<1x32xf32>
    %c0_63 = arith.constant 0 : index
    %c0_64 = arith.constant 0 : index
    %c0_65 = arith.constant 0 : index
    %159 = vector.load %arg16[%c0_63, %c0_64, %c0_65] : memref<2x1x32xf32, #tpu.memory_space<vmem>>, vector<1x1x32xf32>
    %160 = vector.shape_cast %159 : vector<1x1x32xf32> to vector<1x32xf32>
    %cst_66 = arith.constant dense<0.000000e+00> : vector<32xf32>
    %161 = vector.multi_reduction <add>, %156, %cst_66 [1] : vector<32x32xf32> to vector<32xf32>
    %162 = vector.shape_cast %161 : vector<32xf32> to vector<32x1xf32>
    %cst_67 = arith.constant 3.200000e+01 : f32
    %163 = vector.broadcast %cst_67 : f32 to vector<32x1xf32>
    %164 = arith.divf %162, %163 : vector<32x1xf32>
    %165 = vector.broadcast %164 : vector<32x1xf32> to vector<32x32xf32>
    %166 = arith.subf %156, %165 : vector<32x32xf32>
    %167 = arith.mulf %166, %166 : vector<32x32xf32>
    %cst_68 = arith.constant dense<0.000000e+00> : vector<32xf32>
    %168 = vector.multi_reduction <add>, %167, %cst_68 [1] : vector<32x32xf32> to vector<32xf32>
    %169 = vector.shape_cast %168 : vector<32xf32> to vector<32x1xf32>
    %cst_69 = arith.constant 3.200000e+01 : f32
    %170 = vector.broadcast %cst_69 : f32 to vector<32x1xf32>
    %171 = arith.divf %169, %170 : vector<32x1xf32>
    %172 = vector.broadcast %164 : vector<32x1xf32> to vector<32x32xf32>
    %173 = arith.subf %156, %172 : vector<32x32xf32>
    %cst_70 = arith.constant 9.99999974E-6 : f32
    %174 = vector.broadcast %cst_70 : f32 to vector<32x1xf32>
    %175 = arith.addf %171, %174 : vector<32x1xf32>
    %176 = math.rsqrt %175 : vector<32x1xf32>
    %177 = vector.broadcast %176 : vector<32x1xf32> to vector<32x32xf32>
    %178 = arith.mulf %173, %177 : vector<32x32xf32>
    %179 = vector.broadcast %158 : vector<1x32xf32> to vector<32x32xf32>
    %180 = arith.mulf %178, %179 : vector<32x32xf32>
    %181 = vector.broadcast %160 : vector<1x32xf32> to vector<32x32xf32>
    %182 = arith.addf %180, %181 : vector<32x32xf32>
    %183 = arith.truncf %182 : vector<32x32xf32> to vector<32x32xbf16>
    %c1 = arith.constant 1 : index
    %c0_71 = arith.constant 0 : index
    %c0_72 = arith.constant 0 : index
    %184 = vector.load %arg5[%c1, %c0_71, %c0_72] : memref<2x32x96xbf16, #tpu.memory_space<vmem>>, vector<1x32x96xbf16>
    %185 = vector.shape_cast %184 : vector<1x32x96xbf16> to vector<32x96xbf16>
    %cst_73 = arith.constant dense<0.000000e+00> : vector<32x96xf32>
    %186 = tpu.matmul %183, %185, %cst_73 {dimension_numbers = #tpu.dot_dimension_numbers<[1], [0], [0], [1], [0, 0, 1, 1], [], []>} : vector<32x32xbf16>, vector<32x96xbf16>, vector<32x96xf32> -> vector<32x96xf32>
    %c1_74 = arith.constant 1 : index
    %c0_75 = arith.constant 0 : index
    %c0_76 = arith.constant 0 : index
    %187 = vector.load %arg6[%c1_74, %c0_75, %c0_76] : memref<2x1x96xf32, #tpu.memory_space<vmem>>, vector<1x1x96xf32>
    %188 = vector.shape_cast %187 : vector<1x1x96xf32> to vector<1x96xf32>
    %189 = vector.broadcast %188 : vector<1x96xf32> to vector<32x96xf32>
    %190 = arith.addf %186, %189 : vector<32x96xf32>
    %191 = arith.truncf %190 : vector<32x96xf32> to vector<32x96xbf16>
    %192 = vector.extract_strided_slice %191 {offsets = [0, 0], sizes = [32, 8], strides = [1, 1]} : vector<32x96xbf16> to vector<32x8xbf16>
    %193 = vector.extract_strided_slice %191 {offsets = [0, 8], sizes = [32, 8], strides = [1, 1]} : vector<32x96xbf16> to vector<32x8xbf16>
    %194 = vector.extract_strided_slice %191 {offsets = [0, 16], sizes = [32, 8], strides = [1, 1]} : vector<32x96xbf16> to vector<32x8xbf16>
    %195 = vector.extract_strided_slice %191 {offsets = [0, 24], sizes = [32, 8], strides = [1, 1]} : vector<32x96xbf16> to vector<32x8xbf16>
    %196 = vector.shape_cast %192 : vector<32x8xbf16> to vector<1x32x8xbf16>
    %197 = vector.shape_cast %193 : vector<32x8xbf16> to vector<1x32x8xbf16>
    %198 = vector.shape_cast %194 : vector<32x8xbf16> to vector<1x32x8xbf16>
    %199 = vector.shape_cast %195 : vector<32x8xbf16> to vector<1x32x8xbf16>
    %200 = tpu.concatenate %196, %197, %198, %199 in 0 : vector<1x32x8xbf16>, vector<1x32x8xbf16>, vector<1x32x8xbf16>, vector<1x32x8xbf16> -> vector<4x32x8xbf16>
    %201 = vector.extract_strided_slice %191 {offsets = [0, 32], sizes = [32, 8], strides = [1, 1]} : vector<32x96xbf16> to vector<32x8xbf16>
    %202 = vector.extract_strided_slice %191 {offsets = [0, 40], sizes = [32, 8], strides = [1, 1]} : vector<32x96xbf16> to vector<32x8xbf16>
    %203 = vector.extract_strided_slice %191 {offsets = [0, 48], sizes = [32, 8], strides = [1, 1]} : vector<32x96xbf16> to vector<32x8xbf16>
    %204 = vector.extract_strided_slice %191 {offsets = [0, 56], sizes = [32, 8], strides = [1, 1]} : vector<32x96xbf16> to vector<32x8xbf16>
    %205 = vector.shape_cast %201 : vector<32x8xbf16> to vector<1x32x8xbf16>
    %206 = vector.shape_cast %202 : vector<32x8xbf16> to vector<1x32x8xbf16>
    %207 = vector.shape_cast %203 : vector<32x8xbf16> to vector<1x32x8xbf16>
    %208 = vector.shape_cast %204 : vector<32x8xbf16> to vector<1x32x8xbf16>
    %209 = tpu.concatenate %205, %206, %207, %208 in 0 : vector<1x32x8xbf16>, vector<1x32x8xbf16>, vector<1x32x8xbf16>, vector<1x32x8xbf16> -> vector<4x32x8xbf16>
    %210 = vector.extract_strided_slice %191 {offsets = [0, 64], sizes = [32, 8], strides = [1, 1]} : vector<32x96xbf16> to vector<32x8xbf16>
    %211 = vector.extract_strided_slice %191 {offsets = [0, 72], sizes = [32, 8], strides = [1, 1]} : vector<32x96xbf16> to vector<32x8xbf16>
    %212 = vector.extract_strided_slice %191 {offsets = [0, 80], sizes = [32, 8], strides = [1, 1]} : vector<32x96xbf16> to vector<32x8xbf16>
    %213 = vector.extract_strided_slice %191 {offsets = [0, 88], sizes = [32, 8], strides = [1, 1]} : vector<32x96xbf16> to vector<32x8xbf16>
    %214 = vector.shape_cast %210 : vector<32x8xbf16> to vector<1x32x8xbf16>
    %215 = vector.shape_cast %211 : vector<32x8xbf16> to vector<1x32x8xbf16>
    %216 = vector.shape_cast %212 : vector<32x8xbf16> to vector<1x32x8xbf16>
    %217 = vector.shape_cast %213 : vector<32x8xbf16> to vector<1x32x8xbf16>
    %218 = tpu.concatenate %214, %215, %216, %217 in 0 : vector<1x32x8xbf16>, vector<1x32x8xbf16>, vector<1x32x8xbf16>, vector<1x32x8xbf16> -> vector<4x32x8xbf16>
    "tpu.trace_start"() <{level = 10 : i32, message = "hqd,hkd->hqk"}> : () -> ()
    %cst_77 = arith.constant dense<0.000000e+00> : vector<4x32x32xf32>
    %219 = tpu.matmul %200, %209, %cst_77 {dimension_numbers = #tpu.dot_dimension_numbers<[2], [2], [1], [1], [0, 0, 0, 1, 1, 1], [0], [0]>} : vector<4x32x8xbf16>, vector<4x32x8xbf16>, vector<4x32x32xf32> -> vector<4x32x32xf32>
    "tpu.trace_stop"() : () -> ()
    %220 = arith.addf %219, %28 : vector<4x32x32xf32>
    %cst_78 = arith.constant dense<0xFF800000> : vector<4x32xf32>
    %221 = vector.multi_reduction <maximumf>, %220, %cst_78 [2] : vector<4x32x32xf32> to vector<4x32xf32>
    %222 = vector.shape_cast %221 : vector<4x32xf32> to vector<4x32x1xf32>
    %223 = vector.broadcast %222 : vector<4x32x1xf32> to vector<4x32x32xf32>
    %224 = arith.subf %220, %223 : vector<4x32x32xf32>
    %225 = math.exp %224 : vector<4x32x32xf32>
    %cst_79 = arith.constant dense<0.000000e+00> : vector<4x32xf32>
    %226 = vector.multi_reduction <add>, %225, %cst_79 [2] : vector<4x32x32xf32> to vector<4x32xf32>
    %227 = vector.shape_cast %226 : vector<4x32xf32> to vector<4x32x1xf32>
    %228 = tpu.reciprocal %227 {approx = true} : vector<4x32x1xf32> -> vector<4x32x1xf32>
    %229 = vector.broadcast %228 : vector<4x32x1xf32> to vector<4x32x32xf32>
    %230 = arith.mulf %225, %229 : vector<4x32x32xf32>
    %231 = arith.truncf %230 : vector<4x32x32xf32> to vector<4x32x32xbf16>
    "tpu.trace_start"() <{level = 10 : i32, message = "hqk,hkd->hqd"}> : () -> ()
    %cst_80 = arith.constant dense<0.000000e+00> : vector<4x32x8xf32>
    %232 = tpu.matmul %231, %218, %cst_80 {dimension_numbers = #tpu.dot_dimension_numbers<[2], [1], [1], [2], [0, 0, 0, 1, 1, 2], [0], [0]>} : vector<4x32x32xbf16>, vector<4x32x8xbf16>, vector<4x32x8xf32> -> vector<4x32x8xf32>
    "tpu.trace_stop"() : () -> ()
    %233 = arith.truncf %232 : vector<4x32x8xf32> to vector<4x32x8xbf16>
    %c1_81 = arith.constant 1 : index
    %c0_82 = arith.constant 0 : index
    %c0_83 = arith.constant 0 : index
    %c0_84 = arith.constant 0 : index
    %234 = vector.load %arg7[%c1_81, %c0_82, %c0_83, %c0_84] : memref<2x4x8x32xbf16, #tpu.memory_space<vmem>>, vector<1x4x8x32xbf16>
    %235 = vector.shape_cast %234 : vector<1x4x8x32xbf16> to vector<4x8x32xbf16>
    "tpu.trace_start"() <{level = 10 : i32, message = "hqd,hdc->hqc"}> : () -> ()
    %cst_85 = arith.constant dense<0.000000e+00> : vector<4x32x32xf32>
    %236 = tpu.matmul %233, %235, %cst_85 {dimension_numbers = #tpu.dot_dimension_numbers<[2], [1], [1], [2], [0, 0, 0, 1, 1, 2], [0], [0]>} : vector<4x32x8xbf16>, vector<4x8x32xbf16>, vector<4x32x32xf32> -> vector<4x32x32xf32>
    "tpu.trace_stop"() : () -> ()
    %237 = vector.extract_strided_slice %236 {offsets = [0, 0, 0], sizes = [1, 32, 32], strides = [1, 1, 1]} : vector<4x32x32xf32> to vector<1x32x32xf32>
    %238 = vector.shape_cast %237 : vector<1x32x32xf32> to vector<32x32xf32>
    %cst_86 = arith.constant 0.000000e+00 : f32
    %239 = vector.broadcast %cst_86 : f32 to vector<32x32xf32>
    %240 = arith.addf %239, %238 : vector<32x32xf32>
    %241 = vector.extract_strided_slice %236 {offsets = [1, 0, 0], sizes = [1, 32, 32], strides = [1, 1, 1]} : vector<4x32x32xf32> to vector<1x32x32xf32>
    %242 = vector.shape_cast %241 : vector<1x32x32xf32> to vector<32x32xf32>
    %243 = arith.addf %240, %242 : vector<32x32xf32>
    %244 = vector.extract_strided_slice %236 {offsets = [2, 0, 0], sizes = [1, 32, 32], strides = [1, 1, 1]} : vector<4x32x32xf32> to vector<1x32x32xf32>
    %245 = vector.shape_cast %244 : vector<1x32x32xf32> to vector<32x32xf32>
    %246 = arith.addf %243, %245 : vector<32x32xf32>
    %247 = vector.extract_strided_slice %236 {offsets = [3, 0, 0], sizes = [1, 32, 32], strides = [1, 1, 1]} : vector<4x32x32xf32> to vector<1x32x32xf32>
    %248 = vector.shape_cast %247 : vector<1x32x32xf32> to vector<32x32xf32>
    %249 = arith.addf %246, %248 : vector<32x32xf32>
    %c1_87 = arith.constant 1 : index
    %c0_88 = arith.constant 0 : index
    %c0_89 = arith.constant 0 : index
    %250 = vector.load %arg8[%c1_87, %c0_88, %c0_89] : memref<2x1x32xf32, #tpu.memory_space<vmem>>, vector<1x1x32xf32>
    %251 = vector.shape_cast %250 : vector<1x1x32xf32> to vector<1x32xf32>
    %252 = vector.broadcast %251 : vector<1x32xf32> to vector<32x32xf32>
    %253 = arith.addf %249, %252 : vector<32x32xf32>
    %254 = arith.addf %182, %253 : vector<32x32xf32>
    %c1_90 = arith.constant 1 : index
    %c0_91 = arith.constant 0 : index
    %c0_92 = arith.constant 0 : index
    %255 = vector.load %arg9[%c1_90, %c0_91, %c0_92] : memref<2x1x32xf32, #tpu.memory_space<vmem>>, vector<1x1x32xf32>
    %256 = vector.shape_cast %255 : vector<1x1x32xf32> to vector<1x32xf32>
    %c1_93 = arith.constant 1 : index
    %c0_94 = arith.constant 0 : index
    %c0_95 = arith.constant 0 : index
    %257 = vector.load %arg10[%c1_93, %c0_94, %c0_95] : memref<2x1x32xf32, #tpu.memory_space<vmem>>, vector<1x1x32xf32>
    %258 = vector.shape_cast %257 : vector<1x1x32xf32> to vector<1x32xf32>
    %cst_96 = arith.constant dense<0.000000e+00> : vector<32xf32>
    %259 = vector.multi_reduction <add>, %254, %cst_96 [1] : vector<32x32xf32> to vector<32xf32>
    %260 = vector.shape_cast %259 : vector<32xf32> to vector<32x1xf32>
    %cst_97 = arith.constant 3.200000e+01 : f32
    %261 = vector.broadcast %cst_97 : f32 to vector<32x1xf32>
    %262 = arith.divf %260, %261 : vector<32x1xf32>
    %263 = vector.broadcast %262 : vector<32x1xf32> to vector<32x32xf32>
    %264 = arith.subf %254, %263 : vector<32x32xf32>
    %265 = arith.mulf %264, %264 : vector<32x32xf32>
    %cst_98 = arith.constant dense<0.000000e+00> : vector<32xf32>
    %266 = vector.multi_reduction <add>, %265, %cst_98 [1] : vector<32x32xf32> to vector<32xf32>
    %267 = vector.shape_cast %266 : vector<32xf32> to vector<32x1xf32>
    %cst_99 = arith.constant 3.200000e+01 : f32
    %268 = vector.broadcast %cst_99 : f32 to vector<32x1xf32>
    %269 = arith.divf %267, %268 : vector<32x1xf32>
    %270 = vector.broadcast %262 : vector<32x1xf32> to vector<32x32xf32>
    %271 = arith.subf %254, %270 : vector<32x32xf32>
    %cst_100 = arith.constant 9.99999974E-6 : f32
    %272 = vector.broadcast %cst_100 : f32 to vector<32x1xf32>
    %273 = arith.addf %269, %272 : vector<32x1xf32>
    %274 = math.rsqrt %273 : vector<32x1xf32>
    %275 = vector.broadcast %274 : vector<32x1xf32> to vector<32x32xf32>
    %276 = arith.mulf %271, %275 : vector<32x32xf32>
    %277 = vector.broadcast %256 : vector<1x32xf32> to vector<32x32xf32>
    %278 = arith.mulf %276, %277 : vector<32x32xf32>
    %279 = vector.broadcast %258 : vector<1x32xf32> to vector<32x32xf32>
    %280 = arith.addf %278, %279 : vector<32x32xf32>
    %281 = arith.truncf %280 : vector<32x32xf32> to vector<32x32xbf16>
    %c1_101 = arith.constant 1 : index
    %c0_102 = arith.constant 0 : index
    %c0_103 = arith.constant 0 : index
    %282 = vector.load %arg11[%c1_101, %c0_102, %c0_103] : memref<2x32x64xbf16, #tpu.memory_space<vmem>>, vector<1x32x64xbf16>
    %283 = vector.shape_cast %282 : vector<1x32x64xbf16> to vector<32x64xbf16>
    %cst_104 = arith.constant dense<0.000000e+00> : vector<32x64xf32>
    %284 = tpu.matmul %281, %283, %cst_104 {dimension_numbers = #tpu.dot_dimension_numbers<[1], [0], [0], [1], [0, 0, 1, 1], [], []>} : vector<32x32xbf16>, vector<32x64xbf16>, vector<32x64xf32> -> vector<32x64xf32>
    %c1_105 = arith.constant 1 : index
    %c0_106 = arith.constant 0 : index
    %c0_107 = arith.constant 0 : index
    %285 = vector.load %arg12[%c1_105, %c0_106, %c0_107] : memref<2x1x64xf32, #tpu.memory_space<vmem>>, vector<1x1x64xf32>
    %286 = vector.shape_cast %285 : vector<1x1x64xf32> to vector<1x64xf32>
    %287 = vector.broadcast %286 : vector<1x64xf32> to vector<32x64xf32>
    %288 = arith.addf %284, %287 : vector<32x64xf32>
    %289 = arith.mulf %288, %288 : vector<32x64xf32>
    %290 = arith.mulf %288, %289 : vector<32x64xf32>
    %cst_108 = arith.constant 4.471500e-02 : f32
    %291 = vector.broadcast %cst_108 : f32 to vector<32x64xf32>
    %292 = arith.mulf %291, %290 : vector<32x64xf32>
    %293 = arith.addf %288, %292 : vector<32x64xf32>
    %cst_109 = arith.constant 0.797884583 : f32
    %294 = vector.broadcast %cst_109 : f32 to vector<32x64xf32>
    %295 = arith.mulf %294, %293 : vector<32x64xf32>
    %296 = math.tanh %295 : vector<32x64xf32>
    %cst_110 = arith.constant 1.000000e+00 : f32
    %297 = vector.broadcast %cst_110 : f32 to vector<32x64xf32>
    %298 = arith.addf %297, %296 : vector<32x64xf32>
    %cst_111 = arith.constant 5.000000e-01 : f32
    %299 = vector.broadcast %cst_111 : f32 to vector<32x64xf32>
    %300 = arith.mulf %299, %298 : vector<32x64xf32>
    %301 = arith.mulf %288, %300 : vector<32x64xf32>
    %302 = arith.truncf %301 : vector<32x64xf32> to vector<32x64xbf16>
    %c1_112 = arith.constant 1 : index
    %c0_113 = arith.constant 0 : index
    %c0_114 = arith.constant 0 : index
    %303 = vector.load %arg13[%c1_112, %c0_113, %c0_114] : memref<2x64x32xbf16, #tpu.memory_space<vmem>>, vector<1x64x32xbf16>
    %304 = vector.shape_cast %303 : vector<1x64x32xbf16> to vector<64x32xbf16>
    %cst_115 = arith.constant dense<0.000000e+00> : vector<32x32xf32>
    %305 = tpu.matmul %302, %304, %cst_115 {dimension_numbers = #tpu.dot_dimension_numbers<[1], [0], [0], [1], [0, 0, 1, 1], [], []>} : vector<32x64xbf16>, vector<64x32xbf16>, vector<32x32xf32> -> vector<32x32xf32>
    %c1_116 = arith.constant 1 : index
    %c0_117 = arith.constant 0 : index
    %c0_118 = arith.constant 0 : index
    %306 = vector.load %arg14[%c1_116, %c0_117, %c0_118] : memref<2x1x32xf32, #tpu.memory_space<vmem>>, vector<1x1x32xf32>
    %307 = vector.shape_cast %306 : vector<1x1x32xf32> to vector<1x32xf32>
    %308 = vector.broadcast %307 : vector<1x32xf32> to vector<32x32xf32>
    %309 = arith.addf %305, %308 : vector<32x32xf32>
    %310 = arith.addf %280, %309 : vector<32x32xf32>
    %c1_119 = arith.constant 1 : index
    %c0_120 = arith.constant 0 : index
    %c0_121 = arith.constant 0 : index
    %311 = vector.load %arg15[%c1_119, %c0_120, %c0_121] : memref<2x1x32xf32, #tpu.memory_space<vmem>>, vector<1x1x32xf32>
    %312 = vector.shape_cast %311 : vector<1x1x32xf32> to vector<1x32xf32>
    %c1_122 = arith.constant 1 : index
    %c0_123 = arith.constant 0 : index
    %c0_124 = arith.constant 0 : index
    %313 = vector.load %arg16[%c1_122, %c0_123, %c0_124] : memref<2x1x32xf32, #tpu.memory_space<vmem>>, vector<1x1x32xf32>
    %314 = vector.shape_cast %313 : vector<1x1x32xf32> to vector<1x32xf32>
    %cst_125 = arith.constant dense<0.000000e+00> : vector<32xf32>
    %315 = vector.multi_reduction <add>, %310, %cst_125 [1] : vector<32x32xf32> to vector<32xf32>
    %316 = vector.shape_cast %315 : vector<32xf32> to vector<32x1xf32>
    %cst_126 = arith.constant 3.200000e+01 : f32
    %317 = vector.broadcast %cst_126 : f32 to vector<32x1xf32>
    %318 = arith.divf %316, %317 : vector<32x1xf32>
    %319 = vector.broadcast %318 : vector<32x1xf32> to vector<32x32xf32>
    %320 = arith.subf %310, %319 : vector<32x32xf32>
    %321 = arith.mulf %320, %320 : vector<32x32xf32>
    %cst_127 = arith.constant dense<0.000000e+00> : vector<32xf32>
    %322 = vector.multi_reduction <add>, %321, %cst_127 [1] : vector<32x32xf32> to vector<32xf32>
    %323 = vector.shape_cast %322 : vector<32xf32> to vector<32x1xf32>
    %cst_128 = arith.constant 3.200000e+01 : f32
    %324 = vector.broadcast %cst_128 : f32 to vector<32x1xf32>
    %325 = arith.divf %323, %324 : vector<32x1xf32>
    %326 = vector.broadcast %318 : vector<32x1xf32> to vector<32x32xf32>
    %327 = arith.subf %310, %326 : vector<32x32xf32>
    %cst_129 = arith.constant 9.99999974E-6 : f32
    %328 = vector.broadcast %cst_129 : f32 to vector<32x1xf32>
    %329 = arith.addf %325, %328 : vector<32x1xf32>
    %330 = math.rsqrt %329 : vector<32x1xf32>
    %331 = vector.broadcast %330 : vector<32x1xf32> to vector<32x32xf32>
    %332 = arith.mulf %327, %331 : vector<32x32xf32>
    %333 = vector.broadcast %312 : vector<1x32xf32> to vector<32x32xf32>
    %334 = arith.mulf %332, %333 : vector<32x32xf32>
    %335 = vector.broadcast %314 : vector<1x32xf32> to vector<32x32xf32>
    %336 = arith.addf %334, %335 : vector<32x32xf32>
    %337 = arith.truncf %336 : vector<32x32xf32> to vector<32x32xbf16>
    %c0_130 = arith.constant 0 : index
    %c0_131 = arith.constant 0 : index
    %338 = vector.load %arg21[%c0_130, %c0_131] : memref<32x128xbf16, #tpu.memory_space<vmem>>, vector<32x128xbf16>
    %cst_132 = arith.constant dense<0.000000e+00> : vector<32x128xf32>
    %339 = tpu.matmul %337, %338, %cst_132 {dimension_numbers = #tpu.dot_dimension_numbers<[1], [0], [0], [1], [0, 0, 1, 1], [], []>} : vector<32x32xbf16>, vector<32x128xbf16>, vector<32x128xf32> -> vector<32x128xf32>
    %c0_133 = arith.constant 0 : index
    %c0_134 = arith.constant 0 : index
    %340 = vector.load %arg22[%c0_133, %c0_134] : memref<1x128xf32, #tpu.memory_space<vmem>>, vector<1x128xf32>
    %341 = vector.broadcast %340 : vector<1x128xf32> to vector<32x128xf32>
    %342 = arith.addf %339, %341 : vector<32x128xf32>
    %343 = arith.truncf %342 : vector<32x128xf32> to vector<32x128xbf16>
    %c0_135 = arith.constant 0 : index
    %c0_136 = arith.constant 0 : index
    %344 = vector.load %arg24[%c0_135, %c0_136] : memref<32x128xbf16, #tpu.memory_space<vmem>>, vector<32x128xbf16>
    tpu.vector_store %arg24[%c0_135, %c0_136], %343 {strides = array<i32>} : memref<32x128xbf16, #tpu.memory_space<vmem>>, vector<32x128xbf16>,
    %345 = tpu.iota {dimensions = array<i32: 1>} : vector<4x32xi32>
    %346 = tpu.iota {dimensions = array<i32: 0>} : vector<4x32xi32>
    %c8_i32 = arith.constant 8 : i32
    %347 = vector.broadcast %c8_i32 : i32 to vector<4x32xi32>
    %348 = arith.muli %346, %347 : vector<4x32xi32>
    %349 = arith.cmpi eq, %345, %348 : vector<4x32xi32>
    %350 = arith.extui %349 : vector<4x32xi1> to vector<4x32xi32>
    %351 = arith.sitofp %350 : vector<4x32xi32> to vector<4x32xf32>
    %352 = arith.truncf %351 : vector<4x32xf32> to vector<4x32xbf16>
    %cst_137 = arith.constant dense<0.000000e+00> : vector<4x32xf32>
    %353 = tpu.matmul %352, %337, %cst_137 {dimension_numbers = #tpu.dot_dimension_numbers<[1], [0], [0], [1], [0, 0, 1, 1], [], []>} : vector<4x32xbf16>, vector<32x32xbf16>, vector<4x32xf32> -> vector<4x32xf32>
    %354 = arith.truncf %353 : vector<4x32xf32> to vector<4x32xbf16>
    %c0_138 = arith.constant 0 : index
    %c0_139 = arith.constant 0 : index
    %355 = vector.load %arg17[%c0_138, %c0_139] : memref<32x32xbf16, #tpu.memory_space<vmem>>, vector<32x32xbf16>
    %cst_140 = arith.constant dense<0.000000e+00> : vector<4x32xf32>
    %356 = tpu.matmul %354, %355, %cst_140 {dimension_numbers = #tpu.dot_dimension_numbers<[1], [0], [0], [1], [0, 0, 1, 1], [], []>} : vector<4x32xbf16>, vector<32x32xbf16>, vector<4x32xf32> -> vector<4x32xf32>
    %c0_141 = arith.constant 0 : index
    %c0_142 = arith.constant 0 : index
    %357 = vector.load %arg18[%c0_141, %c0_142] : memref<1x32xf32, #tpu.memory_space<vmem>>, vector<1x32xf32>
    %358 = vector.broadcast %357 : vector<1x32xf32> to vector<4x32xf32>
    %359 = arith.addf %356, %358 : vector<4x32xf32>
    %360 = math.tanh %359 : vector<4x32xf32>
    %361 = arith.truncf %360 : vector<4x32xf32> to vector<4x32xbf16>
    %c0_143 = arith.constant 0 : index
    %c0_144 = arith.constant 0 : index
    %362 = vector.load %arg19[%c0_143, %c0_144] : memref<32x128xbf16, #tpu.memory_space<vmem>>, vector<32x128xbf16>
    %cst_145 = arith.constant dense<0.000000e+00> : vector<4x128xf32>
    %363 = tpu.matmul %361, %362, %cst_145 {dimension_numbers = #tpu.dot_dimension_numbers<[1], [0], [0], [1], [0, 0, 1, 1], [], []>} : vector<4x32xbf16>, vector<32x128xbf16>, vector<4x128xf32> -> vector<4x128xf32>
    %c0_146 = arith.constant 0 : index
    %c0_147 = arith.constant 0 : index
    %364 = vector.load %arg20[%c0_146, %c0_147] : memref<1x128xf32, #tpu.memory_space<vmem>>, vector<1x128xf32>
    %365 = vector.broadcast %364 : vector<1x128xf32> to vector<4x128xf32>
    %366 = arith.addf %363, %365 : vector<4x128xf32>
    %367 = math.tanh %366 : vector<4x128xf32>
    %c0_148 = arith.constant 0 : index
    %c0_149 = arith.constant 0 : index
    %368 = vector.load %arg23[%c0_148, %c0_149] : memref<4x128xf32, #tpu.memory_space<vmem>>, vector<4x128xf32>
    tpu.vector_store %arg23[%c0_148, %c0_149], %367 {strides = array<i32>} : memref<4x128xf32, #tpu.memory_space<vmem>>, vector<4x128xf32>,
    return
  }
  func.func @transform_0(%arg0: i32) -> (i32, i32) {
    %c0_i32 = arith.constant 0 : i32
    %c0_i32_0 = arith.constant 0 : i32
    %c0_i32_1 = arith.constant 0 : i32
    return %c0_i32, %c0_i32_0 : i32, i32
  }
  func.func @transform_1(%arg0: i32) -> (i32, i32) {
    %c0_i32 = arith.constant 0 : i32
    %c0_i32_0 = arith.constant 0 : i32
    %c0_i32_1 = arith.constant 0 : i32
    return %c0_i32, %c0_i32_0 : i32, i32
  }
  func.func @transform_2(%arg0: i32) -> (i32, i32) {
    %c0_i32 = arith.constant 0 : i32
    %c0_i32_0 = arith.constant 0 : i32
    %c0_i32_1 = arith.constant 0 : i32
    return %c0_i32, %c0_i32_0 : i32, i32
  }
  func.func @transform_3(%arg0: i32) -> (i32, i32) {
    %c0_i32 = arith.constant 0 : i32
    %c0_i32_0 = arith.constant 0 : i32
    %c0_i32_1 = arith.constant 0 : i32
    return %c0_i32, %c0_i32_0 : i32, i32
  }
  func.func @transform_4(%arg0: i32) -> (i32, i32, i32) {
    %c0_i32 = arith.constant 0 : i32
    %c0_i32_0 = arith.constant 0 : i32
    %c0_i32_1 = arith.constant 0 : i32
    %c0_i32_2 = arith.constant 0 : i32
    return %c0_i32, %c0_i32_0, %c0_i32_1 : i32, i32, i32
  }
  func.func @transform_5(%arg0: i32) -> (i32, i32, i32) {
    %c0_i32 = arith.constant 0 : i32
    %c0_i32_0 = arith.constant 0 : i32
    %c0_i32_1 = arith.constant 0 : i32
    %c0_i32_2 = arith.constant 0 : i32
    return %c0_i32, %c0_i32_0, %c0_i32_1 : i32, i32, i32
  }
  func.func @transform_6(%arg0: i32) -> (i32, i32, i32, i32) {
    %c0_i32 = arith.constant 0 : i32
    %c0_i32_0 = arith.constant 0 : i32
    %c0_i32_1 = arith.constant 0 : i32
    %c0_i32_2 = arith.constant 0 : i32
    %c0_i32_3 = arith.constant 0 : i32
    return %c0_i32, %c0_i32_0, %c0_i32_1, %c0_i32_2 : i32, i32, i32, i32
  }
  func.func @transform_7(%arg0: i32) -> (i32, i32, i32) {
    %c0_i32 = arith.constant 0 : i32
    %c0_i32_0 = arith.constant 0 : i32
    %c0_i32_1 = arith.constant 0 : i32
    %c0_i32_2 = arith.constant 0 : i32
    return %c0_i32, %c0_i32_0, %c0_i32_1 : i32, i32, i32
  }
  func.func @transform_8(%arg0: i32) -> (i32, i32, i32) {
    %c0_i32 = arith.constant 0 : i32
    %c0_i32_0 = arith.constant 0 : i32
    %c0_i32_1 = arith.constant 0 : i32
    %c0_i32_2 = arith.constant 0 : i32
    return %c0_i32, %c0_i32_0, %c0_i32_1 : i32, i32, i32
  }
  func.func @transform_9(%arg0: i32) -> (i32, i32, i32) {
    %c0_i32 = arith.constant 0 : i32
    %c0_i32_0 = arith.constant 0 : i32
    %c0_i32_1 = arith.constant 0 : i32
    %c0_i32_2 = arith.constant 0 : i32
    return %c0_i32, %c0_i32_0, %c0_i32_1 : i32, i32, i32
  }
  func.func @transform_10(%arg0: i32) -> (i32, i32, i32) {
    %c0_i32 = arith.constant 0 : i32
    %c0_i32_0 = arith.constant 0 : i32
    %c0_i32_1 = arith.constant 0 : i32
    %c0_i32_2 = arith.constant 0 : i32
    return %c0_i32, %c0_i32_0, %c0_i32_1 : i32, i32, i32
  }
  func.func @transform_11(%arg0: i32) -> (i32, i32, i32) {
    %c0_i32 = arith.constant 0 : i32
    %c0_i32_0 = arith.constant 0 : i32
    %c0_i32_1 = arith.constant 0 : i32
    %c0_i32_2 = arith.constant 0 : i32
    return %c0_i32, %c0_i32_0, %c0_i32_1 : i32, i32, i32
  }
  func.func @transform_12(%arg0: i32) -> (i32, i32, i32) {
    %c0_i32 = arith.constant 0 : i32
    %c0_i32_0 = arith.constant 0 : i32
    %c0_i32_1 = arith.constant 0 : i32
    %c0_i32_2 = arith.constant 0 : i32
    return %c0_i32, %c0_i32_0, %c0_i32_1 : i32, i32, i32
  }
  func.func @transform_13(%arg0: i32) -> (i32, i32, i32) {
    %c0_i32 = arith.constant 0 : i32
    %c0_i32_0 = arith.constant 0 : i32
    %c0_i32_1 = arith.constant 0 : i32
    %c0_i32_2 = arith.constant 0 : i32
    return %c0_i32, %c0_i32_0, %c0_i32_1 : i32, i32, i32
  }
  func.func @transform_14(%arg0: i32) -> (i32, i32, i32) {
    %c0_i32 = arith.constant 0 : i32
    %c0_i32_0 = arith.constant 0 : i32
    %c0_i32_1 = arith.constant 0 : i32
    %c0_i32_2 = arith.constant 0 : i32
    return %c0_i32, %c0_i32_0, %c0_i32_1 : i32, i32, i32
  }
  func.func @transform_15(%arg0: i32) -> (i32, i32, i32) {
    %c0_i32 = arith.constant 0 : i32
    %c0_i32_0 = arith.constant 0 : i32
    %c0_i32_1 = arith.constant 0 : i32
    %c0_i32_2 = arith.constant 0 : i32
    return %c0_i32, %c0_i32_0, %c0_i32_1 : i32, i32, i32
  }
  func.func @transform_16(%arg0: i32) -> (i32, i32) {
    %c0_i32 = arith.constant 0 : i32
    %c0_i32_0 = arith.constant 0 : i32
    %c0_i32_1 = arith.constant 0 : i32
    return %c0_i32, %c0_i32_0 : i32, i32
  }
  func.func @transform_17(%arg0: i32) -> (i32, i32) {
    %c0_i32 = arith.constant 0 : i32
    %c0_i32_0 = arith.constant 0 : i32
    %c0_i32_1 = arith.constant 0 : i32
    return %c0_i32, %c0_i32_0 : i32, i32
  }
  func.func @transform_18(%arg0: i32) -> (i32, i32) {
    %c0_i32 = arith.constant 0 : i32
    %c0_i32_0 = arith.constant 0 : i32
    %c0_i32_1 = arith.constant 0 : i32
    return %c0_i32, %c0_i32_0 : i32, i32
  }
  func.func @transform_19(%arg0: i32) -> (i32, i32) {
    %c0_i32 = arith.constant 0 : i32
    %c0_i32_0 = arith.constant 0 : i32
    %c0_i32_1 = arith.constant 0 : i32
    return %c0_i32, %c0_i32_0 : i32, i32
  }
  func.func @transform_20(%arg0: i32) -> (i32, i32) {
    %c0_i32 = arith.constant 0 : i32
    %c0_i32_0 = arith.constant 0 : i32
    %c0_i32_1 = arith.constant 0 : i32
    return %c0_i32, %c0_i32_0 : i32, i32
  }
  func.func @transform_21(%arg0: i32) -> (i32, i32) {
    %c0_i32 = arith.constant 0 : i32
    %c0_i32_0 = arith.constant 0 : i32
    %c0_i32_1 = arith.constant 0 : i32
    return %c0_i32, %c0_i32_0 : i32, i32
  }
  func.func @transform_22(%arg0: i32) -> (i32, i32) {
    %c0_i32 = arith.constant 0 : i32
    %c0_i32_0 = arith.constant 0 : i32
    %c0_i32_1 = arith.constant 0 : i32
    return %c0_i32, %c0_i32_0 : i32, i32
  }
  func.func @transform_23(%arg0: i32) -> (i32, i32) {
    %c0_i32 = arith.constant 0 : i32
    %c0_i32_0 = arith.constant 0 : i32
    %c0_i32_1 = arith.constant 0 : i32
    return %c0_i32, %c0_i32_0 : i32, i32
  }
}

</mosaic_0001>

<bundles_post_ra>
// kernel: eq.8
= control target key start
LH: loop header
LB: loop body
LE: loop exit
PB: predicated region body
PF: predicated region fallthrough
CT: control target
= control target key end

     0   :  { %vm7_vm0 = vcmask 64512   ;;  %s37_s8 = smov 8   ;;  %s38_s9 = smov 16   ;;  %vm13_vm1 = vcmask 261312   ;;  %vm19_vm2 = vcmask 195712   ;;  %vm25_vm3 = vcmask 130112   ;;  %s55_s0 = inlined_call_operand.vmem [shape: s32[4,8], index: 0, kind: input, shape index: {}]   ;;  %s56_s1 = inlined_call_operand.vmem [shape: s32[32], index: 1, kind: output, shape index: {}]  }
   0x1   :  { %v4_v0 = vld [vmem:[%s55_s0] sm:$0xf]  ;;  %s36_s0 = smov 24  }
   0x2   :  { %5 = vst [vmem:[#allocation1] sm:$0xf] %v4_v0 }
   0x9   :  { %v10_v1 = vld [vmem:[#allocation1 + $0x3] sm:$0x1]   ;;  %v22_v2 = vld [vmem:[#allocation1 + $0x1] sm:$0x1]   ;;  %v6_v3 = vld [vmem:[#allocation1] sm:$0x1]  }
   0xa   :  { %11 = vrot.lane.b32.xlu0 %v10_v1, %s36_s0  ;;  %23 = vrot.lane.b32.xlu1 %v22_v2, %s37_s8  ;;  %v16_v4 = vld [vmem:[#allocation1 + $0x2] sm:$0x1]   ;;  %8 = vst.msk [vmem:[#allocation0] sm:$0x1] %vm7_vm0, %v6_v3  }
   0xe   :  { %17 = vrot.lane.b32.xlu0 %v16_v4, %s38_s9 }
  0x7c   :  { %v12_v5 = vpop.permute.xlu0 %11   ;;  %v24_v6 = vpop.permute.xlu1 %23  }
  0x7d   :  { %14 = vst.msk [vmem:[#allocation0] sm:$0x1] %vm13_vm1, %v12_v5  }
  0x80   :  { %v18_v7 = vpop.permute.xlu0 %17  }
  0x81   :  { %20 = vst.msk [vmem:[#allocation0] sm:$0x1] %vm19_vm2, %v18_v7  }
  0x82   :  { %26 = vst.msk [vmem:[#allocation0] sm:$0x1] %vm25_vm3, %v24_v6  }
  0x89   :  { %v30_v8 = vld [vmem:[#allocation0] sm:$0x1] }
  0x8a   :  { %32 = vst [vmem:[%s56_s1] sm:$0x1] %v30_v8 }

// kernel: diffcse_forward.1
= control target key start
LH: loop header
LB: loop body
LE: loop exit
PB: predicated region body
PF: predicated region fallthrough
CT: control target
= control target key end

     0   :  { %vm80_vm0 = vcmask 261120   ;;  %vm258_vm1 = vcmask 64512   ;;  %s4135_s27 = smov 112   ;;  %s5143_s29 = smov 96   ;;  %vm961_vm2 = vcmask 1043456   ;;  %vm1450_vm3 = vcmask 523264   ;;  %s5111_s0 = inlined_call_operand.vmem [shape: f32[32,32], index: 0, kind: input, shape index: {}]   ;;  %s5112_s4 = inlined_call_operand.vmem [shape: bf16[2,32,96], index: 4, kind: input, shape index: {}]   ;;  %s5113_s2 = inlined_call_operand.vmem [shape: f32[1,32], index: 2, kind: input, shape index: {}]   ;;  %s5114_s3 = inlined_call_operand.vmem [shape: f32[1,32], index: 3, kind: input, shape index: {}]   ;;  %s5115_s5 = inlined_call_operand.vmem [shape: f32[2,1,96], index: 5, kind: input, shape index: {}]   ;;  %s5116_s1 = inlined_call_operand.vmem [shape: f32[32,32], index: 1, kind: input, shape index: {}]   ;;  %s5117_s6 = inlined_call_operand.vmem [shape: bf16[2,4,8,32], index: 6, kind: input, shape index: {}]   ;;  %s5118_s7 = inlined_call_operand.vmem [shape: f32[2,1,32], index: 7, kind: input, shape index: {}]   ;;  %s5119_s10 = inlined_call_operand.vmem [shape: bf16[2,32,64], index: 10, kind: input, shape index: {}]   ;;  %s5120_s8 = inlined_call_operand.vmem [shape: f32[2,1,32], index: 8, kind: input, shape index: {}]   ;;  %s5121_s9 = inlined_call_operand.vmem [shape: f32[2,1,32], index: 9, kind: input, shape index: {}]   ;;  %s5122_s12 = inlined_call_operand.vmem [shape: bf16[2,64,32], index: 12, kind: input, shape index: {}]   ;;  %s5123_s11 = inlined_call_operand.vmem [shape: f32[2,1,64], index: 11, kind: input, shape index: {}]   ;;  %s5124_s13 = inlined_call_operand.vmem [shape: f32[2,1,32], index: 13, kind: input, shape index: {}]   ;;  %s5125_s14 = inlined_call_operand.vmem [shape: f32[2,1,32], index: 14, kind: input, shape index: {}]   ;;  %s5126_s15 = inlined_call_operand.vmem [shape: f32[2,1,32], index: 15, kind: input, shape index: {}]   ;;  %s5127_s20 = inlined_call_operand.vmem [shape: bf16[32,128], index: 20, kind: input, shape index: {}]   ;;  %s5128_s16 = inlined_call_operand.vmem [shape: bf16[32,32], index: 16, kind: input, shape index: {}]   ;;  %s5129_s21 = inlined_call_operand.vmem [shape: f32[1,128], index: 21, kind: input, shape index: {}]   ;;  %s5130_s23 = inlined_call_operand.vmem [shape: bf16[32,128], index: 23, kind: output, shape index: {1}]   ;;  %s5131_s18 = inlined_call_operand.vmem [shape: bf16[32,128], index: 18, kind: input, shape index: {}]   ;;  %s5132_s17 = inlined_call_operand.vmem [shape: f32[1,32], index: 17, kind: input, shape index: {}]   ;;  %s5133_s19 = inlined_call_operand.vmem [shape: f32[1,128], index: 19, kind: input, shape index: {}]   ;;  %s5134_s22 = inlined_call_operand.vmem [shape: f32[4,128], index: 22, kind: output, shape index: {0}]  }
   0x1   :  { %5147 = sst [smem:[#allocation2_spill]] %s5111_s0  ;;  %s5163_s0 = smov 104   ;;  %vm4140_vm4 = vmmov 0  }
   0x2   :  { %5148 = sst [smem:[#allocation3_spill]] %s5112_s4  ;;  %s5155_s24 = sld [smem:[#allocation2_spill]] }
   0x3   :  { %5149 = sst [smem:[#allocation4_spill]] %s5113_s2  ;;  %s5156_s28 = sld [smem:[#allocation3_spill]] }
   0x4   :  { %5150 = sst [smem:[#allocation5_spill]] %s5114_s3  ;;  %s5157_s30 = sld [smem:[#allocation4_spill]] }
   0x5   :  { %5151 = sst [smem:[#allocation6_spill]] %s5115_s5  ;;  %s5141_s3 = smov 64  }
   0x6   :  { %5152 = sst [smem:[#allocation7_spill]] %s5116_s1  ;;  %s5158_s1 = sld [smem:[#allocation5_spill]] }
   0x7   :  { %5153 = sst [smem:[#allocation8_spill]] %s5117_s6  ;;  %s5159_s2 = sld [smem:[#allocation6_spill]] }
   0x8   :  { %5154 = sst [smem:[#allocation9_spill]] %s5118_s7  ;;  %v74_v0 = vld [vmem:[%s5155_s24] sm:$0xff]  ;;  %v76_v1 = vld [vmem:[%s5155_s24 + $0x10] sm:$0xff]  ;;  %v75_v2 = vld [vmem:[%s5155_s24 + $0x8] sm:$0xff]  ;;  %s4134_s6 = smov 120  }
   0x9   :  { %v81_v3 = vsel %vm80_vm0, %v74_v0, 0.0  ;;  %v87_v4 = vsel %vm80_vm0, %v76_v1, 0.0  ;;  %v77_v5 = vld [vmem:[%s5155_s24 + $0x18] sm:$0xff]  ;;  %v84_v6 = vsel %vm80_vm0, %v75_v2, 0.0  ;;  %v3920_v28 = vld [vmem:[%s5156_s28] sm:$0xff]   ;;  %v3921_v29 = vld [vmem:[%s5156_s28 + $0x8] sm:$0xff]  }
   0xa   :  { %82 = vadd.xlane.f32.xlu0 %v81_v3  ;;  %88 = vadd.xlane.f32.xlu1 %v87_v4  ;;  %v90_v7 = vsel %vm80_vm0, %v77_v5, 0.0  ;;  %v3316_v44 = vld [vmem:[%s5157_s30] ss:$0 sm:$0xff]  ;;  %s5145_s7 = smov 104   ;;  %s5160_s30 = sld [smem:[#allocation7_spill]] }
   0xb   :  { %3601 = vmatprep.subr.bf16.mxu0 %v3920_v28  ;;  %s5161_s25 = sld [smem:[#allocation8_spill]]  ;;  %s5162_s26 = sld [smem:[#allocation9_spill]] }
   0xc   :  { %3602 = vmatpush3.bf16.msra.mxu0 %v3920_v28  ;;  %v3317_v49 = vld [vmem:[%s5158_s1] ss:$0 sm:$0xff] }
   0xd   :  { %3603 = vmatprep.subr.bf16.mxu0 %v3921_v29  ;;  %v3318_v63 = vld [vmem:[%s5159_s2] ss:$0 sm:$0xff] }
   0xe   :  { %85 = vadd.xlane.f32.xlu0 %v84_v6  ;;  %91 = vadd.xlane.f32.xlu1 %v90_v7 }
  0x10   :  { %3604 = vmatpush3.bf16.msra.mxu0 %v3921_v29 }
  0x97   :  { %v83_v8 = vpop.xlane.xlu0 %82  ;;  %v89_v9 = vpop.xlane.xlu1 %88 }
  0x98   :  { %v94_v10 = vmul.f32 0.03125, %v83_v8  ;;  %v96_v11 = vmul.f32 0.03125, %v89_v9 }
  0x9a   :  { %v98_v12 = vsub.f32 %v74_v0, %v94_v10  ;;  %v100_v13 = vsub.f32 %v76_v1, %v96_v11 }
  0x9b   :  { %v86_v14 = vpop.xlane.xlu0 %85  ;;  %v92_v15 = vpop.xlane.xlu1 %91 }
  0x9c   :  { %v95_v16 = vmul.f32 0.03125, %v86_v14  ;;  %v97_v17 = vmul.f32 0.03125, %v92_v15  ;;  %v102_v18 = vmul.f32 %v98_v12, %v98_v12  ;;  %v104_v19 = vmul.f32 %v100_v13, %v100_v13 }
  0x9e   :  { %v99_v20 = vsub.f32 %v75_v2, %v95_v16  ;;  %v101_v21 = vsub.f32 %v77_v5, %v97_v17  ;;  %v106_v22 = vsel %vm80_vm0, %v102_v18, 0.0  ;;  %v112_v23 = vsel %vm80_vm0, %v104_v19, 0.0 }
  0x9f   :  { %107 = vadd.xlane.f32.xlu0 %v106_v22 }
  0xa0   :  { %v103_v24 = vmul.f32 %v99_v20, %v99_v20  ;;  %v105_v25 = vmul.f32 %v101_v21, %v101_v21 }
  0xa2   :  { %v109_v26 = vsel %vm80_vm0, %v103_v24, 0.0  ;;  %v115_v27 = vsel %vm80_vm0, %v105_v25, 0.0 }
  0xa3   :  { %113 = vadd.xlane.f32.xlu0 %v112_v23  ;;  %110 = vadd.xlane.f32.xlu1 %v109_v26 }
  0xa7   :  { %116 = vadd.xlane.f32.xlu1 %v115_v27 }
 0x12c   :  { %v108_v30 = vpop.xlane.xlu0 %107 }
 0x12d   :  { %v118_v31 = vmul.f32 0.03125, %v108_v30 }
 0x12f   :  { %v122_v32 = vadd.f32 1e-05, %v118_v31 }
 0x130   :  { %v111_v33 = vpop.xlane.xlu1 %110  ;;  %v114_v34 = vpop.xlane.xlu0 %113 }
 0x131   :  { %3942 = vrsqrt.f32 %v122_v32  ;;  %v119_v35 = vmul.f32 0.03125, %v111_v33  ;;  %v120_v36 = vmul.f32 0.03125, %v114_v34  ;;  %v156_v33 = vld [vmem:[%s5160_s30 + $0x10] sm:$0xff] }
 0x133   :  { %v123_v37 = vadd.f32 1e-05, %v119_v35  ;;  %v124_v38 = vadd.f32 1e-05, %v120_v36  ;;  %v154_v35 = vld [vmem:[%s5160_s30] sm:$0xff] }
 0x134   :  { %v117_v39 = vpop.xlane.xlu1 %116 }
 0x135   :  { %3944 = vrsqrt.f32 %v123_v37  ;;  %v121_v40 = vmul.f32 0.03125, %v117_v39 }
 0x136   :  { %3946 = vrsqrt.f32 %v124_v38  ;;  %v155_v38 = vld [vmem:[%s5160_s30 + $0x8] sm:$0xff] }
 0x137   :  { %v125_v41 = vadd.f32 1e-05, %v121_v40 }
 0x139   :  { %3948 = vrsqrt.f32 %v125_v41 }
 0x13b   :  { %v3943_v42 = vpop.eup %3942 }
 0x13c   :  { %v130_v43 = vmul.f32 %v3943_v42, %v98_v12 }
 0x13e   :  { %v140_v48 = vmul.f32 %v3316_v44, %v130_v43  ;;  %v157_v43 = vld [vmem:[%s5160_s30 + $0x18] sm:$0xff] }
 0x13f   :  { %v3945_v45 = vpop.eup %3944 }
 0x140   :  { %v3947_v46 = vpop.eup %3946  ;;  %v131_v47 = vmul.f32 %v3945_v45, %v99_v20  ;;  %v4293_v53 = vadd.f32 %v3317_v49, %v140_v48 }
 0x141   :  { %v132_v50 = vmul.f32 %v3947_v46, %v100_v13 }
 0x142   :  { %v141_v51 = vmul.f32 %v3316_v44, %v131_v47 }
 0x143   :  { %v3949_v52 = vpop.eup %3948  ;;  %v142_v56 = vmul.f32 %v3316_v44, %v132_v50 }
 0x144   :  { %v4295_v54 = vadd.f32 %v3317_v49, %v141_v51  ;;  %v133_v55 = vmul.f32 %v3949_v52, %v101_v21 }
 0x145   :  { %v4300_v59 = vadd.f32 %v3317_v49, %v142_v56 }
 0x146   :  { %v158_v57 = vpack.c.bf16 %v4295_v54, %v4293_v53  ;;  %v143_v58 = vmul.f32 %v3316_v44, %v133_v55 }
 0x148   :  { %3605 = vmatprep.mubr.msk.bf16.mxu0 %vm80_vm0, %v158_v57  ;;  %v4302_v60 = vadd.f32 %v3317_v49, %v143_v58 }
 0x14a   :  { %v159_v61 = vpack.c.bf16 %v4302_v60, %v4300_v59 }
 0x14c   :  { %3606 = vmatmul.mubr.msk.bf16.vlgmr.msra.gmra.mrb[0].mxu0 %vm80_vm0, %v159_v61 }
 0x21f   :  { %v3607_v62 = vpop.f32.mrb[0].mxu0 }
 0x220   :  { %v223_v0 = vpop.f32.mrb[1].mxu0  ;;  %v232_v2 = vadd.f32 %v3607_v62, %v3318_v63 }
 0x221   :  { %v3608_v1 = vpop.f32.mrb[2].mxu0  ;;  %v224_v5 = vadd.f32 %v3318_v63, %v223_v0 }
 0x222   :  { %v235_v3 = vadd.f32 %v3608_v1, %v3318_v63  ;;  %v226_v4 = vpop.f32.mrb[3].mxu0 }
 0x223   :  { %v227_v6 = vadd.f32 %v3318_v63, %v226_v4 }
 0x224   :  { %v239_v7 = vpack.c.bf16 %v235_v3, %v232_v2 }
 0x225   :  { %v238_v8 = vpack.c.bf16 %v227_v6, %v224_v5 }
 0x226   :  { %244 = vrot.lane.b32.xlu1 %v239_v7, %s4134_s6 }
 0x227   :  { %242 = vrot.lane.b32.xlu0 %v238_v8, %s4134_s6  ;;  %3613 = vmatprep.mubr.msk.bf16.mxu1 %vm258_vm1, %v238_v8 }
 0x22a   :  { %246 = vrot.lane.b32.xlu1 %v238_v8, %s4135_s27 }
 0x22b   :  { %250 = vrot.lane.b32.xlu0 %v238_v8, %s5145_s7 }
 0x22e   :  { %248 = vrot.lane.b32.xlu1 %v239_v7, %s4135_s27 }
 0x22f   :  { %254 = vrot.lane.b32.xlu0 %v238_v8, %s5143_s29 }
 0x232   :  { %252 = vrot.lane.b32.xlu1 %v239_v7, %s5145_s7 }
 0x236   :  { %256 = vrot.lane.b32.xlu1 %v239_v7, %s5143_s29 }
 0x298   :  { %v4319_v9 = vpop.permute.xlu1 %244 }
 0x299   :  { %322 = vrot.lane.b32.xlu1 %v4319_v9, %s5143_s29  ;;  %v4323_v10 = vpop.permute.xlu0 %242 }
 0x29a   :  { %3621 = vmatprep.mubr.msk.bf16.mxu0 %vm258_vm1, %v4323_v10  ;;  %320 = vrot.lane.b32.xlu0 %v4323_v10, %s5143_s29 }
 0x29c   :  { %v4329_v11 = vpop.permute.xlu1 %246 }
 0x29d   :  { %v4331_v12 = vpop.permute.xlu0 %250 }
 0x29e   :  { %385 = vrot.lane.b32.xlu0 %v4329_v11, %s5143_s29 }
 0x2a0   :  { %v4335_v13 = vpop.permute.xlu1 %248 }
 0x2a1   :  { %387 = vrot.lane.b32.xlu1 %v4335_v13, %s5143_s29  ;;  %v255_v14 = vpop.permute.xlu0 %254 }
 0x2a2   :  { %450 = vrot.lane.b32.xlu0 %v4331_v12, %s5143_s29  ;;  %3889 = vmatprep.subr.msk.bf16.mxu1 %vm258_vm1, %v255_v14  ;;  %v266_v15 = vsel %vm258_vm1, %v255_v14, 0 }
 0x2a3   :  { %3610 = vmatpush3.bf16.xpose.msra.mxu1 %v266_v15 }
 0x2a4   :  { %v4343_v16 = vpop.permute.xlu1 %252 }
 0x2a5   :  { %452 = vrot.lane.b32.xlu1 %v4343_v16, %s5143_s29 }
 0x2a6   :  { %699 = vrot.lane.b32.xlu0 %v238_v8, %s5141_s3 }
 0x2a8   :  { %v257_v17 = vpop.permute.xlu1 %256 }
 0x2a9   :  { %701 = vrot.lane.b32.xlu1 %v239_v7, %s5141_s3  ;;  %3890 = vmatprep.subr.msk.bf16.mxu1 %vm258_vm1, %v257_v17  ;;  %v269_v18 = vsel %vm258_vm1, %v257_v17, 0 }
 0x2ab   :  { %3612 = vmatpush3.bf16.xpose.msra.mxu1 %v269_v18 }
 0x2b2   :  { %3614 = vmatmul.mubr.msk.bf16.vlgmr.msra.gmra.mrb[0].mxu1 %vm258_vm1, %v239_v7 }
 0x2b3   :  { %3629 = vmatprep.mubr.msk.bf16.mxu1 %vm258_vm1, %v4329_v11 }
 0x30b   :  { %v323_v21 = vpop.permute.xlu1 %322 }
 0x30c   :  { %v321_v19 = vpop.permute.xlu0 %320  ;;  %v334_v26 = vsel %vm258_vm1, %v323_v21, 0 }
 0x30d   :  { %3891 = vmatprep.subr.msk.bf16.mxu0 %vm258_vm1, %v321_v19  ;;  %v331_v20 = vsel %vm258_vm1, %v321_v19, 0 }
 0x30e   :  { %3618 = vmatpush3.bf16.xpose.msra.mxu0 %v331_v20 }
 0x30f   :  { %3892 = vmatprep.subr.msk.bf16.mxu0 %vm258_vm1, %v323_v21 }
 0x310   :  { %v386_v22 = vpop.permute.xlu0 %385 }
 0x311   :  { %3893 = vmatprep.subr.msk.bf16.mxu1 %vm258_vm1, %v386_v22  ;;  %v396_v23 = vsel %vm258_vm1, %v386_v22, 0 }
 0x312   :  { %3626 = vmatpush3.bf16.xpose.msra.mxu1 %v396_v23 }
 0x313   :  { %v388_v24 = vpop.permute.xlu1 %387 }
 0x314   :  { %v451_v25 = vpop.permute.xlu0 %450  ;;  %3894 = vmatprep.subr.msk.bf16.mxu1 %vm258_vm1, %v388_v24  ;;  %v399_v27 = vsel %vm258_vm1, %v388_v24, 0 }
 0x315   :  { %v461_v30 = vsel %vm258_vm1, %v451_v25, 0 }
 0x316   :  { %3620 = vmatpush3.bf16.xpose.msra.mxu0 %v334_v26 }
 0x317   :  { %3895 = vmatprep.subr.msk.bf16.mxu0 %vm258_vm1, %v451_v25  ;;  %v453_v29 = vpop.permute.xlu1 %452 }
 0x318   :  { %v700_v28 = vpop.permute.xlu0 %699  ;;  %v464_v32 = vsel %vm258_vm1, %v453_v29, 0 }
 0x31a   :  { %3628 = vmatpush3.bf16.xpose.msra.mxu1 %v399_v27 }
 0x31b   :  { %3641 = vmatprep.subr.bf16.mxu1 %v700_v28  ;;  %v702_v31 = vpop.permute.xlu1 %701 }
 0x31d   :  { %3622 = vmatmul.mubr.msk.bf16.vlgmr.msra.gmra.mrb[4].mxu0 %vm258_vm1, %v4319_v9 }
 0x31e   :  { %3634 = vmatpush3.bf16.xpose.msra.mxu0 %v461_v30  ;;  %3637 = vmatprep.mubr.msk.bf16.mxu0 %vm258_vm1, %v4331_v12 }
 0x31f   :  { %3896 = vmatprep.subr.msk.bf16.mxu0 %vm258_vm1, %v453_v29 }
 0x321   :  { %3630 = vmatmul.mubr.msk.bf16.vlgmr.msra.gmra.mrb[4].mxu1 %vm258_vm1, %v4335_v13 }
 0x322   :  { %3642 = vmatpush3.bf16.msra.mxu1 %v700_v28 }
 0x323   :  { %3643 = vmatprep.subr.bf16.mxu1 %v702_v31 }
 0x326   :  { %3636 = vmatpush3.bf16.xpose.msra.mxu0 %v464_v32  ;;  %3644 = vmatpush3.bf16.msra.mxu1 %v702_v31 }
 0x32d   :  { %3638 = vmatmul.mubr.msk.bf16.vlgmr.msra.gmra.mrb[8].mxu0 %vm258_vm1, %v4343_v16 }
 0x385   :  { %v3615_v34 = vpop.f32.mrb[0].mxu1 }
 0x386   :  { %v4380_v36 = vadd.f32 %v3615_v34, %v156_v33  ;;  %v305_v37 = vpop.f32.mrb[1].mxu1 }
 0x387   :  { %v3616_v39 = vpop.f32.mrb[2].mxu1  ;;  %v4385_v40 = vadd.f32 %v305_v37, %v154_v35 }
 0x388   :  { %v308_v41 = vpop.f32.mrb[3].mxu1  ;;  %v521_v42 = vsel %vm80_vm0, %v4380_v36, -inf  ;;  %v317_v46 = vadd.f32 %v3616_v39, %v157_v43 }
 0x389   :  { %v4392_v44 = vadd.f32 %v308_v41, %v155_v38  ;;  %522 = vmax.xlane.f32.xlu0 %v521_v42  ;;  %v515_v47 = vsel %vm80_vm0, %v4385_v40, -inf }
 0x38a   :  { %v524_v48 = vsel %vm80_vm0, %v317_v46, -inf }
 0x38b   :  { %v518_v45 = vsel %vm80_vm0, %v4392_v44, -inf }
 0x38c   :  { %519 = vmax.xlane.f32.xlu1 %v518_v45 }
 0x38d   :  { %516 = vmax.xlane.f32.xlu0 %v515_v47 }
 0x391   :  { %525 = vmax.xlane.f32.xlu0 %v524_v48 }
 0x3f0   :  { %v3623_v49 = vpop.f32.mrb[4].mxu0 }
 0x3f1   :  { %v4399_v50 = vadd.f32 %v3623_v49, %v156_v33  ;;  %v370_v51 = vpop.f32.mrb[5].mxu0 }
 0x3f2   :  { %v3624_v52 = vpop.f32.mrb[6].mxu0  ;;  %v4409_v1 = vadd.f32 %v370_v51, %v154_v35 }
 0x3f3   :  { %v4401_v55 = vadd.f32 %v3624_v52, %v157_v43  ;;  %v373_v56 = vpop.f32.mrb[7].mxu0  ;;  %v533_v57 = vsel %vm80_vm0, %v4399_v50, -inf }
 0x3f4   :  { %v3631_v58 = vpop.f32.mrb[4].mxu1  ;;  %534 = vmax.xlane.f32.xlu0 %v533_v57  ;;  %v4415_v5 = vadd.f32 %v373_v56, %v155_v38  ;;  %v527_v8 = vsel %vm80_vm0, %v4409_v1, -inf }
 0x3f5   :  { %v4405_v61 = vadd.f32 %v3631_v58, %v156_v33  ;;  %v435_v62 = vpop.f32.mrb[5].mxu1  ;;  %v536_v63 = vsel %vm80_vm0, %v4401_v55, -inf }
 0x3f6   :  { %v3632_v0 = vpop.f32.mrb[6].mxu1  ;;  %537 = vmax.xlane.f32.xlu1 %v536_v63  ;;  %v4419_v7 = vadd.f32 %v435_v62, %v154_v35  ;;  %v530_v15 = vsel %vm80_vm0, %v4415_v5, -inf }
 0x3f7   :  { %v4411_v2 = vadd.f32 %v3632_v0, %v157_v43  ;;  %v438_v3 = vpop.f32.mrb[7].mxu1  ;;  %v545_v4 = vsel %vm80_vm0, %v4405_v61, -inf }
 0x3f8   :  { %546 = vmax.xlane.f32.xlu0 %v545_v4  ;;  %v4423_v14 = vadd.f32 %v438_v3, %v155_v38  ;;  %v539_v17 = vsel %vm80_vm0, %v4419_v7, -inf }
 0x3f9   :  { %v548_v6 = vsel %vm80_vm0, %v4411_v2, -inf }
 0x3fa   :  { %549 = vmax.xlane.f32.xlu1 %v548_v6  ;;  %v542_v21 = vsel %vm80_vm0, %v4423_v14, -inf }
 0x3fc   :  { %528 = vmax.xlane.f32.xlu0 %v527_v8 }
 0x3fe   :  { %531 = vmax.xlane.f32.xlu1 %v530_v15 }
 0x400   :  { %v3639_v18 = vpop.f32.mrb[8].mxu0  ;;  %540 = vmax.xlane.f32.xlu0 %v539_v17 }
 0x401   :  { %v4429_v19 = vadd.f32 %v3639_v18, %v156_v33  ;;  %v500_v20 = vpop.f32.mrb[9].mxu0 }
 0x402   :  { %v3640_v22 = vpop.f32.mrb[10].mxu0  ;;  %543 = vmax.xlane.f32.xlu1 %v542_v21  ;;  %v4433_v23 = vadd.f32 %v500_v20, %v154_v35 }
 0x403   :  { %v4435_v24 = vadd.f32 %v3640_v22, %v157_v43  ;;  %v503_v25 = vpop.f32.mrb[11].mxu0  ;;  %v557_v26 = vsel %vm80_vm0, %v4429_v19, -inf }
 0x404   :  { %558 = vmax.xlane.f32.xlu0 %v557_v26  ;;  %v4439_v27 = vadd.f32 %v503_v25, %v155_v38  ;;  %v551_v29 = vsel %vm80_vm0, %v4433_v23, -inf }
 0x405   :  { %v560_v28 = vsel %vm80_vm0, %v4435_v24, -inf }
 0x406   :  { %561 = vmax.xlane.f32.xlu1 %v560_v28  ;;  %v554_v30 = vsel %vm80_vm0, %v4439_v27, -inf }
 0x408   :  { %552 = vmax.xlane.f32.xlu0 %v551_v29 }
 0x40a   :  { %555 = vmax.xlane.f32.xlu1 %v554_v30 }
 0x416   :  { %v523_v31 = vpop.xlane.xlu0 %522 }
 0x417   :  { %v565_v41 = vsub.f32 %v4380_v36, %v523_v31 }
 0x419   :  { %v520_v32 = vpop.xlane.xlu1 %519  ;;  %v583_v42 = vmul.f32 1.442695, %v565_v41 }
 0x41a   :  { %v517_v33 = vpop.xlane.xlu0 %516  ;;  %v564_v34 = vsub.f32 %v4392_v44, %v520_v32 }
 0x41b   :  { %v563_v43 = vsub.f32 %v4385_v40, %v517_v33 }
 0x41c   :  { %v581_v38 = vmul.f32 1.442695, %v564_v34 }
 0x41e   :  { %760 = vrot.lane.b32.xlu0 %v4323_v10, %s5141_s3  ;;  %v526_v35 = vpop.xlane.xlu0 %525  ;;  %v579_v10 = vmul.f32 1.442695, %v563_v43 }
 0x41f   :  { %v566_v37 = vsub.f32 %v317_v46, %v526_v35 }
 0x421   :  { %v585_v39 = vmul.f32 1.442695, %v566_v37 }
 0x423   :  { %3950 = vpow2.f32 %v585_v39 }
 0x424   :  { %3952 = vpow2.f32 %v581_v38 }
 0x425   :  { %3954 = vpow2.f32 %v583_v42 }
 0x426   :  { %3956 = vpow2.f32 %v579_v10 }
 0x42d   :  { %v4452_v45 = vpop.eup %3950 }
 0x42e   :  { %v620_v47 = vsel %vm80_vm0, %v4452_v45, 0.0  ;;  %v4456_v44 = vpop.eup %3952 }
 0x42f   :  { %621 = vadd.xlane.f32.xlu1 %v620_v47  ;;  %v614_v46 = vsel %vm80_vm0, %v4456_v44, 0.0  ;;  %v4460_v48 = vpop.eup %3954 }
 0x430   :  { %v617_v36 = vsel %vm80_vm0, %v4460_v48, 0.0  ;;  %v4464_v40 = vpop.eup %3956 }
 0x431   :  { %v611_v49 = vsel %vm80_vm0, %v4464_v40, 0.0 }
 0x433   :  { %615 = vadd.xlane.f32.xlu1 %v614_v46 }
 0x43d   :  { %618 = vadd.xlane.f32.xlu0 %v617_v36 }
 0x441   :  { %612 = vadd.xlane.f32.xlu0 %v611_v49 }
 0x481   :  { %v535_v51 = vpop.xlane.xlu0 %534 }
 0x482   :  { %v569_v52 = vsub.f32 %v4399_v50, %v535_v51 }
 0x483   :  { %v538_v21 = vpop.xlane.xlu1 %537 }
 0x484   :  { %v591_v56 = vmul.f32 1.442695, %v569_v52  ;;  %v570_v29 = vsub.f32 %v4401_v55, %v538_v21 }
 0x485   :  { %v547_v57 = vpop.xlane.xlu0 %546 }
 0x486   :  { %3958 = vpow2.f32 %v591_v56  ;;  %v573_v58 = vsub.f32 %v4405_v61, %v547_v57  ;;  %v593_v33 = vmul.f32 1.442695, %v570_v29 }
 0x487   :  { %v550_v22 = vpop.xlane.xlu1 %549 }
 0x488   :  { %v599_v62 = vmul.f32 1.442695, %v573_v58  ;;  %v574_v34 = vsub.f32 %v4411_v2, %v550_v22 }
 0x489   :  { %v529_v63 = vpop.xlane.xlu0 %528 }
 0x48a   :  { %3960 = vpow2.f32 %v599_v62  ;;  %v567_v0 = vsub.f32 %v4409_v1, %v529_v63  ;;  %v601_v37 = vmul.f32 1.442695, %v574_v34 }
 0x48b   :  { %v532_v25 = vpop.xlane.xlu1 %531 }
 0x48c   :  { %v587_v3 = vmul.f32 1.442695, %v567_v0 }
 0x48d   :  { %v541_v4 = vpop.xlane.xlu0 %540 }
 0x48e   :  { %3962 = vpow2.f32 %v587_v3  ;;  %v571_v28 = vsub.f32 %v4419_v7, %v541_v4 }
 0x48f   :  { %v4487_v26 = vpop.xlane.xlu1 %543 }
 0x490   :  { %v4471_v6 = vpop.eup %3958  ;;  %v595_v30 = vmul.f32 1.442695, %v571_v28 }
 0x491   :  { %v559_v8 = vpop.xlane.xlu0 %558  ;;  %v629_v15 = vsel %vm80_vm0, %v4471_v6, 0.0 }
 0x492   :  { %630 = vadd.xlane.f32.xlu0 %v629_v15  ;;  %v577_v31 = vsub.f32 %v4429_v19, %v559_v8  ;;  %3964 = vpow2.f32 %v595_v30 }
 0x493   :  { %v562_v32 = vpop.xlane.xlu1 %561  ;;  %3966 = vpow2.f32 %v593_v33 }
 0x494   :  { %v4475_v50 = vpop.eup %3960  ;;  %v578_v7 = vsub.f32 %v4435_v24, %v562_v32 }
 0x495   :  { %v553_v17 = vpop.xlane.xlu0 %552  ;;  %v641_v61 = vsel %vm80_vm0, %v4475_v50, 0.0 }
 0x496   :  { %642 = vadd.xlane.f32.xlu1 %v641_v61  ;;  %v575_v35 = vsub.f32 %v4433_v23, %v553_v17  ;;  %v609_v41 = vmul.f32 1.442695, %v578_v7 }
 0x497   :  { %v556_v38 = vpop.xlane.xlu1 %555 }
 0x498   :  { %v4479_v18 = vpop.eup %3962  ;;  %v603_v55 = vmul.f32 1.442695, %v575_v35 }
 0x499   :  { %v761_v1 = vpop.permute.xlu0 %760  ;;  %v623_v20 = vsel %vm80_vm0, %v4479_v18, 0.0 }
 0x49a   :  { %624 = vadd.xlane.f32.xlu0 %v623_v20  ;;  %3649 = vmatprep.subr.bf16.mxu0 %v761_v1 }
 0x49b   :  { %3650 = vmatpush3.bf16.msra.mxu0 %v761_v1 }
 0x49c   :  { %v4496_v42 = vpop.eup %3964 }
 0x49d   :  { %v4498_v2 = vpop.eup %3966 }
 0x49e   :  { %v632_v46 = vsel %vm80_vm0, %v4498_v2, 0.0 }
 0x4a7   :  { %821 = vrot.lane.b32.xlu1 %v4329_v11, %s5141_s3  ;;  %v607_v11 = vmul.f32 1.442695, %v577_v31 }
 0x4a9   :  { %3968 = vpow2.f32 %v607_v11 }
 0x4aa   :  { %3970 = vpow2.f32 %v601_v37  ;;  %v951_v37 = vld [vmem:[%s5161_s25] sm:$0xf] }
 0x4ab   :  { %3972 = vpow2.f32 %v603_v55 }
 0x4b0   :  { %762 = vrot.lane.b32.xlu0 %v4319_v9, %s5141_s3  ;;  %v568_v9 = vsub.f32 %v4415_v5, %v532_v25  ;;  %v635_v5 = vsel %vm80_vm0, %v4496_v42, 0.0 }
 0x4b2   :  { %v589_v39 = vmul.f32 1.442695, %v568_v9 }
 0x4b3   :  { %v4502_v47 = vpop.eup %3968 }
 0x4b4   :  { %3974 = vpow2.f32 %v589_v39  ;;  %v4504_v24 = vpop.eup %3970  ;;  %v653_v36 = vsel %vm80_vm0, %v4502_v47, 0.0 }
 0x4b5   :  { %3976 = vpow2.f32 %v609_v41  ;;  %v4510_v49 = vpop.eup %3972  ;;  %v644_v52 = vsel %vm80_vm0, %v4504_v24, 0.0 }
 0x4b6   :  { %v647_v56 = vsel %vm80_vm0, %v4510_v49, 0.0 }
 0x4bc   :  { %v622_v19 = vpop.xlane.xlu1 %621 }
 0x4be   :  { %v4512_v51 = vpop.eup %3974 }
 0x4bf   :  { %v4518_v57 = vpop.eup %3976  ;;  %v626_v62 = vsel %vm80_vm0, %v4512_v51, 0.0 }
 0x4c0   :  { %v616_v23 = vpop.xlane.xlu1 %615  ;;  %v656_v63 = vsel %vm80_vm0, %v4518_v57, 0.0 }
 0x4ca   :  { %v619_v43 = vpop.xlane.xlu0 %618 }
 0x4cb   :  { %636 = vadd.xlane.f32.xlu1 %v635_v5  ;;  %3978 = vrcp.f32 %v619_v43 }
 0x4cc   :  { %3980 = vrcp.f32 %v616_v23 }
 0x4cd   :  { %3982 = vrcp.f32 %v622_v19 }
 0x4ce   :  { %v613_v10 = vpop.xlane.xlu0 %612 }
 0x4cf   :  { %3984 = vrcp.f32 %v613_v10  ;;  %633 = vadd.xlane.f32.xlu1 %v632_v46  ;;  %654 = vadd.xlane.f32.xlu0 %v653_v36 }
 0x4d3   :  { %645 = vadd.xlane.f32.xlu1 %v644_v52  ;;  %648 = vadd.xlane.f32.xlu0 %v647_v56 }
 0x4d5   :  { %v3979_v58 = vpop.eup %3978 }
 0x4d6   :  { %v3981_v0 = vpop.eup %3980  ;;  %v677_v8 = vmul.f32 %v3979_v58, %v4460_v48  ;;  %v572_v48 = vsub.f32 %v4423_v14, %v4487_v26 }
 0x4d7   :  { %627 = vadd.xlane.f32.xlu1 %v626_v62  ;;  %657 = vadd.xlane.f32.xlu0 %v656_v63  ;;  %v3983_v3 = vpop.eup %3982  ;;  %v676_v17 = vmul.f32 %v3981_v0, %v4456_v44  ;;  %v576_v44 = vsub.f32 %v4439_v27, %v556_v38 }
 0x4d8   :  { %v678_v61 = vmul.f32 %v3983_v3, %v4452_v45 }
 0x4d9   :  { %v3985_v4 = vpop.eup %3984  ;;  %v605_v45 = vmul.f32 1.442695, %v576_v44 }
 0x4da   :  { %v675_v15 = vmul.f32 %v3985_v4, %v4464_v40  ;;  %v692_v20 = vpack.c.bf16 %v678_v61, %v677_v8  ;;  %v597_v40 = vmul.f32 1.442695, %v572_v48  ;;  %v963_v61 = vsel %vm961_vm2, %v951_v37, 0 }
 0x4dc   :  { %v691_v1 = vpack.c.bf16 %v676_v17, %v675_v15  ;;  %3986 = vpow2.f32 %v597_v40 }
 0x4dd   :  { %3988 = vpow2.f32 %v605_v45 }
 0x4de   :  { %3645 = vmatprep.mubr.msk.bf16.mxu1 %vm80_vm0, %v691_v1 }
 0x4df   :  { %3646 = vmatmul.mubr.msk.bf16.vlgmr.msra.gmra.mrb[8].mxu1 %vm80_vm0, %v692_v20 }
 0x4e6   :  { %v4537_v21 = vpop.eup %3986 }
 0x4e7   :  { %v638_v22 = vsel %vm80_vm0, %v4537_v21, 0.0  ;;  %v4541_v25 = vpop.eup %3988 }
 0x4e8   :  { %823 = vrot.lane.b32.xlu1 %v4335_v13, %s5141_s3 }
 0x4ed   :  { %882 = vrot.lane.b32.xlu0 %v4331_v12, %s5141_s3  ;;  %v650_v12 = vsel %vm80_vm0, %v4541_v25, 0.0 }
 0x50c   :  { %639 = vadd.xlane.f32.xlu1 %v638_v22  ;;  %v953_v22 = vld [vmem:[%s5161_s25 + $0x8] sm:$0xf] }
 0x510   :  { %651 = vadd.xlane.f32.xlu1 %v650_v12 }
 0x51f   :  { %v631_v13 = vpop.xlane.xlu0 %630 }
 0x521   :  { %884 = vrot.lane.b32.xlu1 %v4343_v16, %s5141_s3 }
 0x523   :  { %v643_v14 = vpop.xlane.xlu1 %642 }
 0x527   :  { %v822_v27 = vpop.permute.xlu1 %821  ;;  %v625_v26 = vpop.xlane.xlu0 %624 }
 0x528   :  { %3657 = vmatprep.subr.bf16.mxu1 %v822_v27 }
 0x529   :  { %3658 = vmatpush3.bf16.msra.mxu1 %v822_v27 }
 0x52b   :  { %v763_v28 = vpop.permute.xlu0 %762 }
 0x52c   :  { %3651 = vmatprep.subr.bf16.mxu0 %v763_v28 }
 0x52d   :  { %3652 = vmatpush3.bf16.msra.mxu0 %v763_v28  ;;  %v1079_v28 = vsel %vm961_vm2, %v953_v22, 0 }
 0x558   :  { %v637_v29 = vpop.xlane.xlu1 %636 }
 0x55c   :  { %v634_v30 = vpop.xlane.xlu1 %633  ;;  %v655_v31 = vpop.xlane.xlu0 %654 }
 0x55d   :  { %3990 = vrcp.f32 %v634_v30 }
 0x55e   :  { %3992 = vrcp.f32 %v625_v26 }
 0x55f   :  { %3994 = vrcp.f32 %v631_v13 }
 0x560   :  { %v646_v32 = vpop.xlane.xlu1 %645  ;;  %v649_v33 = vpop.xlane.xlu0 %648 }
 0x564   :  { %v628_v34 = vpop.xlane.xlu1 %627  ;;  %v658_v11 = vpop.xlane.xlu0 %657 }
 0x565   :  { %3996 = vrcp.f32 %v628_v34 }
 0x566   :  { %3998 = vrcp.f32 %v646_v32 }
 0x567   :  { %v3991_v9 = vpop.eup %3990  ;;  %4000 = vrcp.f32 %v637_v29  ;;  %v954_v29 = vld [vmem:[%s5161_s25 + $0xc] sm:$0xf] }
 0x568   :  { %v824_v16 = vpop.permute.xlu1 %823  ;;  %v883_v35 = vpop.permute.xlu0 %882  ;;  %v682_v39 = vmul.f32 %v3991_v9, %v4498_v2  ;;  %4002 = vrcp.f32 %v643_v14 }
 0x569   :  { %3659 = vmatprep.subr.bf16.mxu1 %v824_v16  ;;  %3665 = vmatprep.subr.bf16.mxu0 %v883_v35  ;;  %v3993_v38 = vpop.eup %3992 }
 0x56a   :  { %3660 = vmatpush3.bf16.msra.mxu1 %v824_v16  ;;  %v3995_v7 = vpop.eup %3994  ;;  %v679_v19 = vmul.f32 %v3993_v38, %v4479_v18 }
 0x56b   :  { %3897 = vmatprep.subr.msk.bf16.mxu1 %vm961_vm2, %v951_v37  ;;  %v681_v23 = vmul.f32 %v3995_v7, %v4471_v6  ;;  %v1137_v37 = vsel %vm961_vm2, %v954_v29, 0 }
 0x56d   :  { %v694_v5 = vpack.c.bf16 %v682_v39, %v681_v23  ;;  %v3347_v39 = vld [vmem:[%s5162_s26] ss:$0 sm:$0xff] }
 0x56f   :  { %v3997_v55 = vpop.eup %3996 }
 0x570   :  { %v680_v41 = vmul.f32 %v3997_v55, %v4512_v51  ;;  %v3999_v2 = vpop.eup %3998 }
 0x571   :  { %v4001_v6 = vpop.eup %4000  ;;  %v686_v52 = vmul.f32 %v3999_v2, %v4504_v24 }
 0x572   :  { %v693_v43 = vpack.c.bf16 %v680_v41, %v679_v19  ;;  %v4003_v36 = vpop.eup %4002  ;;  %v683_v58 = vmul.f32 %v4001_v6, %v4496_v42 }
 0x573   :  { %v685_v0 = vmul.f32 %v4003_v36, %v4475_v50 }
 0x574   :  { %3653 = vmatprep.mubr.msk.bf16.mxu0 %vm80_vm0, %v693_v43 }
 0x575   :  { %3654 = vmatmul.mubr.msk.bf16.vlgmr.msra.gmra.mrb[12].mxu0 %vm80_vm0, %v694_v5  ;;  %v696_v17 = vpack.c.bf16 %v686_v52, %v685_v0 }
 0x576   :  { %3666 = vmatpush3.bf16.msra.mxu0 %v883_v35 }
 0x599   :  { %v640_v10 = vpop.xlane.xlu1 %639 }
 0x59a   :  { %4004 = vrcp.f32 %v640_v10 }
 0x59b   :  { %4006 = vrcp.f32 %v658_v11 }
 0x59c   :  { %4008 = vrcp.f32 %v649_v33 }
 0x59d   :  { %4010 = vrcp.f32 %v655_v31  ;;  %v652_v18 = vpop.xlane.xlu1 %651 }
 0x59e   :  { %4012 = vrcp.f32 %v652_v18 }
 0x5a1   :  { %v885_v46 = vpop.permute.xlu1 %884 }
 0x5a2   :  { %3667 = vmatprep.subr.bf16.mxu0 %v885_v46 }
 0x5a3   :  { %3668 = vmatpush3.bf16.msra.mxu0 %v885_v46 }
 0x5a4   :  { %v4005_v51 = vpop.eup %4004 }
 0x5a5   :  { %v4007_v56 = vpop.eup %4006  ;;  %v684_v62 = vmul.f32 %v4005_v51, %v4537_v21 }
 0x5a6   :  { %v4009_v63 = vpop.eup %4008  ;;  %v690_v15 = vmul.f32 %v4007_v56, %v4518_v57 }
 0x5a7   :  { %v4011_v3 = vpop.eup %4010  ;;  %v695_v4 = vpack.c.bf16 %v684_v62, %v683_v58  ;;  %v687_v24 = vmul.f32 %v4009_v63, %v4510_v49 }
 0x5a8   :  { %v4013_v8 = vpop.eup %4012  ;;  %v689_v42 = vmul.f32 %v4011_v3, %v4502_v47  ;;  %v952_v47 = vld [vmem:[%s5161_s25 + $0x4] sm:$0xf] }
 0x5a9   :  { %3661 = vmatprep.mubr.msk.bf16.mxu1 %vm80_vm0, %v695_v4  ;;  %v688_v1 = vmul.f32 %v4013_v8, %v4541_v25  ;;  %v1021_v49 = vsel %vm961_vm2, %v952_v47, 0 }
 0x5aa   :  { %3662 = vmatmul.mubr.msk.bf16.vlgmr.msra.gmra.mrb[12].mxu1 %vm80_vm0, %v696_v17  ;;  %v698_v50 = vpack.c.bf16 %v690_v15, %v689_v42 }
 0x5ab   :  { %v697_v20 = vpack.c.bf16 %v688_v1, %v687_v24  ;;  %3674 = vmatpush3.bf16.msra.mxu1 %v963_v61 }
 0x5ac   :  { %3898 = vmatprep.subr.msk.bf16.mxu1 %vm961_vm2, %v952_v47 }
 0x5ad   :  { %3669 = vmatprep.mubr.msk.bf16.mxu0 %vm80_vm0, %v697_v20 }
 0x5ae   :  { %3670 = vmatmul.mubr.msk.bf16.vlgmr.msra.gmra.mrb[16].mxu0 %vm80_vm0, %v698_v50 }
 0x5b2   :  { %v3647_v57 = vpop.f32.mrb[8].mxu1 }
 0x5b3   :  { %v745_v48 = vpop.f32.mrb[9].mxu1 }
 0x5b4   :  { %v3648_v40 = vpop.f32.mrb[10].mxu1 }
 0x5b5   :  { %v944_v44 = vpack.c.bf16 %v3648_v40, %v3647_v57  ;;  %v748_v45 = vpop.f32.mrb[11].mxu1 }
 0x5b6   :  { %v943_v21 = vpack.c.bf16 %v748_v45, %v745_v48  ;;  %v3923_v45 = vld [vmem:[%s5119_s10 + $0x8] sm:$0xff]  }
 0x5b8   :  { %3675 = vmatprep.mubr.msk.bf16.mxu1 %vm258_vm1, %v943_v21 }
 0x5b9   :  { %3676 = vmatmul.mubr.msk.bf16.vlgmr.msra.gmra.mrb[16].mxu1 %vm258_vm1, %v944_v44  ;;  %v3922_v44 = vld [vmem:[%s5119_s10] sm:$0xff]  }
 0x5ba   :  { %3680 = vmatpush3.bf16.msra.mxu1 %v1021_v49  ;;  %3697 = vmatprep.subr.bf16.mxu0 %v3922_v44 }
 0x5bb   :  { %3899 = vmatprep.subr.msk.bf16.mxu1 %vm961_vm2, %v953_v22  ;;  %3698 = vmatpush3.bf16.msra.mxu0 %v3922_v44 }
 0x5bc   :  { %3699 = vmatprep.subr.bf16.mxu0 %v3923_v45 }
 0x5bf   :  { %3700 = vmatpush3.bf16.msra.mxu0 %v3923_v45 }
 0x648   :  { %v3655_v25 = vpop.f32.mrb[12].mxu0 }
 0x649   :  { %v806_v12 = vpop.f32.mrb[13].mxu0 }
 0x64a   :  { %v3656_v13 = vpop.f32.mrb[14].mxu0 }
 0x64b   :  { %v946_v14 = vpack.c.bf16 %v3656_v13, %v3655_v25  ;;  %v809_v27 = vpop.f32.mrb[15].mxu0 }
 0x64c   :  { %v945_v26 = vpack.c.bf16 %v809_v27, %v806_v12 }
 0x64e   :  { %3681 = vmatprep.mubr.msk.bf16.mxu1 %vm258_vm1, %v945_v26 }
 0x64f   :  { %3682 = vmatmul.mubr.msk.bf16.vlgmr.msra.gmra.mrb[16].mxu1 %vm258_vm1, %v946_v14 }
 0x650   :  { %3686 = vmatpush3.bf16.msra.mxu1 %v1079_v28 }
 0x651   :  { %3900 = vmatprep.subr.msk.bf16.mxu1 %vm961_vm2, %v954_v29 }
 0x67d   :  { %v3663_v30 = vpop.f32.mrb[12].mxu1 }
 0x67e   :  { %v867_v31 = vpop.f32.mrb[13].mxu1 }
 0x67f   :  { %v3664_v32 = vpop.f32.mrb[14].mxu1 }
 0x680   :  { %v948_v33 = vpack.c.bf16 %v3664_v32, %v3663_v30  ;;  %v870_v34 = vpop.f32.mrb[15].mxu1 }
 0x681   :  { %v947_v11 = vpack.c.bf16 %v870_v34, %v867_v31  ;;  %v3671_v16 = vpop.f32.mrb[16].mxu0  ;;  %v3348_v31 = vld [vmem:[%s5120_s8] ss:$0 sm:$0xff] }
 0x682   :  { %v928_v35 = vpop.f32.mrb[17].mxu0 }
 0x683   :  { %v3672_v9 = vpop.f32.mrb[18].mxu0  ;;  %3687 = vmatprep.mubr.msk.bf16.mxu1 %vm258_vm1, %v947_v11 }
 0x684   :  { %v950_v38 = vpack.c.bf16 %v3672_v9, %v3671_v16  ;;  %v931_v7 = vpop.f32.mrb[19].mxu0  ;;  %3688 = vmatmul.mubr.msk.bf16.vlgmr.msra.gmra.mrb[16].mxu1 %vm258_vm1, %v948_v33 }
 0x685   :  { %v949_v55 = vpack.c.bf16 %v931_v7, %v928_v35  ;;  %3692 = vmatpush3.bf16.msra.mxu1 %v1137_v37  ;;  %v3349_v35 = vld [vmem:[%s5121_s9] ss:$0 sm:$0xff] }
 0x687   :  { %3693 = vmatprep.mubr.msk.bf16.mxu1 %vm258_vm1, %v949_v55 }
 0x690   :  { %3694 = vmatmul.mubr.msk.bf16.vlgmr.msra.gmra.mrb[16].mxu1 %vm258_vm1, %v950_v38 }
 0x763   :  { %v3695_v19 = vpop.f32.mrb[16].mxu1 }
 0x764   :  { %v1173_v41 = vpop.f32.mrb[17].mxu1  ;;  %v1213_v23 = vadd.f32 %v3695_v19, %v3347_v39 }
 0x765   :  { %v1211_v43 = vadd.f32 %v3347_v39, %v1173_v41  ;;  %v3696_v5 = vpop.f32.mrb[18].mxu1 }
 0x766   :  { %v1176_v10 = vpop.f32.mrb[19].mxu1  ;;  %v1214_v46 = vadd.f32 %v3696_v5, %v3347_v39  ;;  %v1217_v51 = vadd.f32 %v1213_v23, %v4300_v59 }
 0x767   :  { %v1212_v18 = vadd.f32 %v3347_v39, %v1176_v10  ;;  %v1215_v2 = vadd.f32 %v1211_v43, %v4293_v53 }
 0x768   :  { %v1227_v56 = vsel %vm80_vm0, %v1217_v51, 0.0  ;;  %v1218_v58 = vadd.f32 %v1214_v46, %v4302_v60  ;;  %v3926_v46 = vld [vmem:[%s5122_s12 + $0x10] sm:$0xff]  }
 0x769   :  { %v1221_v6 = vsel %vm80_vm0, %v1215_v2, 0.0  ;;  %v1216_v36 = vadd.f32 %v1212_v18, %v4295_v54  ;;  %v3924_v18 = vld [vmem:[%s5122_s12] sm:$0xff]  }
 0x76a   :  { %1222 = vadd.xlane.f32.xlu0 %v1221_v6  ;;  %v1230_v62 = vsel %vm80_vm0, %v1218_v58, 0.0  ;;  %3705 = vmatprep.subr.bf16.mxu0 %v3924_v18  ;;  %v3927_v6 = vld [vmem:[%s5122_s12 + $0x18] sm:$0xff]  }
 0x76b   :  { %v1224_v52 = vsel %vm80_vm0, %v1216_v36, 0.0 }
 0x76c   :  { %1225 = vadd.xlane.f32.xlu1 %v1224_v52 }
 0x76e   :  { %1228 = vadd.xlane.f32.xlu0 %v1227_v56 }
 0x772   :  { %1231 = vadd.xlane.f32.xlu0 %v1230_v62 }
 0x7f7   :  { %v1223_v53 = vpop.xlane.xlu0 %1222 }
 0x7f8   :  { %v1233_v63 = vmul.f32 0.03125, %v1223_v53 }
 0x7f9   :  { %v1226_v0 = vpop.xlane.xlu1 %1225 }
 0x7fa   :  { %v1237_v3 = vsub.f32 %v1215_v2, %v1233_v63  ;;  %v1234_v4 = vmul.f32 0.03125, %v1226_v0  ;;  %v3925_v2 = vld [vmem:[%s5122_s12 + $0x8] sm:$0xff]  }
 0x7fb   :  { %v1229_v54 = vpop.xlane.xlu0 %1228 }
 0x7fc   :  { %v1238_v8 = vsub.f32 %v1216_v36, %v1234_v4  ;;  %v1235_v59 = vmul.f32 0.03125, %v1229_v54  ;;  %v1241_v15 = vmul.f32 %v1237_v3, %v1237_v3  ;;  %v3350_v36 = vld [vmem:[%s5123_s11] ss:$0 sm:$0xff] }
 0x7fe   :  { %v1239_v17 = vsub.f32 %v1217_v51, %v1235_v59  ;;  %v1245_v61 = vsel %vm80_vm0, %v1241_v15, 0.0  ;;  %v1242_v24 = vmul.f32 %v1238_v8, %v1238_v8 }
 0x7ff   :  { %1246 = vadd.xlane.f32.xlu0 %v1245_v61  ;;  %v1232_v1 = vpop.xlane.xlu0 %1231 }
 0x800   :  { %v1236_v60 = vmul.f32 0.03125, %v1232_v1  ;;  %v1248_v42 = vsel %vm80_vm0, %v1242_v24, 0.0  ;;  %v1243_v20 = vmul.f32 %v1239_v17, %v1239_v17 }
 0x801   :  { %1249 = vadd.xlane.f32.xlu1 %v1248_v42 }
 0x802   :  { %v1240_v50 = vsub.f32 %v1218_v58, %v1236_v60  ;;  %v1251_v57 = vsel %vm80_vm0, %v1243_v20, 0.0 }
 0x803   :  { %1252 = vadd.xlane.f32.xlu0 %v1251_v57 }
 0x804   :  { %v1244_v48 = vmul.f32 %v1240_v50, %v1240_v50 }
 0x806   :  { %v1254_v40 = vsel %vm80_vm0, %v1244_v48, 0.0 }
 0x807   :  { %1255 = vadd.xlane.f32.xlu1 %v1254_v40 }
 0x88c   :  { %v1247_v21 = vpop.xlane.xlu0 %1246 }
 0x88d   :  { %v1257_v47 = vmul.f32 0.03125, %v1247_v21 }
 0x88e   :  { %v1250_v49 = vpop.xlane.xlu1 %1249 }
 0x88f   :  { %v1261_v22 = vadd.f32 1e-05, %v1257_v47  ;;  %v1258_v25 = vmul.f32 0.03125, %v1250_v49 }
 0x890   :  { %v1253_v12 = vpop.xlane.xlu0 %1252 }
 0x891   :  { %4014 = vrsqrt.f32 %v1261_v22  ;;  %v1262_v13 = vadd.f32 1e-05, %v1258_v25  ;;  %v1259_v14 = vmul.f32 0.03125, %v1253_v12 }
 0x893   :  { %4016 = vrsqrt.f32 %v1262_v13  ;;  %v1263_v27 = vadd.f32 1e-05, %v1259_v14 }
 0x894   :  { %v1256_v26 = vpop.xlane.xlu1 %1255 }
 0x895   :  { %4018 = vrsqrt.f32 %v1263_v27  ;;  %v1260_v28 = vmul.f32 0.03125, %v1256_v26 }
 0x897   :  { %v1264_v29 = vadd.f32 1e-05, %v1260_v28 }
 0x899   :  { %4020 = vrsqrt.f32 %v1264_v29 }
 0x89b   :  { %v4015_v30 = vpop.eup %4014 }
 0x89c   :  { %v1269_v32 = vmul.f32 %v4015_v30, %v1237_v3 }
 0x89d   :  { %v4017_v33 = vpop.eup %4016 }
 0x89e   :  { %v1270_v34 = vmul.f32 %v4017_v33, %v1238_v8  ;;  %v1279_v11 = vmul.f32 %v3348_v31, %v1269_v32 }
 0x89f   :  { %v4019_v16 = vpop.eup %4018 }
 0x8a0   :  { %v1271_v37 = vmul.f32 %v4019_v16, %v1239_v17  ;;  %v1280_v9 = vmul.f32 %v3348_v31, %v1270_v34  ;;  %v4620_v38 = vadd.f32 %v3349_v35, %v1279_v11 }
 0x8a2   :  { %v4622_v7 = vadd.f32 %v3349_v35, %v1280_v9  ;;  %v1281_v39 = vmul.f32 %v3348_v31, %v1271_v37 }
 0x8a3   :  { %v4021_v55 = vpop.eup %4020 }
 0x8a4   :  { %v1272_v19 = vmul.f32 %v4021_v55, %v1240_v50  ;;  %v1293_v41 = vpack.c.bf16 %v4622_v7, %v4620_v38  ;;  %v4627_v43 = vadd.f32 %v3349_v35, %v1281_v39 }
 0x8a6   :  { %v1282_v23 = vmul.f32 %v3348_v31, %v1272_v19  ;;  %3701 = vmatprep.mubr.msk.bf16.mxu0 %vm80_vm0, %v1293_v41 }
 0x8a8   :  { %v4629_v5 = vadd.f32 %v3349_v35, %v1282_v23  ;;  %v3355_v35 = vld [vmem:[%s5124_s13] ss:$0 sm:$0xff] }
 0x8aa   :  { %v1294_v10 = vpack.c.bf16 %v4629_v5, %v4627_v43 }
 0x8ac   :  { %3702 = vmatmul.mubr.msk.bf16.vlgmr.msra.gmra.mrb[20].mxu0 %vm80_vm0, %v1294_v10 }
 0x8ad   :  { %3706 = vmatpush3.bf16.msra.mxu0 %v3924_v18 }
 0x8ae   :  { %3707 = vmatprep.subr.bf16.mxu0 %v3925_v2 }
 0x8b1   :  { %3708 = vmatpush3.bf16.msra.mxu0 %v3925_v2 }
 0x8b2   :  { %3709 = vmatprep.subr.bf16.mxu0 %v3926_v46 }
 0x8b5   :  { %3710 = vmatpush3.bf16.msra.mxu0 %v3926_v46 }
 0x8b6   :  { %3711 = vmatprep.subr.bf16.mxu0 %v3927_v6 }
 0x8b9   :  { %3712 = vmatpush3.bf16.msra.mxu0 %v3927_v6 }
 0x97f   :  { %v3703_v51 = vpop.f32.mrb[20].mxu0 }
 0x980   :  { %v1367_v52 = vadd.f32 %v3703_v51, %v3350_v36  ;;  %v1358_v56 = vpop.f32.mrb[21].mxu0 }
 0x981   :  { %v1359_v58 = vadd.f32 %v3350_v36, %v1358_v56  ;;  %v3704_v62 = vpop.f32.mrb[22].mxu0 }
 0x982   :  { %v1375_v53 = vmul.f32 %v1367_v52, %v1367_v52  ;;  %v1370_v63 = vadd.f32 %v3704_v62, %v3350_v36  ;;  %v1361_v0 = vpop.f32.mrb[23].mxu0 }
 0x983   :  { %v1373_v3 = vmul.f32 %v1359_v58, %v1359_v58  ;;  %v1362_v4 = vadd.f32 %v3350_v36, %v1361_v0 }
 0x984   :  { %v1379_v54 = vmul.f32 %v1375_v53, %v1367_v52  ;;  %v1376_v8 = vmul.f32 %v1370_v63, %v1370_v63 }
 0x985   :  { %v1377_v59 = vmul.f32 %v1373_v3, %v1359_v58  ;;  %v1374_v15 = vmul.f32 %v1362_v4, %v1362_v4 }
 0x986   :  { %v1383_v17 = vmul.f32 0.044715, %v1379_v54  ;;  %v1380_v61 = vmul.f32 %v1376_v8, %v1370_v63 }
 0x987   :  { %v1381_v24 = vmul.f32 0.044715, %v1377_v59  ;;  %v1378_v1 = vmul.f32 %v1374_v15, %v1362_v4 }
 0x988   :  { %v1387_v60 = vadd.f32 %v1383_v17, %v1367_v52  ;;  %v1384_v42 = vmul.f32 0.044715, %v1380_v61 }
 0x989   :  { %v1385_v20 = vadd.f32 %v1381_v24, %v1359_v58  ;;  %v1382_v50 = vmul.f32 0.044715, %v1378_v1 }
 0x98a   :  { %v1391_v57 = vmul.f32 0.7978846, %v1387_v60  ;;  %v1388_v48 = vadd.f32 %v1384_v42, %v1370_v63  ;;  %v3928_v42 = vld [vmem:[%s5156_s28 + $0x10] sm:$0xff]  }
 0x98b   :  { %v1389_v40 = vmul.f32 0.7978846, %v1385_v20  ;;  %v1386_v44 = vadd.f32 %v1382_v50, %v1362_v4  ;;  %3717 = vmatprep.subr.bf16.mxu0 %v3928_v42  ;;  %v3929_v20 = vld [vmem:[%s5156_s28 + $0x18] sm:$0xff]  }
 0x98c   :  { %4022 = vtanh.f32 %v1391_v57  ;;  %v1392_v45 = vmul.f32 0.7978846, %v1388_v48 }
 0x98d   :  { %4024 = vtanh.f32 %v1389_v40  ;;  %v1390_v21 = vmul.f32 0.7978846, %v1386_v44 }
 0x98e   :  { %4026 = vtanh.f32 %v1392_v45 }
 0x98f   :  { %4028 = vtanh.f32 %v1390_v21 }
 0x996   :  { %v4023_v47 = vpop.eup %4022 }
 0x997   :  { %v4025_v49 = vpop.eup %4024  ;;  %v1399_v22 = vadd.f32 1.0, %v4023_v47 }
 0x998   :  { %v4027_v25 = vpop.eup %4026  ;;  %v1397_v12 = vadd.f32 1.0, %v4025_v49 }
 0x999   :  { %v4029_v13 = vpop.eup %4028  ;;  %v1403_v14 = vmul.f32 0.5, %v1399_v22  ;;  %v1400_v27 = vadd.f32 1.0, %v4027_v25 }
 0x99a   :  { %v1401_v26 = vmul.f32 0.5, %v1397_v12  ;;  %v1398_v28 = vadd.f32 1.0, %v4029_v13 }
 0x99b   :  { %v1404_v29 = vmul.f32 0.5, %v1400_v27  ;;  %v1407_v31 = vmul.f32 %v1403_v14, %v1367_v52  ;;  %v3362_v14 = vld [vmem:[%s5125_s14] ss:$0 sm:$0xff] }
 0x99c   :  { %v1402_v30 = vmul.f32 0.5, %v1398_v28  ;;  %v1405_v33 = vmul.f32 %v1401_v26, %v1359_v58 }
 0x99d   :  { %v1408_v32 = vmul.f32 %v1404_v29, %v1370_v63 }
 0x99e   :  { %v1406_v34 = vmul.f32 %v1402_v30, %v1362_v4 }
 0x99f   :  { %v1410_v11 = vpack.c.bf16 %v1408_v32, %v1407_v31  ;;  %v3363_v31 = vld [vmem:[%s5126_s15] ss:$0 sm:$0xff] }
 0x9a0   :  { %v1409_v16 = vpack.c.bf16 %v1406_v34, %v1405_v33 }
 0x9a2   :  { %3713 = vmatprep.mubr.msk.bf16.mxu0 %vm1450_vm3, %v1409_v16 }
 0x9a3   :  { %3714 = vmatmul.mubr.msk.bf16.vlgmr.msra.gmra.mrb[24].mxu0 %vm1450_vm3, %v1410_v11 }
 0x9a4   :  { %3718 = vmatpush3.bf16.msra.mxu0 %v3928_v42 }
 0x9a5   :  { %3719 = vmatprep.subr.bf16.mxu0 %v3929_v20 }
 0x9a8   :  { %3720 = vmatpush3.bf16.msra.mxu0 %v3929_v20 }
 0xa76   :  { %v3715_v37 = vpop.f32.mrb[24].mxu0 }
 0xa77   :  { %v1491_v9 = vpop.f32.mrb[25].mxu0  ;;  %v1500_v55 = vadd.f32 %v3715_v37, %v3355_v35 }
 0xa78   :  { %v1492_v39 = vadd.f32 %v3355_v35, %v1491_v9  ;;  %v3716_v19 = vpop.f32.mrb[26].mxu0 }
 0xa79   :  { %v1494_v41 = vpop.f32.mrb[27].mxu0  ;;  %v1503_v23 = vadd.f32 %v3716_v19, %v3355_v35  ;;  %v1508_v6 = vadd.f32 %v1500_v55, %v4627_v43 }
 0xa7a   :  { %v1495_v10 = vadd.f32 %v3355_v35, %v1494_v41  ;;  %v1506_v18 = vadd.f32 %v1492_v39, %v4620_v38 }
 0xa7b   :  { %v1509_v51 = vadd.f32 %v1503_v23, %v4629_v5  ;;  %v1518_v52 = vsel %vm80_vm0, %v1508_v6, 0.0 }
 0xa7c   :  { %v1512_v2 = vsel %vm80_vm0, %v1506_v18, 0.0  ;;  %v1507_v46 = vadd.f32 %v1495_v10, %v4622_v7  ;;  %v3369_v10 = vld [vmem:[%s5159_s2 + $0x1] ss:$0 sm:$0xff]  ;;  %s5164_s2 = smov 96  }
 0xa7d   :  { %1513 = vadd.xlane.f32.xlu0 %v1512_v2  ;;  %v1521_v56 = vsel %vm80_vm0, %v1509_v51, 0.0 }
 0xa7e   :  { %v1515_v36 = vsel %vm80_vm0, %v1507_v46, 0.0 }
 0xa7f   :  { %1516 = vadd.xlane.f32.xlu1 %v1515_v36 }
 0xa81   :  { %1519 = vadd.xlane.f32.xlu0 %v1518_v52 }
 0xa83   :  { %1522 = vadd.xlane.f32.xlu1 %v1521_v56 }
 0xb0a   :  { %v1514_v58 = vpop.xlane.xlu0 %1513 }
 0xb0b   :  { %v1524_v38 = vmul.f32 0.03125, %v1514_v58 }
 0xb0c   :  { %v1517_v62 = vpop.xlane.xlu1 %1516 }
 0xb0d   :  { %v1528_v53 = vsub.f32 %v1506_v18, %v1524_v38  ;;  %v1525_v63 = vmul.f32 0.03125, %v1517_v62 }
 0xb0e   :  { %v1520_v7 = vpop.xlane.xlu0 %1519 }
 0xb0f   :  { %v1529_v0 = vsub.f32 %v1507_v46, %v1525_v63  ;;  %v1526_v43 = vmul.f32 0.03125, %v1520_v7  ;;  %v1532_v3 = vmul.f32 %v1528_v53, %v1528_v53 }
 0xb10   :  { %v1523_v4 = vpop.xlane.xlu1 %1522 }
 0xb11   :  { %v1530_v54 = vsub.f32 %v1508_v6, %v1526_v43  ;;  %v1527_v8 = vmul.f32 0.03125, %v1523_v4  ;;  %v1536_v5 = vsel %vm80_vm0, %v1532_v3, 0.0  ;;  %v1533_v59 = vmul.f32 %v1529_v0, %v1529_v0 }
 0xb12   :  { %1537 = vadd.xlane.f32.xlu0 %v1536_v5 }
 0xb13   :  { %v1531_v15 = vsub.f32 %v1509_v51, %v1527_v8  ;;  %v1539_v17 = vsel %vm80_vm0, %v1533_v59, 0.0  ;;  %v1534_v61 = vmul.f32 %v1530_v54, %v1530_v54 }
 0xb14   :  { %1540 = vadd.xlane.f32.xlu1 %v1539_v17 }
 0xb15   :  { %v1542_v24 = vsel %vm80_vm0, %v1534_v61, 0.0  ;;  %v1535_v1 = vmul.f32 %v1531_v15, %v1531_v15 }
 0xb16   :  { %1543 = vadd.xlane.f32.xlu0 %v1542_v24 }
 0xb17   :  { %v1545_v60 = vsel %vm80_vm0, %v1535_v1, 0.0 }
 0xb18   :  { %1546 = vadd.xlane.f32.xlu1 %v1545_v60 }
 0xb9f   :  { %v1538_v50 = vpop.xlane.xlu0 %1537 }
 0xba0   :  { %v1548_v57 = vmul.f32 0.03125, %v1538_v50 }
 0xba1   :  { %v1541_v48 = vpop.xlane.xlu1 %1540 }
 0xba2   :  { %v1552_v40 = vadd.f32 1e-05, %v1548_v57  ;;  %v1549_v44 = vmul.f32 0.03125, %v1541_v48 }
 0xba3   :  { %v1544_v45 = vpop.xlane.xlu0 %1543 }
 0xba4   :  { %4030 = vrsqrt.f32 %v1552_v40  ;;  %v1553_v21 = vadd.f32 1e-05, %v1549_v44  ;;  %v1550_v47 = vmul.f32 0.03125, %v1544_v45  ;;  %v4130_v44 = vld [vmem:[%s5160_s30 + $0x10] sm:$0xff] }
 0xba5   :  { %v1547_v49 = vpop.xlane.xlu1 %1546 }
 0xba6   :  { %4032 = vrsqrt.f32 %v1553_v21  ;;  %v1554_v22 = vadd.f32 1e-05, %v1550_v47  ;;  %v1551_v25 = vmul.f32 0.03125, %v1547_v49  ;;  %v4131_v49 = vld [vmem:[%s5160_s30] sm:$0xff] }
 0xba8   :  { %4034 = vrsqrt.f32 %v1554_v22  ;;  %v1555_v12 = vadd.f32 1e-05, %v1551_v25 }
 0xbaa   :  { %4036 = vrsqrt.f32 %v1555_v12 }
 0xbae   :  { %v4031_v13 = vpop.eup %4030 }
 0xbaf   :  { %v1560_v27 = vmul.f32 %v4031_v13, %v1528_v53  ;;  %v4132_v13 = vld [vmem:[%s5160_s30 + $0x8] sm:$0xff] }
 0xbb0   :  { %v4033_v26 = vpop.eup %4032 }
 0xbb1   :  { %v1561_v28 = vmul.f32 %v4033_v26, %v1529_v0  ;;  %v1570_v29 = vmul.f32 %v3362_v14, %v1560_v27  ;;  %v4133_v26 = vld [vmem:[%s5160_s30 + $0x18] sm:$0xff] }
 0xbb2   :  { %v4035_v30 = vpop.eup %4034 }
 0xbb3   :  { %v1562_v32 = vmul.f32 %v4035_v30, %v1530_v54  ;;  %v1571_v33 = vmul.f32 %v3362_v14, %v1561_v28  ;;  %v4678_v35 = vadd.f32 %v3363_v31, %v1570_v29 }
 0xbb4   :  { %v4037_v34 = vpop.eup %4036 }
 0xbb5   :  { %v1572_v11 = vmul.f32 %v3362_v14, %v1562_v32  ;;  %v1563_v16 = vmul.f32 %v4037_v34, %v1531_v15  ;;  %v4680_v37 = vadd.f32 %v3363_v31, %v1571_v33 }
 0xbb7   :  { %v1573_v9 = vmul.f32 %v3362_v14, %v1563_v16  ;;  %v1584_v55 = vpack.c.bf16 %v4680_v37, %v4678_v35  ;;  %v4685_v39 = vadd.f32 %v3363_v31, %v1572_v11 }
 0xbb9   :  { %3721 = vmatprep.mubr.msk.bf16.mxu0 %vm80_vm0, %v1584_v55  ;;  %v4687_v19 = vadd.f32 %v3363_v31, %v1573_v9 }
 0xbbb   :  { %v1585_v41 = vpack.c.bf16 %v4687_v19, %v4685_v39 }
 0xbbd   :  { %3722 = vmatmul.mubr.msk.bf16.vlgmr.msra.gmra.mrb[28].mxu0 %vm80_vm0, %v1585_v41 }
 0xc90   :  { %v3723_v23 = vpop.f32.mrb[28].mxu0 }
 0xc91   :  { %v1651_v18 = vpop.f32.mrb[29].mxu0  ;;  %v1660_v46 = vadd.f32 %v3723_v23, %v3369_v10 }
 0xc92   :  { %v3724_v2 = vpop.f32.mrb[30].mxu0  ;;  %v1652_v51 = vadd.f32 %v3369_v10, %v1651_v18 }
 0xc93   :  { %v1663_v6 = vadd.f32 %v3724_v2, %v3369_v10  ;;  %v1654_v36 = vpop.f32.mrb[31].mxu0 }
 0xc94   :  { %v1655_v52 = vadd.f32 %v3369_v10, %v1654_v36 }
 0xc95   :  { %v1667_v56 = vpack.c.bf16 %v1663_v6, %v1660_v46 }
 0xc96   :  { %v1666_v58 = vpack.c.bf16 %v1655_v52, %v1652_v51 }
 0xc97   :  { %1672 = vrot.lane.b32.xlu1 %v1667_v56, %s4134_s6 }
 0xc98   :  { %1670 = vrot.lane.b32.xlu0 %v1666_v58, %s4134_s6  ;;  %3729 = vmatprep.mubr.msk.bf16.mxu1 %vm258_vm1, %v1666_v58  ;;  %s5165_s6 = smov 64  }
 0xc9b   :  { %1674 = vrot.lane.b32.xlu1 %v1666_v58, %s4135_s27 }
 0xc9c   :  { %1678 = vrot.lane.b32.xlu0 %v1666_v58, %s5163_s0 }
 0xc9f   :  { %1676 = vrot.lane.b32.xlu1 %v1667_v56, %s4135_s27 }
 0xca0   :  { %1682 = vrot.lane.b32.xlu0 %v1666_v58, %s5164_s2 }
 0xca3   :  { %1680 = vrot.lane.b32.xlu1 %v1667_v56, %s5163_s0 }
 0xca7   :  { %1684 = vrot.lane.b32.xlu1 %v1667_v56, %s5164_s2 }
 0xd09   :  { %v4704_v38 = vpop.permute.xlu1 %1672 }
 0xd0a   :  { %1749 = vrot.lane.b32.xlu1 %v4704_v38, %s5164_s2  ;;  %v4708_v62 = vpop.permute.xlu0 %1670 }
 0xd0b   :  { %3737 = vmatprep.mubr.msk.bf16.mxu0 %vm258_vm1, %v4708_v62  ;;  %1747 = vrot.lane.b32.xlu0 %v4708_v62, %s5164_s2 }
 0xd0d   :  { %v4714_v53 = vpop.permute.xlu1 %1674 }
 0xd0e   :  { %v4716_v63 = vpop.permute.xlu0 %1678 }
 0xd0f   :  { %1812 = vrot.lane.b32.xlu0 %v4714_v53, %s5164_s2 }
 0xd11   :  { %v4720_v7 = vpop.permute.xlu1 %1676 }
 0xd12   :  { %1814 = vrot.lane.b32.xlu1 %v4720_v7, %s5164_s2  ;;  %v1683_v0 = vpop.permute.xlu0 %1682 }
 0xd13   :  { %v1693_v43 = vsel %vm258_vm1, %v1683_v0, 0  ;;  %1877 = vrot.lane.b32.xlu0 %v4716_v63, %s5164_s2  ;;  %3901 = vmatprep.subr.msk.bf16.mxu1 %vm258_vm1, %v1683_v0 }
 0xd14   :  { %3726 = vmatpush3.bf16.xpose.msra.mxu1 %v1693_v43 }
 0xd15   :  { %v4728_v3 = vpop.permute.xlu1 %1680 }
 0xd16   :  { %1879 = vrot.lane.b32.xlu1 %v4728_v3, %s5164_s2 }
 0xd17   :  { %2126 = vrot.lane.b32.xlu0 %v1666_v58, %s5165_s6 }
 0xd19   :  { %v1685_v4 = vpop.permute.xlu1 %1684 }
 0xd1a   :  { %v1696_v54 = vsel %vm258_vm1, %v1685_v4, 0  ;;  %2128 = vrot.lane.b32.xlu1 %v1667_v56, %s5165_s6  ;;  %3902 = vmatprep.subr.msk.bf16.mxu1 %vm258_vm1, %v1685_v4 }
 0xd1c   :  { %3728 = vmatpush3.bf16.xpose.msra.mxu1 %v1696_v54 }
 0xd23   :  { %3730 = vmatmul.mubr.msk.bf16.vlgmr.msra.gmra.mrb[20].mxu1 %vm258_vm1, %v1667_v56 }
 0xd24   :  { %3745 = vmatprep.mubr.msk.bf16.mxu1 %vm258_vm1, %v4714_v53 }
 0xd7c   :  { %v1750_v59 = vpop.permute.xlu1 %1749 }
 0xd7d   :  { %v1748_v8 = vpop.permute.xlu0 %1747  ;;  %v1761_v1 = vsel %vm258_vm1, %v1750_v59, 0 }
 0xd7e   :  { %v1758_v5 = vsel %vm258_vm1, %v1748_v8, 0  ;;  %3903 = vmatprep.subr.msk.bf16.mxu0 %vm258_vm1, %v1748_v8 }
 0xd7f   :  { %3734 = vmatpush3.bf16.xpose.msra.mxu0 %v1758_v5 }
 0xd80   :  { %3904 = vmatprep.subr.msk.bf16.mxu0 %vm258_vm1, %v1750_v59 }
 0xd81   :  { %v1813_v15 = vpop.permute.xlu0 %1812 }
 0xd82   :  { %v1823_v17 = vsel %vm258_vm1, %v1813_v15, 0  ;;  %3905 = vmatprep.subr.msk.bf16.mxu1 %vm258_vm1, %v1813_v15 }
 0xd83   :  { %3742 = vmatpush3.bf16.xpose.msra.mxu1 %v1823_v17 }
 0xd84   :  { %v1815_v61 = vpop.permute.xlu1 %1814 }
 0xd85   :  { %v1878_v24 = vpop.permute.xlu0 %1877  ;;  %3906 = vmatprep.subr.msk.bf16.mxu1 %vm258_vm1, %v1815_v61  ;;  %v1826_v60 = vsel %vm258_vm1, %v1815_v61, 0 }
 0xd86   :  { %v1888_v50 = vsel %vm258_vm1, %v1878_v24, 0 }
 0xd87   :  { %3736 = vmatpush3.bf16.xpose.msra.mxu0 %v1761_v1 }
 0xd88   :  { %3907 = vmatprep.subr.msk.bf16.mxu0 %vm258_vm1, %v1878_v24  ;;  %v1880_v20 = vpop.permute.xlu1 %1879 }
 0xd89   :  { %v2127_v42 = vpop.permute.xlu0 %2126  ;;  %v1891_v48 = vsel %vm258_vm1, %v1880_v20, 0 }
 0xd8b   :  { %3744 = vmatpush3.bf16.xpose.msra.mxu1 %v1826_v60 }
 0xd8c   :  { %3757 = vmatprep.subr.bf16.mxu1 %v2127_v42  ;;  %v2129_v57 = vpop.permute.xlu1 %2128 }
 0xd8e   :  { %3738 = vmatmul.mubr.msk.bf16.vlgmr.msra.gmra.mrb[32].mxu0 %vm258_vm1, %v4704_v38 }
 0xd8f   :  { %3750 = vmatpush3.bf16.xpose.msra.mxu0 %v1888_v50  ;;  %3753 = vmatprep.mubr.msk.bf16.mxu0 %vm258_vm1, %v4716_v63 }
 0xd90   :  { %3908 = vmatprep.subr.msk.bf16.mxu0 %vm258_vm1, %v1880_v20 }
 0xd92   :  { %3746 = vmatmul.mubr.msk.bf16.vlgmr.msra.gmra.mrb[24].mxu1 %vm258_vm1, %v4720_v7 }
 0xd93   :  { %3758 = vmatpush3.bf16.msra.mxu1 %v2127_v42 }
 0xd94   :  { %3759 = vmatprep.subr.bf16.mxu1 %v2129_v57 }
 0xd97   :  { %3752 = vmatpush3.bf16.xpose.msra.mxu0 %v1891_v48  ;;  %3760 = vmatpush3.bf16.msra.mxu1 %v2129_v57 }
 0xd9e   :  { %3754 = vmatmul.mubr.msk.bf16.vlgmr.msra.gmra.mrb[36].mxu0 %vm258_vm1, %v4728_v3 }
 0xdf6   :  { %v3731_v40 = vpop.f32.mrb[20].mxu1 }
 0xdf7   :  { %v4762_v45 = vadd.f32 %v4130_v44, %v3731_v40  ;;  %v1732_v21 = vpop.f32.mrb[21].mxu1 }
 0xdf8   :  { %v3732_v47 = vpop.f32.mrb[22].mxu1  ;;  %v4767_v22 = vadd.f32 %v4131_v49, %v1732_v21 }
 0xdf9   :  { %v1735_v25 = vpop.f32.mrb[23].mxu1  ;;  %v1948_v12 = vsel %vm80_vm0, %v4762_v45, -inf  ;;  %v1744_v28 = vadd.f32 %v4133_v26, %v3732_v47 }
 0xdfa   :  { %v4774_v14 = vadd.f32 %v4132_v13, %v1735_v25  ;;  %1949 = vmax.xlane.f32.xlu0 %v1948_v12  ;;  %v1942_v29 = vsel %vm80_vm0, %v4767_v22, -inf }
 0xdfb   :  { %v1951_v30 = vsel %vm80_vm0, %v1744_v28, -inf }
 0xdfc   :  { %v1945_v27 = vsel %vm80_vm0, %v4774_v14, -inf }
 0xdfd   :  { %1946 = vmax.xlane.f32.xlu1 %v1945_v27 }
 0xdfe   :  { %1943 = vmax.xlane.f32.xlu0 %v1942_v29 }
 0xe02   :  { %1952 = vmax.xlane.f32.xlu0 %v1951_v30 }
 0xe61   :  { %v3739_v31 = vpop.f32.mrb[32].mxu0 }
 0xe62   :  { %v4784_v32 = vadd.f32 %v4130_v44, %v3739_v31  ;;  %v1797_v33 = vpop.f32.mrb[33].mxu0 }
 0xe63   :  { %v3740_v34 = vpop.f32.mrb[34].mxu0  ;;  %v4794_v2 = vadd.f32 %v4131_v49, %v1797_v33 }
 0xe64   :  { %v4786_v11 = vadd.f32 %v4133_v26, %v3740_v34  ;;  %v1800_v16 = vpop.f32.mrb[35].mxu0  ;;  %v1960_v9 = vsel %vm80_vm0, %v4784_v32, -inf }
 0xe65   :  { %v3747_v55 = vpop.f32.mrb[24].mxu1  ;;  %1961 = vmax.xlane.f32.xlu0 %v1960_v9  ;;  %v4800_v51 = vadd.f32 %v4132_v13, %v1800_v16  ;;  %v1954_v58 = vsel %vm80_vm0, %v4794_v2, -inf }
 0xe66   :  { %v4790_v41 = vadd.f32 %v4130_v44, %v3747_v55  ;;  %v1862_v23 = vpop.f32.mrb[25].mxu1  ;;  %v1963_v10 = vsel %vm80_vm0, %v4786_v11, -inf }
 0xe67   :  { %v3748_v18 = vpop.f32.mrb[26].mxu1  ;;  %1964 = vmax.xlane.f32.xlu1 %v1963_v10  ;;  %v4804_v56 = vadd.f32 %v4131_v49, %v1862_v23  ;;  %v1957_v43 = vsel %vm80_vm0, %v4800_v51, -inf }
 0xe68   :  { %v4796_v46 = vadd.f32 %v4133_v26, %v3748_v18  ;;  %v1865_v6 = vpop.f32.mrb[27].mxu1  ;;  %v1972_v36 = vsel %vm80_vm0, %v4790_v41, -inf }
 0xe69   :  { %1973 = vmax.xlane.f32.xlu0 %v1972_v36  ;;  %v4808_v0 = vadd.f32 %v4132_v13, %v1865_v6  ;;  %v1966_v4 = vsel %vm80_vm0, %v4804_v56, -inf }
 0xe6a   :  { %v1975_v52 = vsel %vm80_vm0, %v4796_v46, -inf }
 0xe6b   :  { %1976 = vmax.xlane.f32.xlu1 %v1975_v52  ;;  %v1969_v59 = vsel %vm80_vm0, %v4808_v0, -inf }
 0xe6d   :  { %1955 = vmax.xlane.f32.xlu0 %v1954_v58 }
 0xe6f   :  { %1958 = vmax.xlane.f32.xlu1 %v1957_v43 }
 0xe71   :  { %v3755_v54 = vpop.f32.mrb[36].mxu0  ;;  %1967 = vmax.xlane.f32.xlu0 %v1966_v4 }
 0xe72   :  { %v4814_v8 = vadd.f32 %v4130_v44, %v3755_v54  ;;  %v1927_v5 = vpop.f32.mrb[37].mxu0 }
 0xe73   :  { %v3756_v15 = vpop.f32.mrb[38].mxu0  ;;  %1970 = vmax.xlane.f32.xlu1 %v1969_v59  ;;  %v4818_v17 = vadd.f32 %v4131_v49, %v1927_v5 }
 0xe74   :  { %v4820_v61 = vadd.f32 %v4133_v26, %v3756_v15  ;;  %v1930_v24 = vpop.f32.mrb[39].mxu0  ;;  %v1984_v1 = vsel %vm80_vm0, %v4814_v8, -inf }
 0xe75   :  { %1985 = vmax.xlane.f32.xlu0 %v1984_v1  ;;  %v4824_v60 = vadd.f32 %v4132_v13, %v1930_v24  ;;  %v1978_v20 = vsel %vm80_vm0, %v4818_v17, -inf }
 0xe76   :  { %v1987_v42 = vsel %vm80_vm0, %v4820_v61, -inf }
 0xe77   :  { %1988 = vmax.xlane.f32.xlu1 %v1987_v42  ;;  %v1981_v50 = vsel %vm80_vm0, %v4824_v60, -inf }
 0xe79   :  { %1979 = vmax.xlane.f32.xlu0 %v1978_v20 }
 0xe7b   :  { %1982 = vmax.xlane.f32.xlu1 %v1981_v50 }
 0xe87   :  { %v1950_v57 = vpop.xlane.xlu0 %1949 }
 0xe88   :  { %v1992_v12 = vsub.f32 %v4762_v45, %v1950_v57 }
 0xe8a   :  { %v1947_v48 = vpop.xlane.xlu1 %1946  ;;  %v2010_v13 = vmul.f32 1.442695, %v1992_v12 }
 0xe8b   :  { %v1944_v40 = vpop.xlane.xlu0 %1943  ;;  %v1991_v44 = vsub.f32 %v4774_v14, %v1947_v48 }
 0xe8c   :  { %v1990_v27 = vsub.f32 %v4767_v22, %v1944_v40 }
 0xe8d   :  { %v2008_v49 = vmul.f32 1.442695, %v1991_v44 }
 0xe8f   :  { %2187 = vrot.lane.b32.xlu0 %v4708_v62, %s5165_s6  ;;  %v1953_v21 = vpop.xlane.xlu0 %1952  ;;  %v2006_v62 = vmul.f32 1.442695, %v1990_v27 }
 0xe90   :  { %v1993_v47 = vsub.f32 %v1744_v28, %v1953_v21 }
 0xe92   :  { %v2012_v25 = vmul.f32 1.442695, %v1993_v47 }
 0xe94   :  { %4038 = vpow2.f32 %v2012_v25 }
 0xe95   :  { %4040 = vpow2.f32 %v2008_v49 }
 0xe96   :  { %4042 = vpow2.f32 %v2010_v13 }
 0xe97   :  { %4044 = vpow2.f32 %v2006_v62 }
 0xe9e   :  { %v4837_v26 = vpop.eup %4038 }
 0xe9f   :  { %v2047_v29 = vsel %vm80_vm0, %v4837_v26, 0.0  ;;  %v4841_v14 = vpop.eup %4040 }
 0xea0   :  { %2048 = vadd.xlane.f32.xlu1 %v2047_v29  ;;  %v2041_v28 = vsel %vm80_vm0, %v4841_v14, 0.0  ;;  %v4845_v30 = vpop.eup %4042 }
 0xea1   :  { %v2044_v45 = vsel %vm80_vm0, %v4845_v30, 0.0  ;;  %v4849_v22 = vpop.eup %4044 }
 0xea2   :  { %v2038_v31 = vsel %vm80_vm0, %v4849_v22, 0.0 }
 0xea4   :  { %2042 = vadd.xlane.f32.xlu1 %v2041_v28 }
 0xeae   :  { %2045 = vadd.xlane.f32.xlu0 %v2044_v45 }
 0xeb2   :  { %2039 = vadd.xlane.f32.xlu0 %v2038_v31 }
 0xef2   :  { %v1962_v33 = vpop.xlane.xlu0 %1961 }
 0xef3   :  { %v1996_v34 = vsub.f32 %v4784_v32, %v1962_v33 }
 0xef4   :  { %v1965_v59 = vpop.xlane.xlu1 %1964 }
 0xef5   :  { %v2018_v16 = vmul.f32 1.442695, %v1996_v34  ;;  %v1997_v20 = vsub.f32 %v4786_v11, %v1965_v59 }
 0xef6   :  { %v1974_v9 = vpop.xlane.xlu0 %1973 }
 0xef7   :  { %4046 = vpow2.f32 %v2018_v16  ;;  %v2000_v55 = vsub.f32 %v4790_v41, %v1974_v9  ;;  %v2020_v40 = vmul.f32 1.442695, %v1997_v20 }
 0xef8   :  { %v1977_v15 = vpop.xlane.xlu1 %1976 }
 0xef9   :  { %v2026_v23 = vmul.f32 1.442695, %v2000_v55  ;;  %v2001_v44 = vsub.f32 %v4796_v46, %v1977_v15 }
 0xefa   :  { %v1956_v10 = vpop.xlane.xlu0 %1955 }
 0xefb   :  { %4048 = vpow2.f32 %v2026_v23  ;;  %v1994_v18 = vsub.f32 %v4794_v2, %v1956_v10  ;;  %v2028_v47 = vmul.f32 1.442695, %v2001_v44 }
 0xefc   :  { %v1959_v24 = vpop.xlane.xlu1 %1958 }
 0xefd   :  { %v2014_v6 = vmul.f32 1.442695, %v1994_v18 }
 0xefe   :  { %v1968_v36 = vpop.xlane.xlu0 %1967 }
 0xeff   :  { %4050 = vpow2.f32 %v2014_v6  ;;  %v1998_v42 = vsub.f32 %v4804_v56, %v1968_v36 }
 0xf00   :  { %v4872_v1 = vpop.xlane.xlu1 %1970 }
 0xf01   :  { %v4856_v52 = vpop.eup %4046  ;;  %v2022_v50 = vmul.f32 1.442695, %v1998_v42 }
 0xf02   :  { %v1986_v58 = vpop.xlane.xlu0 %1985  ;;  %v2056_v43 = vsel %vm80_vm0, %v4856_v52, 0.0 }
 0xf03   :  { %2057 = vadd.xlane.f32.xlu0 %v2056_v43  ;;  %v2004_v57 = vsub.f32 %v4814_v8, %v1986_v58  ;;  %4052 = vpow2.f32 %v2022_v50 }
 0xf04   :  { %v1989_v48 = vpop.xlane.xlu1 %1988  ;;  %4054 = vpow2.f32 %v2020_v40 }
 0xf05   :  { %v4860_v32 = vpop.eup %4048  ;;  %v2005_v56 = vsub.f32 %v4820_v61, %v1989_v48 }
 0xf06   :  { %v1980_v4 = vpop.xlane.xlu0 %1979  ;;  %v2068_v41 = vsel %vm80_vm0, %v4860_v32, 0.0 }
 0xf07   :  { %2069 = vadd.xlane.f32.xlu1 %v2068_v41  ;;  %v2002_v21 = vsub.f32 %v4818_v17, %v1980_v4  ;;  %v2036_v12 = vmul.f32 1.442695, %v2005_v56 }
 0xf08   :  { %v1983_v49 = vpop.xlane.xlu1 %1982 }
 0xf09   :  { %v4864_v54 = vpop.eup %4050  ;;  %v2030_v11 = vmul.f32 1.442695, %v2002_v21 }
 0xf0a   :  { %v2188_v2 = vpop.permute.xlu0 %2187  ;;  %v2050_v5 = vsel %vm80_vm0, %v4864_v54, 0.0 }
 0xf0b   :  { %2051 = vadd.xlane.f32.xlu0 %v2050_v5  ;;  %3765 = vmatprep.subr.bf16.mxu0 %v2188_v2 }
 0xf0c   :  { %3766 = vmatpush3.bf16.msra.mxu0 %v2188_v2 }
 0xf0d   :  { %v4881_v13 = vpop.eup %4052 }
 0xf0e   :  { %v4883_v46 = vpop.eup %4054 }
 0xf0f   :  { %v2059_v28 = vsel %vm80_vm0, %v4883_v46, 0.0 }
 0xf18   :  { %2248 = vrot.lane.b32.xlu1 %v4714_v53, %s5165_s6  ;;  %v2034_v53 = vmul.f32 1.442695, %v2004_v57 }
 0xf1a   :  { %4056 = vpow2.f32 %v2034_v53 }
 0xf1b   :  { %4058 = vpow2.f32 %v2028_v47  ;;  %v3390_v47 = vld [vmem:[%s5161_s25 + $0x10] sm:$0xf] }
 0xf1c   :  { %4060 = vpow2.f32 %v2030_v11 }
 0xf21   :  { %2189 = vrot.lane.b32.xlu0 %v4704_v38, %s5165_s6  ;;  %v1995_v38 = vsub.f32 %v4800_v51, %v1959_v24  ;;  %v2062_v51 = vsel %vm80_vm0, %v4881_v13, 0.0 }
 0xf23   :  { %v2016_v25 = vmul.f32 1.442695, %v1995_v38 }
 0xf24   :  { %v4887_v29 = vpop.eup %4056 }
 0xf25   :  { %4062 = vpow2.f32 %v2016_v25  ;;  %v4889_v61 = vpop.eup %4058  ;;  %v2080_v45 = vsel %vm80_vm0, %v4887_v29, 0.0 }
 0xf26   :  { %4064 = vpow2.f32 %v2036_v12  ;;  %v4895_v31 = vpop.eup %4060  ;;  %v2071_v34 = vsel %vm80_vm0, %v4889_v61, 0.0 }
 0xf27   :  { %v2074_v16 = vsel %vm80_vm0, %v4895_v31, 0.0 }
 0xf2d   :  { %v2049_v8 = vpop.xlane.xlu1 %2048 }
 0xf2f   :  { %v4897_v33 = vpop.eup %4062 }
 0xf30   :  { %v4903_v9 = vpop.eup %4064  ;;  %v2053_v23 = vsel %vm80_vm0, %v4897_v33, 0.0 }
 0xf31   :  { %v2043_v17 = vpop.xlane.xlu1 %2042  ;;  %v2083_v10 = vsel %vm80_vm0, %v4903_v9, 0.0 }
 0xf3b   :  { %v2046_v27 = vpop.xlane.xlu0 %2045 }
 0xf3c   :  { %2063 = vadd.xlane.f32.xlu1 %v2062_v51  ;;  %4066 = vrcp.f32 %v2046_v27 }
 0xf3d   :  { %4068 = vrcp.f32 %v2043_v17 }
 0xf3e   :  { %4070 = vrcp.f32 %v2049_v8 }
 0xf3f   :  { %v2040_v62 = vpop.xlane.xlu0 %2039 }
 0xf40   :  { %4072 = vrcp.f32 %v2040_v62  ;;  %2060 = vadd.xlane.f32.xlu1 %v2059_v28  ;;  %2081 = vadd.xlane.f32.xlu0 %v2080_v45 }
 0xf44   :  { %2072 = vadd.xlane.f32.xlu1 %v2071_v34  ;;  %2075 = vadd.xlane.f32.xlu0 %v2074_v16 }
 0xf46   :  { %v4067_v55 = vpop.eup %4066 }
 0xf47   :  { %v4069_v18 = vpop.eup %4068  ;;  %v2104_v58 = vmul.f32 %v4067_v55, %v4845_v30  ;;  %v1999_v30 = vsub.f32 %v4808_v0, %v4872_v1 }
 0xf48   :  { %2054 = vadd.xlane.f32.xlu1 %v2053_v23  ;;  %2084 = vadd.xlane.f32.xlu0 %v2083_v10  ;;  %v4071_v6 = vpop.eup %4070  ;;  %v2103_v4 = vmul.f32 %v4069_v18, %v4841_v14  ;;  %v2003_v14 = vsub.f32 %v4824_v60, %v1983_v49 }
 0xf49   :  { %v2105_v41 = vmul.f32 %v4071_v6, %v4837_v26 }
 0xf4a   :  { %v4073_v36 = vpop.eup %4072  ;;  %v2032_v26 = vmul.f32 1.442695, %v2003_v14 }
 0xf4b   :  { %v2102_v43 = vmul.f32 %v4073_v36, %v4849_v22  ;;  %v2119_v5 = vpack.c.bf16 %v2105_v41, %v2104_v58  ;;  %v2024_v22 = vmul.f32 1.442695, %v1999_v30  ;;  %v2390_v41 = vsel %vm961_vm2, %v3390_v47, 0 }
 0xf4d   :  { %v2118_v2 = vpack.c.bf16 %v2103_v4, %v2102_v43  ;;  %4074 = vpow2.f32 %v2024_v22 }
 0xf4e   :  { %4076 = vpow2.f32 %v2032_v26 }
 0xf4f   :  { %3761 = vmatprep.mubr.msk.bf16.mxu1 %vm80_vm0, %v2118_v2 }
 0xf50   :  { %3762 = vmatmul.mubr.msk.bf16.vlgmr.msra.gmra.mrb[28].mxu1 %vm80_vm0, %v2119_v5 }
 0xf57   :  { %v4922_v59 = vpop.eup %4074 }
 0xf58   :  { %v2065_v15 = vsel %vm80_vm0, %v4922_v59, 0.0  ;;  %v4926_v24 = vpop.eup %4076 }
 0xf59   :  { %2250 = vrot.lane.b32.xlu1 %v4720_v7, %s5165_s6 }
 0xf5e   :  { %2309 = vrot.lane.b32.xlu0 %v4716_v63, %s5165_s6  ;;  %v2077_v63 = vsel %vm80_vm0, %v4926_v24, 0.0 }
 0xf7d   :  { %2066 = vadd.xlane.f32.xlu1 %v2065_v15  ;;  %v3392_v15 = vld [vmem:[%s5161_s25 + $0x18] sm:$0xf] }
 0xf81   :  { %2078 = vadd.xlane.f32.xlu1 %v2077_v63 }
 0xf90   :  { %v2058_v7 = vpop.xlane.xlu0 %2057 }
 0xf92   :  { %2311 = vrot.lane.b32.xlu1 %v4728_v3, %s5165_s6 }
 0xf94   :  { %v2070_v0 = vpop.xlane.xlu1 %2069 }
 0xf98   :  { %v2249_v60 = vpop.permute.xlu1 %2248  ;;  %v2052_v1 = vpop.xlane.xlu0 %2051 }
 0xf99   :  { %3773 = vmatprep.subr.bf16.mxu1 %v2249_v60 }
 0xf9a   :  { %3774 = vmatpush3.bf16.msra.mxu1 %v2249_v60 }
 0xf9c   :  { %v2190_v42 = vpop.permute.xlu0 %2189 }
 0xf9d   :  { %3767 = vmatprep.subr.bf16.mxu0 %v2190_v42 }
 0xf9e   :  { %3768 = vmatpush3.bf16.msra.mxu0 %v2190_v42  ;;  %v2506_v42 = vsel %vm961_vm2, %v3392_v15, 0 }
 0xfc9   :  { %v2064_v20 = vpop.xlane.xlu1 %2063 }
 0xfcd   :  { %v2061_v50 = vpop.xlane.xlu1 %2060  ;;  %v2082_v57 = vpop.xlane.xlu0 %2081 }
 0xfce   :  { %4078 = vrcp.f32 %v2061_v50 }
 0xfcf   :  { %4080 = vrcp.f32 %v2052_v1 }
 0xfd0   :  { %4082 = vrcp.f32 %v2058_v7 }
 0xfd1   :  { %v2073_v48 = vpop.xlane.xlu1 %2072  ;;  %v2076_v40 = vpop.xlane.xlu0 %2075 }
 0xfd5   :  { %v2055_v44 = vpop.xlane.xlu1 %2054  ;;  %v2085_v53 = vpop.xlane.xlu0 %2084 }
 0xfd6   :  { %4084 = vrcp.f32 %v2055_v44 }
 0xfd7   :  { %4086 = vrcp.f32 %v2073_v48 }
 0xfd8   :  { %v4079_v38 = vpop.eup %4078  ;;  %4088 = vrcp.f32 %v2064_v20  ;;  %v3393_v20 = vld [vmem:[%s5161_s25 + $0x1c] sm:$0xf] }
 0xfd9   :  { %v2251_v3 = vpop.permute.xlu1 %2250  ;;  %v2310_v21 = vpop.permute.xlu0 %2309  ;;  %v2109_v25 = vmul.f32 %v4079_v38, %v4883_v46  ;;  %4090 = vrcp.f32 %v2070_v0 }
 0xfda   :  { %3775 = vmatprep.subr.bf16.mxu1 %v2251_v3  ;;  %3781 = vmatprep.subr.bf16.mxu0 %v2310_v21  ;;  %v4081_v49 = vpop.eup %4080 }
 0xfdb   :  { %3776 = vmatpush3.bf16.msra.mxu1 %v2251_v3  ;;  %v4083_v56 = vpop.eup %4082  ;;  %v2106_v8 = vmul.f32 %v4081_v49, %v4864_v54 }
 0xfdc   :  { %3909 = vmatprep.subr.msk.bf16.mxu1 %vm961_vm2, %v3390_v47  ;;  %v2108_v17 = vmul.f32 %v4083_v56, %v4856_v52  ;;  %v2564_v47 = vsel %vm961_vm2, %v3393_v20, 0 }
 0xfde   :  { %v2121_v51 = vpack.c.bf16 %v2109_v25, %v2108_v17  ;;  %v3403_v25 = vld [vmem:[%s5162_s26 + $0x1] ss:$0 sm:$0xff] }
 0xfe0   :  { %v4085_v11 = vpop.eup %4084 }
 0xfe1   :  { %v2107_v12 = vmul.f32 %v4085_v11, %v4897_v33  ;;  %v4087_v46 = vpop.eup %4086 }
 0xfe2   :  { %v4089_v52 = vpop.eup %4088  ;;  %v2113_v34 = vmul.f32 %v4087_v46, %v4889_v61 }
 0xfe3   :  { %v2120_v27 = vpack.c.bf16 %v2107_v12, %v2106_v8  ;;  %v4091_v45 = vpop.eup %4090  ;;  %v2110_v55 = vmul.f32 %v4089_v52, %v4881_v13 }
 0xfe4   :  { %v2112_v18 = vmul.f32 %v4091_v45, %v4860_v32 }
 0xfe5   :  { %3769 = vmatprep.mubr.msk.bf16.mxu0 %vm80_vm0, %v2120_v27 }
 0xfe6   :  { %3770 = vmatmul.mubr.msk.bf16.vlgmr.msra.gmra.mrb[40].mxu0 %vm80_vm0, %v2121_v51  ;;  %v2123_v4 = vpack.c.bf16 %v2113_v34, %v2112_v18 }
 0xfe7   :  { %3782 = vmatpush3.bf16.msra.mxu0 %v2310_v21 }
0x100a   :  { %v2067_v62 = vpop.xlane.xlu1 %2066 }
0x100b   :  { %4092 = vrcp.f32 %v2067_v62 }
0x100c   :  { %4094 = vrcp.f32 %v2085_v53 }
0x100d   :  { %4096 = vrcp.f32 %v2076_v40 }
0x100e   :  { %4098 = vrcp.f32 %v2082_v57  ;;  %v2079_v54 = vpop.xlane.xlu1 %2078 }
0x100f   :  { %4100 = vrcp.f32 %v2079_v54 }
0x1012   :  { %v2312_v28 = vpop.permute.xlu1 %2311 }
0x1013   :  { %3783 = vmatprep.subr.bf16.mxu0 %v2312_v28 }
0x1014   :  { %3784 = vmatpush3.bf16.msra.mxu0 %v2312_v28 }
0x1015   :  { %v4093_v33 = vpop.eup %4092 }
0x1016   :  { %v4095_v16 = vpop.eup %4094  ;;  %v2111_v23 = vmul.f32 %v4093_v33, %v4922_v59 }
0x1017   :  { %v4097_v10 = vpop.eup %4096  ;;  %v2117_v43 = vmul.f32 %v4095_v16, %v4903_v9 }
0x1018   :  { %v4099_v6 = vpop.eup %4098  ;;  %v2122_v36 = vpack.c.bf16 %v2111_v23, %v2110_v55  ;;  %v2114_v61 = vmul.f32 %v4097_v10, %v4895_v31 }
0x1019   :  { %v4101_v58 = vpop.eup %4100  ;;  %v2116_v13 = vmul.f32 %v4099_v6, %v4887_v29  ;;  %v3391_v29 = vld [vmem:[%s5161_s25 + $0x14] sm:$0xf] }
0x101a   :  { %3777 = vmatprep.mubr.msk.bf16.mxu1 %vm80_vm0, %v2122_v36  ;;  %v2115_v2 = vmul.f32 %v4101_v58, %v4926_v24  ;;  %v2448_v31 = vsel %vm961_vm2, %v3391_v29, 0 }
0x101b   :  { %3778 = vmatmul.mubr.msk.bf16.vlgmr.msra.gmra.mrb[32].mxu1 %vm80_vm0, %v2123_v4  ;;  %v2125_v32 = vpack.c.bf16 %v2117_v43, %v2116_v13 }
0x101c   :  { %v2124_v5 = vpack.c.bf16 %v2115_v2, %v2114_v61  ;;  %3790 = vmatpush3.bf16.msra.mxu1 %v2390_v41 }
0x101d   :  { %3910 = vmatprep.subr.msk.bf16.mxu1 %vm961_vm2, %v3391_v29 }
0x101e   :  { %3785 = vmatprep.mubr.msk.bf16.mxu0 %vm80_vm0, %v2124_v5 }
0x101f   :  { %3786 = vmatmul.mubr.msk.bf16.vlgmr.msra.gmra.mrb[44].mxu0 %vm80_vm0, %v2125_v32 }
0x1023   :  { %v3763_v9 = vpop.f32.mrb[28].mxu1 }
0x1024   :  { %v2172_v30 = vpop.f32.mrb[29].mxu1 }
0x1025   :  { %v3764_v22 = vpop.f32.mrb[30].mxu1 }
0x1026   :  { %v2371_v14 = vpack.c.bf16 %v3764_v22, %v3763_v9  ;;  %v2175_v26 = vpop.f32.mrb[31].mxu1 }
0x1027   :  { %v2370_v59 = vpack.c.bf16 %v2175_v26, %v2172_v30  ;;  %v3931_v26 = vld [vmem:[%s5119_s10 + $0x18] sm:$0xff]  }
0x1029   :  { %3791 = vmatprep.mubr.msk.bf16.mxu1 %vm258_vm1, %v2370_v59 }
0x102a   :  { %3792 = vmatmul.mubr.msk.bf16.vlgmr.msra.gmra.mrb[36].mxu1 %vm258_vm1, %v2371_v14  ;;  %v3930_v14 = vld [vmem:[%s5119_s10 + $0x10] sm:$0xff]  }
0x102b   :  { %3796 = vmatpush3.bf16.msra.mxu1 %v2448_v31  ;;  %3813 = vmatprep.subr.bf16.mxu0 %v3930_v14 }
0x102c   :  { %3911 = vmatprep.subr.msk.bf16.mxu1 %vm961_vm2, %v3392_v15  ;;  %3814 = vmatpush3.bf16.msra.mxu0 %v3930_v14 }
0x102d   :  { %3815 = vmatprep.subr.bf16.mxu0 %v3931_v26 }
0x1030   :  { %3816 = vmatpush3.bf16.msra.mxu0 %v3931_v26 }
0x10b9   :  { %v3771_v24 = vpop.f32.mrb[40].mxu0 }
0x10ba   :  { %v2233_v63 = vpop.f32.mrb[41].mxu0 }
0x10bb   :  { %v3772_v7 = vpop.f32.mrb[42].mxu0 }
0x10bc   :  { %v2373_v0 = vpack.c.bf16 %v3772_v7, %v3771_v24  ;;  %v2236_v60 = vpop.f32.mrb[43].mxu0 }
0x10bd   :  { %v2372_v1 = vpack.c.bf16 %v2236_v60, %v2233_v63 }
0x10bf   :  { %3797 = vmatprep.mubr.msk.bf16.mxu1 %vm258_vm1, %v2372_v1 }
0x10c0   :  { %3798 = vmatmul.mubr.msk.bf16.vlgmr.msra.gmra.mrb[36].mxu1 %vm258_vm1, %v2373_v0 }
0x10c1   :  { %3802 = vmatpush3.bf16.msra.mxu1 %v2506_v42 }
0x10c2   :  { %3912 = vmatprep.subr.msk.bf16.mxu1 %vm961_vm2, %v3393_v20 }
0x10ee   :  { %v3779_v50 = vpop.f32.mrb[32].mxu1 }
0x10ef   :  { %v2294_v57 = vpop.f32.mrb[33].mxu1 }
0x10f0   :  { %v3780_v48 = vpop.f32.mrb[34].mxu1 }
0x10f1   :  { %v2375_v40 = vpack.c.bf16 %v3780_v48, %v3779_v50  ;;  %v2297_v44 = vpop.f32.mrb[35].mxu1 }
0x10f2   :  { %v2374_v53 = vpack.c.bf16 %v2297_v44, %v2294_v57  ;;  %v3787_v3 = vpop.f32.mrb[44].mxu0  ;;  %v3406_v57 = vld [vmem:[%s5120_s8 + $0x1] ss:$0 sm:$0xff] }
0x10f3   :  { %v2355_v21 = vpop.f32.mrb[45].mxu0 }
0x10f4   :  { %v3788_v38 = vpop.f32.mrb[46].mxu0  ;;  %3803 = vmatprep.mubr.msk.bf16.mxu1 %vm258_vm1, %v2374_v53 }
0x10f5   :  { %v2377_v49 = vpack.c.bf16 %v3788_v38, %v3787_v3  ;;  %v2358_v56 = vpop.f32.mrb[47].mxu0  ;;  %3804 = vmatmul.mubr.msk.bf16.vlgmr.msra.gmra.mrb[36].mxu1 %vm258_vm1, %v2375_v40 }
0x10f6   :  { %v2376_v11 = vpack.c.bf16 %v2358_v56, %v2355_v21  ;;  %3808 = vmatpush3.bf16.msra.mxu1 %v2564_v47  ;;  %v3407_v21 = vld [vmem:[%s5121_s9 + $0x1] ss:$0 sm:$0xff] }
0x10f8   :  { %3809 = vmatprep.mubr.msk.bf16.mxu1 %vm258_vm1, %v2376_v11 }
0x1101   :  { %3810 = vmatmul.mubr.msk.bf16.vlgmr.msra.gmra.mrb[36].mxu1 %vm258_vm1, %v2377_v49 }
0x11d4   :  { %v3811_v8 = vpop.f32.mrb[36].mxu1 }
0x11d5   :  { %v2600_v12 = vpop.f32.mrb[37].mxu1  ;;  %v2641_v17 = vadd.f32 %v3811_v8, %v3403_v25 }
0x11d6   :  { %v2639_v27 = vadd.f32 %v3403_v25, %v2600_v12  ;;  %v3812_v51 = vpop.f32.mrb[38].mxu1 }
0x11d7   :  { %v2603_v62 = vpop.f32.mrb[39].mxu1  ;;  %v2645_v28 = vadd.f32 %v2641_v17, %v4685_v39  ;;  %v2642_v52 = vadd.f32 %v3812_v51, %v3403_v25 }
0x11d8   :  { %v2643_v54 = vadd.f32 %v2639_v27, %v4678_v35  ;;  %v2640_v46 = vadd.f32 %v3403_v25, %v2603_v62 }
0x11d9   :  { %v2646_v16 = vadd.f32 %v2642_v52, %v4687_v19  ;;  %v2657_v55 = vsel %vm80_vm0, %v2645_v28, 0.0  ;;  %v3935_v52 = vld [vmem:[%s5122_s12 + $0x38] sm:$0xff]  }
0x11da   :  { %v2644_v45 = vadd.f32 %v2640_v46, %v4680_v37  ;;  %v2651_v33 = vsel %vm80_vm0, %v2643_v54, 0.0  ;;  %v3933_v46 = vld [vmem:[%s5122_s12 + $0x28] sm:$0xff]  }
0x11db   :  { %2652 = vadd.xlane.f32.xlu0 %v2651_v33  ;;  %v2660_v23 = vsel %vm80_vm0, %v2646_v16, 0.0 }
0x11dc   :  { %v2654_v34 = vsel %vm80_vm0, %v2644_v45, 0.0 }
0x11dd   :  { %2655 = vadd.xlane.f32.xlu1 %v2654_v34 }
0x11df   :  { %2658 = vadd.xlane.f32.xlu0 %v2657_v55 }
0x11e3   :  { %2661 = vadd.xlane.f32.xlu0 %v2660_v23 }
0x1268   :  { %v2653_v35 = vpop.xlane.xlu0 %2652 }
0x1269   :  { %v2663_v10 = vmul.f32 0.03125, %v2653_v35 }
0x126a   :  { %v2656_v39 = vpop.xlane.xlu1 %2655 }
0x126b   :  { %v2667_v18 = vsub.f32 %v2643_v54, %v2663_v10  ;;  %v2664_v6 = vmul.f32 0.03125, %v2656_v39  ;;  %v3932_v54 = vld [vmem:[%s5122_s12 + $0x20] sm:$0xff]  }
0x126c   :  { %v2659_v37 = vpop.xlane.xlu0 %2658  ;;  %3821 = vmatprep.subr.bf16.mxu0 %v3932_v54 }
0x126d   :  { %v2668_v36 = vsub.f32 %v2644_v45, %v2664_v6  ;;  %v2665_v58 = vmul.f32 0.03125, %v2659_v37  ;;  %v2671_v43 = vmul.f32 %v2667_v18, %v2667_v18  ;;  %v3413_v45 = vld [vmem:[%s5123_s11 + $0x1] ss:$0 sm:$0xff] }
0x126f   :  { %v2669_v4 = vsub.f32 %v2645_v28, %v2665_v58  ;;  %v2675_v41 = vsel %vm80_vm0, %v2671_v43, 0.0  ;;  %v2672_v61 = vmul.f32 %v2668_v36, %v2668_v36  ;;  %v3934_v28 = vld [vmem:[%s5122_s12 + $0x30] sm:$0xff]  }
0x1270   :  { %2676 = vadd.xlane.f32.xlu0 %v2675_v41  ;;  %v2662_v19 = vpop.xlane.xlu0 %2661 }
0x1271   :  { %v2666_v2 = vmul.f32 0.03125, %v2662_v19  ;;  %v2678_v13 = vsel %vm80_vm0, %v2672_v61, 0.0  ;;  %v2673_v5 = vmul.f32 %v2669_v4, %v2669_v4 }
0x1272   :  { %2679 = vadd.xlane.f32.xlu1 %v2678_v13 }
0x1273   :  { %v2670_v32 = vsub.f32 %v2646_v16, %v2666_v2  ;;  %v2681_v9 = vsel %vm80_vm0, %v2673_v5, 0.0 }
0x1274   :  { %2682 = vadd.xlane.f32.xlu0 %v2681_v9 }
0x1275   :  { %v2674_v30 = vmul.f32 %v2670_v32, %v2670_v32 }
0x1277   :  { %v2684_v22 = vsel %vm80_vm0, %v2674_v30, 0.0 }
0x1278   :  { %2685 = vadd.xlane.f32.xlu1 %v2684_v22 }
0x12fd   :  { %v2677_v59 = vpop.xlane.xlu0 %2676 }
0x12fe   :  { %v2687_v29 = vmul.f32 0.03125, %v2677_v59 }
0x12ff   :  { %v2680_v31 = vpop.xlane.xlu1 %2679 }
0x1300   :  { %v2691_v15 = vadd.f32 1e-05, %v2687_v29  ;;  %v2688_v24 = vmul.f32 0.03125, %v2680_v31 }
0x1301   :  { %v2683_v63 = vpop.xlane.xlu0 %2682 }
0x1302   :  { %4102 = vrsqrt.f32 %v2691_v15  ;;  %v2692_v7 = vadd.f32 1e-05, %v2688_v24  ;;  %v2689_v0 = vmul.f32 0.03125, %v2683_v63 }
0x1304   :  { %4104 = vrsqrt.f32 %v2692_v7  ;;  %v2693_v60 = vadd.f32 1e-05, %v2689_v0 }
0x1305   :  { %v2686_v1 = vpop.xlane.xlu1 %2685 }
0x1306   :  { %4106 = vrsqrt.f32 %v2693_v60  ;;  %v2690_v42 = vmul.f32 0.03125, %v2686_v1 }
0x1308   :  { %v2694_v20 = vadd.f32 1e-05, %v2690_v42 }
0x130a   :  { %4108 = vrsqrt.f32 %v2694_v20 }
0x130c   :  { %v4103_v50 = vpop.eup %4102 }
0x130d   :  { %v2699_v48 = vmul.f32 %v4103_v50, %v2667_v18 }
0x130e   :  { %v4105_v40 = vpop.eup %4104 }
0x130f   :  { %v2700_v44 = vmul.f32 %v4105_v40, %v2668_v36  ;;  %v2709_v53 = vmul.f32 %v3406_v57, %v2699_v48 }
0x1310   :  { %v4107_v3 = vpop.eup %4106 }
0x1311   :  { %v2701_v47 = vmul.f32 %v4107_v3, %v2669_v4  ;;  %v2710_v38 = vmul.f32 %v3406_v57, %v2700_v44  ;;  %v5005_v49 = vadd.f32 %v3407_v21, %v2709_v53 }
0x1313   :  { %v5007_v56 = vadd.f32 %v3407_v21, %v2710_v38  ;;  %v2711_v25 = vmul.f32 %v3406_v57, %v2701_v47 }
0x1314   :  { %v4109_v11 = vpop.eup %4108 }
0x1315   :  { %v2702_v8 = vmul.f32 %v4109_v11, %v2670_v32  ;;  %v2723_v12 = vpack.c.bf16 %v5007_v56, %v5005_v49  ;;  %v5012_v27 = vadd.f32 %v3407_v21, %v2711_v25 }
0x1317   :  { %v2712_v17 = vmul.f32 %v3406_v57, %v2702_v8  ;;  %3817 = vmatprep.mubr.msk.bf16.mxu0 %vm80_vm0, %v2723_v12 }
0x1319   :  { %v5014_v51 = vadd.f32 %v3407_v21, %v2712_v17  ;;  %v3427_v21 = vld [vmem:[%s5124_s13 + $0x1] ss:$0 sm:$0xff] }
0x131b   :  { %v2724_v62 = vpack.c.bf16 %v5014_v51, %v5012_v27 }
0x131d   :  { %3818 = vmatmul.mubr.msk.bf16.vlgmr.msra.gmra.mrb[48].mxu0 %vm80_vm0, %v2724_v62 }
0x131e   :  { %3822 = vmatpush3.bf16.msra.mxu0 %v3932_v54 }
0x131f   :  { %3823 = vmatprep.subr.bf16.mxu0 %v3933_v46 }
0x1322   :  { %3824 = vmatpush3.bf16.msra.mxu0 %v3933_v46 }
0x1323   :  { %3825 = vmatprep.subr.bf16.mxu0 %v3934_v28 }
0x1326   :  { %3826 = vmatpush3.bf16.msra.mxu0 %v3934_v28 }
0x1327   :  { %3827 = vmatprep.subr.bf16.mxu0 %v3935_v52 }
0x132a   :  { %3828 = vmatpush3.bf16.msra.mxu0 %v3935_v52 }
0x13f0   :  { %v3819_v33 = vpop.f32.mrb[48].mxu0 }
0x13f1   :  { %v2799_v34 = vadd.f32 %v3819_v33, %v3413_v45  ;;  %v2790_v16 = vpop.f32.mrb[49].mxu0 }
0x13f2   :  { %v2791_v55 = vadd.f32 %v3413_v45, %v2790_v16  ;;  %v3820_v23 = vpop.f32.mrb[50].mxu0 }
0x13f3   :  { %v2807_v35 = vmul.f32 %v2799_v34, %v2799_v34  ;;  %v2802_v10 = vadd.f32 %v3820_v23, %v3413_v45  ;;  %v2793_v39 = vpop.f32.mrb[51].mxu0 }
0x13f4   :  { %v2805_v18 = vmul.f32 %v2791_v55, %v2791_v55  ;;  %v2794_v6 = vadd.f32 %v3413_v45, %v2793_v39 }
0x13f5   :  { %v2811_v37 = vmul.f32 %v2807_v35, %v2799_v34  ;;  %v2808_v36 = vmul.f32 %v2802_v10, %v2802_v10 }
0x13f6   :  { %v2809_v58 = vmul.f32 %v2805_v18, %v2791_v55  ;;  %v2806_v43 = vmul.f32 %v2794_v6, %v2794_v6 }
0x13f7   :  { %v2815_v4 = vmul.f32 0.044715, %v2811_v37  ;;  %v2812_v41 = vmul.f32 %v2808_v36, %v2802_v10 }
0x13f8   :  { %v2813_v61 = vmul.f32 0.044715, %v2809_v58  ;;  %v2810_v19 = vmul.f32 %v2806_v43, %v2794_v6 }
0x13f9   :  { %v2819_v2 = vadd.f32 %v2815_v4, %v2799_v34  ;;  %v2816_v13 = vmul.f32 0.044715, %v2812_v41 }
0x13fa   :  { %v2817_v5 = vadd.f32 %v2813_v61, %v2791_v55  ;;  %v2814_v32 = vmul.f32 0.044715, %v2810_v19 }
0x13fb   :  { %v2823_v9 = vmul.f32 0.7978846, %v2819_v2  ;;  %v2820_v30 = vadd.f32 %v2816_v13, %v2802_v10  ;;  %v3936_v13 = vld [vmem:[%s5127_s20] sm:$0xff]  }
0x13fc   :  { %v2821_v22 = vmul.f32 0.7978846, %v2817_v5  ;;  %v2818_v14 = vadd.f32 %v2814_v32, %v2794_v6  ;;  %3833 = vmatprep.subr.bf16.mxu0 %v3936_v13  ;;  %v3937_v5 = vld [vmem:[%s5127_s20 + $0x8] sm:$0xff]   ;;  %v4139_v32 = vmov 0.0  }
0x13fd   :  { %4110 = vtanh.f32 %v2823_v9  ;;  %v2824_v26 = vmul.f32 0.7978846, %v2820_v30  ;;  %3841 = vmatprep.subr.bf16.mxu1 %v4139_v32  ;;  %3845 = vmatprep.mubr.msk.bf16.mxu1 %vm4140_vm4, %v4139_v32 }
0x13fe   :  { %4112 = vtanh.f32 %v2821_v22  ;;  %v2822_v59 = vmul.f32 0.7978846, %v2818_v14 }
0x13ff   :  { %4114 = vtanh.f32 %v2824_v26 }
0x1400   :  { %4116 = vtanh.f32 %v2822_v59 }
0x1407   :  { %v4111_v29 = vpop.eup %4110 }
0x1408   :  { %v4113_v31 = vpop.eup %4112  ;;  %v2831_v15 = vadd.f32 1.0, %v4111_v29 }
0x1409   :  { %v4115_v24 = vpop.eup %4114  ;;  %v2829_v63 = vadd.f32 1.0, %v4113_v31 }
0x140a   :  { %v4117_v7 = vpop.eup %4116  ;;  %v2835_v0 = vmul.f32 0.5, %v2831_v15  ;;  %v2832_v60 = vadd.f32 1.0, %v4115_v24 }
0x140b   :  { %v2833_v1 = vmul.f32 0.5, %v2829_v63  ;;  %v2830_v42 = vadd.f32 1.0, %v4117_v7 }
0x140c   :  { %v2836_v20 = vmul.f32 0.5, %v2832_v60  ;;  %v2839_v57 = vmul.f32 %v2835_v0, %v2799_v34  ;;  %v3119_v0 = vlaneseq }
0x140d   :  { %v2834_v50 = vmul.f32 0.5, %v2830_v42  ;;  %v2837_v40 = vmul.f32 %v2833_v1, %v2791_v55  ;;  %v3436_v1 = vld [vmem:[%s5125_s14 + $0x1] ss:$0 sm:$0xff] }
0x140e   :  { %v2840_v48 = vmul.f32 %v2836_v20, %v2802_v10  ;;  %v3122_v42 = vshrl.u32 %v3119_v0, 7 }
0x140f   :  { %v2838_v44 = vmul.f32 %v2834_v50, %v2794_v6 }
0x1410   :  { %v2842_v53 = vpack.c.bf16 %v2840_v48, %v2839_v57 }
0x1411   :  { %v2841_v3 = vpack.c.bf16 %v2838_v44, %v2837_v40  ;;  %v3437_v44 = vld [vmem:[%s5126_s15 + $0x1] ss:$0 sm:$0xff] }
0x1413   :  { %3829 = vmatprep.mubr.msk.bf16.mxu0 %vm1450_vm3, %v2841_v3  ;;  %v3123_v3 = vmul.u32 8, %v3122_v42 }
0x1414   :  { %3830 = vmatmul.mubr.msk.bf16.vlgmr.msra.gmra.mrb[52].mxu0 %vm1450_vm3, %v2842_v53  ;;  %v3120_v53 = vand.u32 127, %v3119_v0 }
0x1415   :  { %3834 = vmatpush3.bf16.msra.mxu0 %v3936_v13 }
0x1416   :  { %3835 = vmatprep.subr.bf16.mxu0 %v3937_v5  ;;  %vm3124_vm5 = vcmp.eq.s32.totalorder %v3120_v53, %v3123_v3 }
0x1419   :  { %3836 = vmatpush3.bf16.msra.mxu0 %v3937_v5 }
0x141a   :  { %3849 = vmatprep.subr.bf16.mxu0 %v4139_v32 }
0x14e7   :  { %v3831_v47 = vpop.f32.mrb[52].mxu0 }
0x14e8   :  { %v2924_v38 = vpop.f32.mrb[53].mxu0  ;;  %v2933_v11 = vadd.f32 %v3831_v47, %v3427_v21 }
0x14e9   :  { %v2925_v25 = vadd.f32 %v3427_v21, %v2924_v38  ;;  %v3832_v8 = vpop.f32.mrb[54].mxu0 }
0x14ea   :  { %v2927_v12 = vpop.f32.mrb[55].mxu0  ;;  %v2936_v62 = vadd.f32 %v3832_v8, %v3427_v21  ;;  %v2941_v46 = vadd.f32 %v2933_v11, %v5012_v27 }
0x14eb   :  { %v2939_v17 = vadd.f32 %v2925_v25, %v5005_v49  ;;  %v2928_v54 = vadd.f32 %v3427_v21, %v2927_v12 }
0x14ec   :  { %v2942_v45 = vadd.f32 %v2936_v62, %v5014_v51  ;;  %v2953_v34 = vsel %vm80_vm0, %v2941_v46, 0.0 }
0x14ed   :  { %v2940_v28 = vadd.f32 %v2928_v54, %v5007_v56  ;;  %v2947_v52 = vsel %vm80_vm0, %v2939_v17, 0.0 }
0x14ee   :  { %2948 = vadd.xlane.f32.xlu0 %v2947_v52  ;;  %v2956_v16 = vsel %vm80_vm0, %v2942_v45, 0.0  ;;  %v3938_v52 = vld [vmem:[%s5128_s16] sm:$0xff]  }
0x14ef   :  { %v2950_v33 = vsel %vm80_vm0, %v2940_v28, 0.0 }
0x14f0   :  { %2951 = vadd.xlane.f32.xlu1 %v2950_v33 }
0x14f2   :  { %2954 = vadd.xlane.f32.xlu0 %v2953_v34  ;;  %v3939_v34 = vld [vmem:[%s5128_s16 + $0x8] sm:$0xff]  }
0x14f4   :  { %2957 = vadd.xlane.f32.xlu1 %v2956_v16 }
0x157b   :  { %v2949_v49 = vpop.xlane.xlu0 %2948 }
0x157c   :  { %v2959_v55 = vmul.f32 0.03125, %v2949_v49  ;;  %v3438_v49 = vld [vmem:[%s5129_s21] ss:$0 sm:$0xff] }
0x157d   :  { %v2952_v23 = vpop.xlane.xlu1 %2951 }
0x157e   :  { %v2963_v27 = vsub.f32 %v2939_v17, %v2959_v55  ;;  %v2960_v35 = vmul.f32 0.03125, %v2952_v23 }
0x157f   :  { %v2955_v56 = vpop.xlane.xlu0 %2954 }
0x1580   :  { %v2964_v10 = vsub.f32 %v2940_v28, %v2960_v35  ;;  %v2961_v39 = vmul.f32 0.03125, %v2955_v56  ;;  %v2967_v18 = vmul.f32 %v2963_v27, %v2963_v27  ;;  %v3447_v28 = vsel %vm3124_vm5, 1.0, %v4139_v32 }
0x1581   :  { %v2958_v6 = vpop.xlane.xlu1 %2957  ;;  %v3127_v33 = vpack.c.bf16 %v3447_v28, %v3447_v28 }
0x1582   :  { %v2965_v51 = vsub.f32 %v2941_v46, %v2961_v39  ;;  %v2962_v37 = vmul.f32 0.03125, %v2958_v6  ;;  %v2971_v36 = vsel %vm80_vm0, %v2967_v18, 0.0  ;;  %v2968_v58 = vmul.f32 %v2964_v10, %v2964_v10 }
0x1583   :  { %2972 = vadd.xlane.f32.xlu0 %v2971_v36 }
0x1584   :  { %v2966_v43 = vsub.f32 %v2942_v45, %v2962_v37  ;;  %v2974_v4 = vsel %vm80_vm0, %v2968_v58, 0.0  ;;  %v2969_v41 = vmul.f32 %v2965_v51, %v2965_v51 }
0x1585   :  { %2975 = vadd.xlane.f32.xlu1 %v2974_v4  ;;  %v3940_v4 = vld [vmem:[%s5131_s18] sm:$0xff]  }
0x1586   :  { %v2977_v61 = vsel %vm80_vm0, %v2969_v41, 0.0  ;;  %v2970_v19 = vmul.f32 %v2966_v43, %v2966_v43  ;;  %v3941_v41 = vld [vmem:[%s5131_s18 + $0x8] sm:$0xff]  }
0x1587   :  { %2978 = vadd.xlane.f32.xlu0 %v2977_v61  ;;  %v3449_v61 = vld [vmem:[%s5132_s17] ss:$0 sm:$0xff] }
0x1588   :  { %v2980_v2 = vsel %vm80_vm0, %v2970_v19, 0.0 }
0x1589   :  { %2981 = vadd.xlane.f32.xlu1 %v2980_v2 }
0x1610   :  { %v2973_v9 = vpop.xlane.xlu0 %2972 }
0x1611   :  { %v2983_v30 = vmul.f32 0.03125, %v2973_v9 }
0x1612   :  { %v2976_v22 = vpop.xlane.xlu1 %2975 }
0x1613   :  { %v2987_v14 = vadd.f32 1e-05, %v2983_v30  ;;  %v2984_v26 = vmul.f32 0.03125, %v2976_v22 }
0x1614   :  { %v2979_v59 = vpop.xlane.xlu0 %2978 }
0x1615   :  { %4118 = vrsqrt.f32 %v2987_v14  ;;  %v2988_v29 = vadd.f32 1e-05, %v2984_v26  ;;  %v2985_v31 = vmul.f32 0.03125, %v2979_v59 }
0x1616   :  { %v2982_v15 = vpop.xlane.xlu1 %2981 }
0x1617   :  { %4120 = vrsqrt.f32 %v2988_v29  ;;  %v2989_v24 = vadd.f32 1e-05, %v2985_v31  ;;  %v2986_v63 = vmul.f32 0.03125, %v2982_v15 }
0x1619   :  { %4122 = vrsqrt.f32 %v2989_v24  ;;  %v2990_v7 = vadd.f32 1e-05, %v2986_v63 }
0x161b   :  { %4124 = vrsqrt.f32 %v2990_v7 }
0x161f   :  { %v4119_v60 = vpop.eup %4118 }
0x1620   :  { %v2995_v20 = vmul.f32 %v4119_v60, %v2963_v27 }
0x1621   :  { %v4121_v50 = vpop.eup %4120 }
0x1622   :  { %v2996_v57 = vmul.f32 %v4121_v50, %v2964_v10  ;;  %v3005_v48 = vmul.f32 %v3436_v1, %v2995_v20 }
0x1623   :  { %v4123_v40 = vpop.eup %4122 }
0x1624   :  { %v2997_v21 = vmul.f32 %v4123_v40, %v2965_v51  ;;  %v3006_v47 = vmul.f32 %v3436_v1, %v2996_v57  ;;  %v3015_v8 = vadd.f32 %v3437_v44, %v3005_v48 }
0x1625   :  { %v4125_v38 = vpop.eup %4124 }
0x1626   :  { %v3007_v11 = vmul.f32 %v3436_v1, %v2997_v21  ;;  %v2998_v25 = vmul.f32 %v4125_v38, %v2966_v43  ;;  %v3016_v12 = vadd.f32 %v3437_v44, %v3006_v47 }
0x1628   :  { %v3008_v17 = vmul.f32 %v3436_v1, %v2998_v25  ;;  %v3019_v62 = vpack.c.bf16 %v3016_v12, %v3015_v8  ;;  %v3017_v54 = vadd.f32 %v3437_v44, %v3007_v11 }
0x162a   :  { %3837 = vmatprep.mubr.msk.bf16.mxu0 %vm80_vm0, %v3019_v62  ;;  %3842 = vmatpush3.bf16.msra.mxu1 %v3019_v62  ;;  %v3018_v46 = vadd.f32 %v3437_v44, %v3008_v17 }
0x162b   :  { %3843 = vmatprep.subr.bf16.mxu1 %v4139_v32 }
0x162c   :  { %v3020_v45 = vpack.c.bf16 %v3018_v46, %v3017_v54 }
0x162e   :  { %3838 = vmatmul.mubr.msk.bf16.vlgmr.msra.gmra.mrb[56].mxu0 %vm80_vm0, %v3020_v45  ;;  %3844 = vmatpush3.bf16.msra.mxu1 %v3020_v45 }
0x162f   :  { %3850 = vmatpush3.bf16.msra.mxu0 %v3938_v52  ;;  %3853 = vmatprep.mubr.msk.bf16.mxu0 %vm4140_vm4, %v4139_v32 }
0x1630   :  { %3851 = vmatprep.subr.bf16.mxu0 %v4139_v32  ;;  %3857 = vmatprep.subr.bf16.mxu1 %v4139_v32 }
0x1631   :  { %3846 = vmatmul.mubr.msk.bf16.vlgmr.msra.gmra.mrb[40].mxu1 %vm80_vm0, %v3127_v33 }
0x1632   :  { %3861 = vmatprep.mubr.msk.bf16.mxu1 %vm4140_vm4, %v4139_v32  ;;  %3858 = vmatpush3.bf16.msra.mxu1 %v3940_v4 }
0x1633   :  { %3852 = vmatpush3.bf16.msra.mxu0 %v3939_v34  ;;  %3859 = vmatprep.subr.bf16.mxu1 %v4139_v32  ;;  %v3453_v32 = vld [vmem:[%s5133_s19] ss:$0 sm:$0xff] }
0x1636   :  { %3860 = vmatpush3.bf16.msra.mxu1 %v3941_v41 }
0x1701   :  { %v3839_v16 = vpop.f32.mrb[56].mxu0 }
0x1702   :  { %v3084_v55 = vpop.f32.mrb[57].mxu0  ;;  %v3093_v27 = vadd.f32 %v3839_v16, %v3438_v49 }
0x1703   :  { %v3840_v23 = vpop.f32.mrb[58].mxu0  ;;  %v3085_v39 = vadd.f32 %v3438_v49, %v3084_v55 }
0x1704   :  { %v3096_v35 = vadd.f32 %v3840_v23, %v3438_v49  ;;  %v3087_v56 = vpop.f32.mrb[59].mxu0  ;;  %v3165_v10 = vpop.f32.mrb[40].mxu1 }
0x1705   :  { %v3088_v18 = vadd.f32 %v3438_v49, %v3087_v56  ;;  %v3171_v6 = vpack.c.bf16 %v3165_v10, %v3165_v10  ;;  %v3847_v51 = vpop.f32.mrb[41].mxu1 }
0x1706   :  { %v3469_v37 = vpack.c.bf16 %v3096_v35, %v3093_v27  ;;  %v3168_v36 = vpop.f32.mrb[42].mxu1 }
0x1707   :  { %v3464_v58 = vpack.c.bf16 %v3088_v18, %v3085_v39  ;;  %v3848_v43 = vpop.f32.mrb[43].mxu1  ;;  %3854 = vmatmul.mubr.msk.bf16.vlgmr.msra.gmra.mrb[60].mxu0 %vm80_vm0, %v3171_v6 }
0x1708   :  { %3471 = vst [vmem:[%s5130_s23 + $0x8] sm:$0xff] %v3469_v37  }
0x1709   :  { %3465 = vst [vmem:[%s5130_s23] sm:$0xff] %v3464_v58  }
0x17da   :  { %v3232_v19 = vpop.f32.mrb[60].mxu0 }
0x17db   :  { %v3233_v2 = vadd.f32 %v3449_v61, %v3232_v19  ;;  %v3855_v13 = vpop.f32.mrb[61].mxu0 }
0x17dc   :  { %v3235_v5 = vpop.f32.mrb[62].mxu0 }
0x17dd   :  { %4126 = vtanh.f32 %v3233_v2  ;;  %v3856_v9 = vpop.f32.mrb[63].mxu0 }
0x17e7   :  { %v4127_v30 = vpop.eup %4126 }
0x17e8   :  { %v3239_v22 = vpack.c.bf16 %v4127_v30, %v4127_v30 }
0x17ea   :  { %3862 = vmatmul.mubr.msk.bf16.vlgmr.msra.gmra.mrb[44].mxu1 %vm80_vm0, %v3239_v22 }
0x18bd   :  { %v3300_v14 = vpop.f32.mrb[44].mxu1 }
0x18be   :  { %v3301_v26 = vadd.f32 %v3453_v32, %v3300_v14  ;;  %v3863_v59 = vpop.f32.mrb[45].mxu1 }
0x18bf   :  { %v3303_v29 = vpop.f32.mrb[46].mxu1 }
0x18c0   :  { %4128 = vtanh.f32 %v3301_v26  ;;  %v3864_v31 = vpop.f32.mrb[47].mxu1 }
0x18ca   :  { %v4129_v15 = vpop.eup %4128 }
0x18cb   :  { %3307 = vst [vmem:[%s5134_s22] sm:$0xf] %v4129_v15 }

</bundles_post_ra>
